<compile_context>
chip_gen: v5e
topology: v5e:2x2
jax: 0.10.0
libtpu: 0.0.40
codegen_flags: <defaults>
</compile_context>

<pallas_src>
import functools
import math

import jax
import jax.numpy as jnp
from jax import lax
from jax.experimental import pallas as pl
from jax.experimental.pallas import tpu as pltpu


def _mbconv_kernel(
    x_ref, w_exp_ref, b0_ref,
    w_dw_ref, b1_ref,
    w_sr_ref, b_sr_ref, w_se_ref, b_se_ref,
    w_p_ref, b2_ref,
    o_ref,
    pad_ref,
    *, H, W, K, stride, pad_t, pad_l, H_pad, W_pad, H_out, W_out,
    has_expand, has_se, use_skip,
):
    f32 = jnp.float32
    x_in = x_ref[0]  # (H*W, C_in) bf16

    # ---- expand 1x1 conv (bf16 MXU, BN0 scale pre-folded into weights) + swish ----
    if has_expand:
        h = jnp.dot(x_in, w_exp_ref[...], preferred_element_type=f32)
        h = h + b0_ref[...]
        h = h * jax.nn.sigmoid(h)
    else:
        h = x_in.astype(f32)
    c_exp = h.shape[-1]

    # ---- stage halo-padded activation in VMEM; zero only the thin halo strips ----
    pad_b = H_pad - H - pad_t
    pad_r = W_pad - W - pad_l
    if pad_t > 0:
        pad_ref[0:pad_t, :, :] = jnp.zeros((pad_t, W_pad, c_exp), f32)
    if pad_b > 0:
        pad_ref[pad_t + H:H_pad, :, :] = jnp.zeros((pad_b, W_pad, c_exp), f32)
    if pad_l > 0:
        pad_ref[:, 0:pad_l, :] = jnp.zeros((H_pad, pad_l, c_exp), f32)
    if pad_r > 0:
        pad_ref[:, pad_l + W:W_pad, :] = jnp.zeros((H_pad, pad_r, c_exp), f32)
    pad_ref[pad_t:pad_t + H, pad_l:pad_l + W, :] = h.reshape(H, W, c_exp)

    # ---- depthwise KxK conv (BN1 scale pre-folded into taps), value accumulation ----
    wd = w_dw_ref[...]  # (K*K, C_exp) f32, already scaled by BN1
    if stride == 1:
        hd, wdd = H_out, W_out
    else:
        # dense stride-1 accumulation, decimate once at the end
        hd = (H_out - 1) * stride + 1
        wdd = (W_out - 1) * stride + 1
    acc = None
    for kh in range(K):
        for kw in range(K):
            win = pad_ref[kh:kh + hd, kw:kw + wdd, :]
            tap = wd[kh * K + kw:kh * K + kw + 1, :].reshape(1, 1, c_exp)
            contrib = win * tap
            acc = contrib if acc is None else acc + contrib
    if stride != 1:
        acc = acc[::stride, ::stride, :]

    xdw = acc.reshape(H_out * W_out, c_exp)
    xdw = xdw + b1_ref[...]
    xdw = xdw * jax.nn.sigmoid(xdw)

    # ---- squeeze & excite (tiny, f32) ----
    if has_se:
        pooled = jnp.mean(xdw, axis=0, keepdims=True)  # (1, C_exp)
        se = jnp.dot(pooled, w_sr_ref[...], preferred_element_type=f32) + b_sr_ref[...]
        se = se * jax.nn.sigmoid(se)
        se = jnp.dot(se, w_se_ref[...], preferred_element_type=f32) + b_se_ref[...]
        xdw = xdw * jax.nn.sigmoid(se)

    # ---- project 1x1 conv (bf16 MXU, BN2 scale pre-folded) + bias ----
    y = jnp.dot(xdw.astype(jnp.bfloat16), w_p_ref[...], preferred_element_type=f32)
    y = y + b2_ref[...]

    # ---- identity skip (f32) ----
    if use_skip:
        y = y + x_in.astype(f32)

    o_ref[0] = y.astype(o_ref.dtype)


def _fold_bn(gamma, beta, mean, var, eps):
    scale = gamma / jnp.sqrt(var + eps)
    bias = beta - mean * scale
    return scale, bias


def mbconv_forward(x_nchw, params, *, kernel_size, stride, expand_ratio,
                   se_ratio, id_skip, bn_eps):
    N, C_in, H, W = x_nchw.shape
    has_expand = expand_ratio != 1
    C_exp = C_in * expand_ratio
    C_out = params["w_proj"].shape[0]
    has_se = se_ratio is not None and 0 < se_ratio <= 1
    use_skip = bool(id_skip and stride == 1 and C_in == C_out)

    K = kernel_size
    # TF "SAME" padding as in Conv2dStaticSamePadding (dilation=1).
    oh, ow = math.ceil(H / stride), math.ceil(W / stride)
    pad_h = max((oh - 1) * stride + K - H, 0)
    pad_w = max((ow - 1) * stride + K - W, 0)
    pad_t, pad_l = pad_h // 2, pad_w // 2
    H_pad, W_pad = H + pad_h, W + pad_w
    H_out = (H_pad - K) // stride + 1
    W_out = (W_pad - K) // stride + 1

    f32, bf16 = jnp.float32, jnp.bfloat16

    # NCHW -> NHWC-flat (N, H*W, C), bf16 for DMA + MXU.
    x2 = jnp.transpose(x_nchw, (0, 2, 3, 1)).reshape(N, H * W, C_in).astype(bf16)

    if has_expand:
        s0, b0 = _fold_bn(params["bn0_gamma"], params["bn0_beta"],
                          params["bn0_mean"], params["bn0_var"], bn_eps)
        w_exp = (jnp.transpose(params["w_expand"][:, :, 0, 0], (1, 0))
                 * s0.reshape(1, -1)).astype(bf16)           # (C_in, C_exp), BN0 folded
        b0 = b0.reshape(1, -1).astype(f32)
    else:
        w_exp = jnp.zeros((1, 1), bf16)
        b0 = jnp.zeros((1, 1), f32)

    s1, b1 = _fold_bn(params["bn1_gamma"], params["bn1_beta"],
                      params["bn1_mean"], params["bn1_var"], bn_eps)
    w_dw = (jnp.transpose(params["w_dw"][:, 0, :, :], (1, 2, 0)).reshape(K * K, C_exp)
            * s1.reshape(1, -1)).astype(f32)                  # (K*K, C_exp), BN1 folded
    b1 = b1.reshape(1, -1).astype(f32)

    if has_se:
        w_sr = jnp.transpose(params["w_se_reduce"][:, :, 0, 0], (1, 0)).astype(f32)
        b_sr = params["b_se_reduce"].reshape(1, -1).astype(f32)
        w_se = jnp.transpose(params["w_se_expand"][:, :, 0, 0], (1, 0)).astype(f32)
        b_se = params["b_se_expand"].reshape(1, -1).astype(f32)
    else:
        w_sr = jnp.zeros((1, 1), f32)
        b_sr = jnp.zeros((1, 1), f32)
        w_se = jnp.zeros((1, 1), f32)
        b_se = jnp.zeros((1, 1), f32)

    s2, b2 = _fold_bn(params["bn2_gamma"], params["bn2_beta"],
                      params["bn2_mean"], params["bn2_var"], bn_eps)
    w_p = (jnp.transpose(params["w_proj"][:, :, 0, 0], (1, 0))
           * s2.reshape(1, -1)).astype(bf16)                  # (C_exp, C_out), BN2 folded
    b2 = b2.reshape(1, -1).astype(f32)

    kernel = functools.partial(
        _mbconv_kernel, H=H, W=W, K=K, stride=stride,
        pad_t=pad_t, pad_l=pad_l, H_pad=H_pad, W_pad=W_pad,
        H_out=H_out, W_out=W_out,
        has_expand=has_expand, has_se=has_se, use_skip=use_skip)

    def full(shape):
        nd = len(shape)
        return pl.BlockSpec(shape, lambda n, _nd=nd: (0,) * _nd)

    # Explicit scoped-VMEM budget (layout-padded to (8,128) tiles) with headroom.
    def p8(v):
        return -(-v // 8) * 8

    def p128(v):
        return -(-v // 128) * 128

    est = (2 * p8(H * W) * p128(C_in) * 2            # double-buffered bf16 input block
           + 2 * p8(H_out * W_out) * p128(C_out) * 4  # double-buffered f32 output block
           + H_pad * p8(W_pad) * p128(C_exp) * 4      # halo scratch
           + 6 * p8(H * W) * p128(C_exp) * 4)         # value intermediates (h, acc, xdw)
    vmem_limit = int(min(max(2 * est, 24 << 20), 48 << 20))

    out = pl.pallas_call(
        kernel,
        out_shape=jax.ShapeDtypeStruct((N, H_out * W_out, C_out), f32),
        grid=(N,),
        in_specs=[
            pl.BlockSpec((1, H * W, C_in), lambda n: (n, 0, 0)),
            full(w_exp.shape), full(b0.shape),
            full(w_dw.shape), full(b1.shape),
            full(w_sr.shape), full(b_sr.shape), full(w_se.shape), full(b_se.shape),
            full(w_p.shape), full(b2.shape),
        ],
        out_specs=pl.BlockSpec((1, H_out * W_out, C_out), lambda n: (n, 0, 0)),
        scratch_shapes=[
            pltpu.VMEM((H_pad, W_pad, C_exp), f32),   # halo-padded expanded activations
        ],
        compiler_params=pltpu.CompilerParams(
            dimension_semantics=("parallel",),
            vmem_limit_bytes=vmem_limit),
    )(x2, w_exp, b0, w_dw, b1, w_sr, b_sr, w_se, b_se, w_p, b2)

    y = out.reshape(N, H_out, W_out, C_out)
    return jnp.transpose(y, (0, 3, 1, 2)).astype(x_nchw.dtype)


# ------------------------- pure-JAX reference -------------------------

def _bn_ref(x, gamma, beta, mean, var, eps):
    inv = 1.0 / jnp.sqrt(var + eps)
    return ((x - mean.reshape(1, -1, 1, 1)) * inv.reshape(1, -1, 1, 1)
            * gamma.reshape(1, -1, 1, 1) + beta.reshape(1, -1, 1, 1))


def _conv_ref(x, w, b, stride, pad, groups):
    out = lax.conv_general_dilated(
        x, w, window_strides=(stride, stride),
        padding=((pad[0], pad[1]), (pad[2], pad[3])),
        dimension_numbers=("NCHW", "OIHW", "NCHW"),
        feature_group_count=groups,
        precision=lax.Precision.HIGHEST)
    if b is not None:
        out = out + b.reshape(1, -1, 1, 1)
    return out


def mbconv_reference(x, params, *, kernel_size, stride, expand_ratio, se_ratio,
                     id_skip, bn_eps):
    N, C_in, H, W = x.shape
    C_out = params["w_proj"].shape[0]
    swish = lambda t: t * jax.nn.sigmoid(t)
    h = x
    if expand_ratio != 1:
        h = _conv_ref(h, params["w_expand"], None, 1, (0, 0, 0, 0), 1)
        h = swish(_bn_ref(h, params["bn0_gamma"], params["bn0_beta"],
                          params["bn0_mean"], params["bn0_var"], bn_eps))
    K = kernel_size
    oh, ow = math.ceil(H / stride), math.ceil(W / stride)
    pad_h = max((oh - 1) * stride + K - H, 0)
    pad_w = max((ow - 1) * stride + K - W, 0)
    C_exp = h.shape[1]
    h = _conv_ref(h, params["w_dw"], None, stride,
                  (pad_h // 2, pad_h - pad_h // 2, pad_w // 2, pad_w - pad_w // 2),
                  groups=C_exp)
    h = swish(_bn_ref(h, params["bn1_gamma"], params["bn1_beta"],
                      params["bn1_mean"], params["bn1_var"], bn_eps))
    if se_ratio is not None and 0 < se_ratio <= 1:
        sq = jnp.mean(h, axis=(2, 3), keepdims=True)
        sq = _conv_ref(sq, params["w_se_reduce"], params["b_se_reduce"], 1, (0, 0, 0, 0), 1)
        sq = swish(sq)
        sq = _conv_ref(sq, params["w_se_expand"], params["b_se_expand"], 1, (0, 0, 0, 0), 1)
        h = jax.nn.sigmoid(sq) * h
    h = _conv_ref(h, params["w_proj"], None, 1, (0, 0, 0, 0), 1)
    h = _bn_ref(h, params["bn2_gamma"], params["bn2_beta"],
                params["bn2_mean"], params["bn2_var"], bn_eps)
    if id_skip and stride == 1 and C_in == C_out:
        h = h + x
    return h


if __name__ == "__main__":
    # Toy MBConvBlock config: input_filters=4, output_filters=4, expand_ratio=6,
    # kernel_size=3, stride=1, se_ratio=0.25, id_skip=True (residual active).
    N, C_in, H, W = 2, 4, 16, 16
    expand_ratio, K, stride, se_ratio, id_skip = 6, 3, 1, 0.25, True
    C_exp = C_in * expand_ratio
    C_out = C_in
    C_sq = max(1, int(C_in * se_ratio))
    bn_eps = 1e-3

    key = jax.random.PRNGKey(0)
    ks = jax.random.split(key, 20)
    f32 = jnp.float32

    def randn(k, shape, scale=1.0):
        return (scale * jax.random.normal(k, shape)).astype(f32)

    params = {
        "w_expand": randn(ks[0], (C_exp, C_in, 1, 1), 0.5),
        "bn0_gamma": (1.0 + 0.1 * jax.random.normal(ks[1], (C_exp,))).astype(f32),
        "bn0_beta": randn(ks[2], (C_exp,), 0.1),
        "bn0_mean": randn(ks[3], (C_exp,), 0.1),
        "bn0_var": (0.5 + jax.random.uniform(ks[4], (C_exp,))).astype(f32),
        "w_dw": randn(ks[5], (C_exp, 1, K, K), 0.3),
        "bn1_gamma": (1.0 + 0.1 * jax.random.normal(ks[6], (C_exp,))).astype(f32),
        "bn1_beta": randn(ks[7], (C_exp,), 0.1),
        "bn1_mean": randn(ks[8], (C_exp,), 0.1),
        "bn1_var": (0.5 + jax.random.uniform(ks[9], (C_exp,))).astype(f32),
        "w_se_reduce": randn(ks[10], (C_sq, C_exp, 1, 1), 0.3),
        "b_se_reduce": randn(ks[11], (C_sq,), 0.1),
        "w_se_expand": randn(ks[12], (C_exp, C_sq, 1, 1), 0.3),
        "b_se_expand": randn(ks[13], (C_exp,), 0.1),
        "w_proj": randn(ks[14], (C_out, C_exp, 1, 1), 0.3),
        "bn2_gamma": (1.0 + 0.1 * jax.random.normal(ks[15], (C_out,))).astype(f32),
        "bn2_beta": randn(ks[16], (C_out,), 0.1),
        "bn2_mean": randn(ks[17], (C_out,), 0.1),
        "bn2_var": (0.5 + jax.random.uniform(ks[18], (C_out,))).astype(f32),
    }
    x = randn(ks[19], (N, C_in, H, W), 1.0)

    cfg = dict(kernel_size=K, stride=stride, expand_ratio=expand_ratio,
               se_ratio=se_ratio, id_skip=id_skip, bn_eps=bn_eps)

    y = mbconv_forward(x, params, **cfg)
    jax.block_until_ready(y)

    y_ref = mbconv_reference(x, params, **cfg)
    jax.block_until_ready(y_ref)

    assert y.shape == y_ref.shape == (N, C_out, H, W)
    max_err = float(jnp.max(jnp.abs(y - y_ref)))
    assert max_err < 5e-2, f"max abs error {max_err}"
    print("KERNEL_OK")
</pallas_src>

<mosaic_0001>
module attributes {stable_mosaic.version = 11 : i64} {
  func.func @_mbconv_kernel(%arg0: i32, %arg1: memref<1x256x4xbf16, #tpu.memory_space<vmem>>, %arg2: memref<4x24xbf16, #tpu.memory_space<vmem>>, %arg3: memref<1x24xf32, #tpu.memory_space<vmem>>, %arg4: memref<9x24xf32, #tpu.memory_space<vmem>>, %arg5: memref<1x24xf32, #tpu.memory_space<vmem>>, %arg6: memref<24x1xf32, #tpu.memory_space<vmem>>, %arg7: memref<1x1xf32, #tpu.memory_space<vmem>>, %arg8: memref<1x24xf32, #tpu.memory_space<vmem>>, %arg9: memref<1x24xf32, #tpu.memory_space<vmem>>, %arg10: memref<24x4xbf16, #tpu.memory_space<vmem>>, %arg11: memref<1x4xf32, #tpu.memory_space<vmem>>, %arg12: memref<1x256x4xf32, #tpu.memory_space<vmem>>, %arg13: memref<18x18x24xf32, #tpu.memory_space<vmem>>) attributes {dimension_semantics = [#tpu.dimension_semantics<parallel>], iteration_bounds = array<i64: 2>, scalar_prefetch = 0 : i64, scratch_operands = 1 : i64, tpu.core_type = #tpu.core_type<tc>, window_params = [{transform_indices = @transform_0, window_bounds = array<i64: 1, 256, 4>}, {pipeline_mode = #tpu.pipeline_mode<synchronous>, transform_indices = @transform_1, window_bounds = array<i64: 4, 24>}, {pipeline_mode = #tpu.pipeline_mode<synchronous>, transform_indices = @transform_2, window_bounds = array<i64: 1, 24>}, {pipeline_mode = #tpu.pipeline_mode<synchronous>, transform_indices = @transform_3, window_bounds = array<i64: 9, 24>}, {pipeline_mode = #tpu.pipeline_mode<synchronous>, transform_indices = @transform_4, window_bounds = array<i64: 1, 24>}, {pipeline_mode = #tpu.pipeline_mode<synchronous>, transform_indices = @transform_5, window_bounds = array<i64: 24, 1>}, {pipeline_mode = #tpu.pipeline_mode<synchronous>, transform_indices = @transform_6, window_bounds = array<i64: 1, 1>}, {pipeline_mode = #tpu.pipeline_mode<synchronous>, transform_indices = @transform_7, window_bounds = array<i64: 1, 24>}, {pipeline_mode = #tpu.pipeline_mode<synchronous>, transform_indices = @transform_8, window_bounds = array<i64: 1, 24>}, {pipeline_mode = #tpu.pipeline_mode<synchronous>, transform_indices = @transform_9, window_bounds = array<i64: 24, 4>}, {pipeline_mode = #tpu.pipeline_mode<synchronous>, transform_indices = @transform_10, window_bounds = array<i64: 1, 4>}, {transform_indices = @transform_11, window_bounds = array<i64: 1, 256, 4>}]} {
    %c0 = arith.constant 0 : index
    %c0_0 = arith.constant 0 : index
    %c0_1 = arith.constant 0 : index
    %0 = vector.load %arg1[%c0, %c0_0, %c0_1] : memref<1x256x4xbf16, #tpu.memory_space<vmem>>, vector<1x256x4xbf16>
    %1 = vector.shape_cast %0 : vector<1x256x4xbf16> to vector<256x4xbf16>
    %c0_2 = arith.constant 0 : index
    %c0_3 = arith.constant 0 : index
    %2 = vector.load %arg2[%c0_2, %c0_3] : memref<4x24xbf16, #tpu.memory_space<vmem>>, vector<4x24xbf16>
    %cst = arith.constant dense<0.000000e+00> : vector<256x24xf32>
    %3 = tpu.matmul %1, %2, %cst {dimension_numbers = #tpu.dot_dimension_numbers<[1], [0], [0], [1], [0, 0, 1, 1], [], []>} : vector<256x4xbf16>, vector<4x24xbf16>, vector<256x24xf32> -> vector<256x24xf32>
    %c0_4 = arith.constant 0 : index
    %c0_5 = arith.constant 0 : index
    %4 = vector.load %arg3[%c0_4, %c0_5] : memref<1x24xf32, #tpu.memory_space<vmem>>, vector<1x24xf32>
    %5 = vector.broadcast %4 : vector<1x24xf32> to vector<256x24xf32>
    %6 = arith.addf %3, %5 : vector<256x24xf32>
    %7 = arith.negf %6 : vector<256x24xf32>
    %8 = math.exp %7 : vector<256x24xf32>
    %cst_6 = arith.constant 1.000000e+00 : f32
    %9 = vector.broadcast %cst_6 : f32 to vector<256x24xf32>
    %10 = arith.addf %9, %8 : vector<256x24xf32>
    %11 = arith.divf %9, %10 : vector<256x24xf32>
    %12 = arith.mulf %6, %11 : vector<256x24xf32>
    %cst_7 = arith.constant 0.000000e+00 : f32
    %13 = vector.broadcast %cst_7 : f32 to vector<1x18x24xf32>
    %c0_8 = arith.constant 0 : index
    %c0_9 = arith.constant 0 : index
    %c0_10 = arith.constant 0 : index
    %14 = vector.load %arg13[%c0_8, %c0_9, %c0_10] : memref<18x18x24xf32, #tpu.memory_space<vmem>>, vector<1x18x24xf32>
    tpu.vector_store %arg13[%c0_8, %c0_9, %c0_10], %13 {strides = array<i32>} : memref<18x18x24xf32, #tpu.memory_space<vmem>>, vector<1x18x24xf32>,
    %cst_11 = arith.constant 0.000000e+00 : f32
    %15 = vector.broadcast %cst_11 : f32 to vector<1x18x24xf32>
    %c17 = arith.constant 17 : index
    %c0_12 = arith.constant 0 : index
    %c0_13 = arith.constant 0 : index
    %16 = vector.load %arg13[%c17, %c0_12, %c0_13] : memref<18x18x24xf32, #tpu.memory_space<vmem>>, vector<1x18x24xf32>
    tpu.vector_store %arg13[%c17, %c0_12, %c0_13], %15 {strides = array<i32>} : memref<18x18x24xf32, #tpu.memory_space<vmem>>, vector<1x18x24xf32>,
    %cst_14 = arith.constant 0.000000e+00 : f32
    %17 = vector.broadcast %cst_14 : f32 to vector<18x1x24xf32>
    %c0_15 = arith.constant 0 : index
    %c0_16 = arith.constant 0 : index
    %c0_17 = arith.constant 0 : index
    %18 = vector.load %arg13[%c0_15, %c0_16, %c0_17] : memref<18x18x24xf32, #tpu.memory_space<vmem>>, vector<18x1x24xf32>
    tpu.vector_store %arg13[%c0_15, %c0_16, %c0_17], %17 {strides = array<i32>} : memref<18x18x24xf32, #tpu.memory_space<vmem>>, vector<18x1x24xf32>,
    %cst_18 = arith.constant 0.000000e+00 : f32
    %19 = vector.broadcast %cst_18 : f32 to vector<18x1x24xf32>
    %c0_19 = arith.constant 0 : index
    %c17_20 = arith.constant 17 : index
    %c0_21 = arith.constant 0 : index
    %20 = vector.load %arg13[%c0_19, %c17_20, %c0_21] : memref<18x18x24xf32, #tpu.memory_space<vmem>>, vector<18x1x24xf32>
    tpu.vector_store %arg13[%c0_19, %c17_20, %c0_21], %19 {strides = array<i32>} : memref<18x18x24xf32, #tpu.memory_space<vmem>>, vector<18x1x24xf32>,
    %21 = vector.shape_cast %12 : vector<256x24xf32> to vector<16x16x24xf32>
    %c1 = arith.constant 1 : index
    %c1_22 = arith.constant 1 : index
    %c0_23 = arith.constant 0 : index
    %22 = vector.load %arg13[%c1, %c1_22, %c0_23] : memref<18x18x24xf32, #tpu.memory_space<vmem>>, vector<16x16x24xf32>
    tpu.vector_store %arg13[%c1, %c1_22, %c0_23], %21 {strides = array<i32>} : memref<18x18x24xf32, #tpu.memory_space<vmem>>, vector<16x16x24xf32>,
    %c0_24 = arith.constant 0 : index
    %c0_25 = arith.constant 0 : index
    %23 = vector.load %arg4[%c0_24, %c0_25] : memref<9x24xf32, #tpu.memory_space<vmem>>, vector<9x24xf32>
    %c0_26 = arith.constant 0 : index
    %c0_27 = arith.constant 0 : index
    %c0_28 = arith.constant 0 : index
    %24 = vector.load %arg13[%c0_26, %c0_27, %c0_28] : memref<18x18x24xf32, #tpu.memory_space<vmem>>, vector<16x16x24xf32>
    %25 = vector.extract_strided_slice %23 {offsets = [0, 0], sizes = [1, 24], strides = [1, 1]} : vector<9x24xf32> to vector<1x24xf32>
    %26 = vector.shape_cast %25 : vector<1x24xf32> to vector<1x1x24xf32>
    %27 = vector.broadcast %26 : vector<1x1x24xf32> to vector<16x16x24xf32>
    %28 = arith.mulf %24, %27 : vector<16x16x24xf32>
    %c0_29 = arith.constant 0 : index
    %c1_30 = arith.constant 1 : index
    %c0_31 = arith.constant 0 : index
    %29 = vector.load %arg13[%c0_29, %c1_30, %c0_31] : memref<18x18x24xf32, #tpu.memory_space<vmem>>, vector<16x16x24xf32>
    %30 = vector.extract_strided_slice %23 {offsets = [1, 0], sizes = [1, 24], strides = [1, 1]} : vector<9x24xf32> to vector<1x24xf32>
    %31 = vector.shape_cast %30 : vector<1x24xf32> to vector<1x1x24xf32>
    %32 = vector.broadcast %31 : vector<1x1x24xf32> to vector<16x16x24xf32>
    %33 = arith.mulf %29, %32 : vector<16x16x24xf32>
    %34 = arith.addf %28, %33 : vector<16x16x24xf32>
    %c0_32 = arith.constant 0 : index
    %c2 = arith.constant 2 : index
    %c0_33 = arith.constant 0 : index
    %35 = vector.load %arg13[%c0_32, %c2, %c0_33] : memref<18x18x24xf32, #tpu.memory_space<vmem>>, vector<16x16x24xf32>
    %36 = vector.extract_strided_slice %23 {offsets = [2, 0], sizes = [1, 24], strides = [1, 1]} : vector<9x24xf32> to vector<1x24xf32>
    %37 = vector.shape_cast %36 : vector<1x24xf32> to vector<1x1x24xf32>
    %38 = vector.broadcast %37 : vector<1x1x24xf32> to vector<16x16x24xf32>
    %39 = arith.mulf %35, %38 : vector<16x16x24xf32>
    %40 = arith.addf %34, %39 : vector<16x16x24xf32>
    %c1_34 = arith.constant 1 : index
    %c0_35 = arith.constant 0 : index
    %c0_36 = arith.constant 0 : index
    %41 = vector.load %arg13[%c1_34, %c0_35, %c0_36] : memref<18x18x24xf32, #tpu.memory_space<vmem>>, vector<16x16x24xf32>
    %42 = vector.extract_strided_slice %23 {offsets = [3, 0], sizes = [1, 24], strides = [1, 1]} : vector<9x24xf32> to vector<1x24xf32>
    %43 = vector.shape_cast %42 : vector<1x24xf32> to vector<1x1x24xf32>
    %44 = vector.broadcast %43 : vector<1x1x24xf32> to vector<16x16x24xf32>
    %45 = arith.mulf %41, %44 : vector<16x16x24xf32>
    %46 = arith.addf %40, %45 : vector<16x16x24xf32>
    %c1_37 = arith.constant 1 : index
    %c1_38 = arith.constant 1 : index
    %c0_39 = arith.constant 0 : index
    %47 = vector.load %arg13[%c1_37, %c1_38, %c0_39] : memref<18x18x24xf32, #tpu.memory_space<vmem>>, vector<16x16x24xf32>
    %48 = vector.extract_strided_slice %23 {offsets = [4, 0], sizes = [1, 24], strides = [1, 1]} : vector<9x24xf32> to vector<1x24xf32>
    %49 = vector.shape_cast %48 : vector<1x24xf32> to vector<1x1x24xf32>
    %50 = vector.broadcast %49 : vector<1x1x24xf32> to vector<16x16x24xf32>
    %51 = arith.mulf %47, %50 : vector<16x16x24xf32>
    %52 = arith.addf %46, %51 : vector<16x16x24xf32>
    %c1_40 = arith.constant 1 : index
    %c2_41 = arith.constant 2 : index
    %c0_42 = arith.constant 0 : index
    %53 = vector.load %arg13[%c1_40, %c2_41, %c0_42] : memref<18x18x24xf32, #tpu.memory_space<vmem>>, vector<16x16x24xf32>
    %54 = vector.extract_strided_slice %23 {offsets = [5, 0], sizes = [1, 24], strides = [1, 1]} : vector<9x24xf32> to vector<1x24xf32>
    %55 = vector.shape_cast %54 : vector<1x24xf32> to vector<1x1x24xf32>
    %56 = vector.broadcast %55 : vector<1x1x24xf32> to vector<16x16x24xf32>
    %57 = arith.mulf %53, %56 : vector<16x16x24xf32>
    %58 = arith.addf %52, %57 : vector<16x16x24xf32>
    %c2_43 = arith.constant 2 : index
    %c0_44 = arith.constant 0 : index
    %c0_45 = arith.constant 0 : index
    %59 = vector.load %arg13[%c2_43, %c0_44, %c0_45] : memref<18x18x24xf32, #tpu.memory_space<vmem>>, vector<16x16x24xf32>
    %60 = vector.extract_strided_slice %23 {offsets = [6, 0], sizes = [1, 24], strides = [1, 1]} : vector<9x24xf32> to vector<1x24xf32>
    %61 = vector.shape_cast %60 : vector<1x24xf32> to vector<1x1x24xf32>
    %62 = vector.broadcast %61 : vector<1x1x24xf32> to vector<16x16x24xf32>
    %63 = arith.mulf %59, %62 : vector<16x16x24xf32>
    %64 = arith.addf %58, %63 : vector<16x16x24xf32>
    %c2_46 = arith.constant 2 : index
    %c1_47 = arith.constant 1 : index
    %c0_48 = arith.constant 0 : index
    %65 = vector.load %arg13[%c2_46, %c1_47, %c0_48] : memref<18x18x24xf32, #tpu.memory_space<vmem>>, vector<16x16x24xf32>
    %66 = vector.extract_strided_slice %23 {offsets = [7, 0], sizes = [1, 24], strides = [1, 1]} : vector<9x24xf32> to vector<1x24xf32>
    %67 = vector.shape_cast %66 : vector<1x24xf32> to vector<1x1x24xf32>
    %68 = vector.broadcast %67 : vector<1x1x24xf32> to vector<16x16x24xf32>
    %69 = arith.mulf %65, %68 : vector<16x16x24xf32>
    %70 = arith.addf %64, %69 : vector<16x16x24xf32>
    %c2_49 = arith.constant 2 : index
    %c2_50 = arith.constant 2 : index
    %c0_51 = arith.constant 0 : index
    %71 = vector.load %arg13[%c2_49, %c2_50, %c0_51] : memref<18x18x24xf32, #tpu.memory_space<vmem>>, vector<16x16x24xf32>
    %72 = vector.extract_strided_slice %23 {offsets = [8, 0], sizes = [1, 24], strides = [1, 1]} : vector<9x24xf32> to vector<1x24xf32>
    %73 = vector.shape_cast %72 : vector<1x24xf32> to vector<1x1x24xf32>
    %74 = vector.broadcast %73 : vector<1x1x24xf32> to vector<16x16x24xf32>
    %75 = arith.mulf %71, %74 : vector<16x16x24xf32>
    %76 = arith.addf %70, %75 : vector<16x16x24xf32>
    %77 = vector.shape_cast %76 : vector<16x16x24xf32> to vector<256x24xf32>
    %c0_52 = arith.constant 0 : index
    %c0_53 = arith.constant 0 : index
    %78 = vector.load %arg5[%c0_52, %c0_53] : memref<1x24xf32, #tpu.memory_space<vmem>>, vector<1x24xf32>
    %79 = vector.broadcast %78 : vector<1x24xf32> to vector<256x24xf32>
    %80 = arith.addf %77, %79 : vector<256x24xf32>
    %81 = arith.negf %80 : vector<256x24xf32>
    %82 = math.exp %81 : vector<256x24xf32>
    %cst_54 = arith.constant 1.000000e+00 : f32
    %83 = vector.broadcast %cst_54 : f32 to vector<256x24xf32>
    %84 = arith.addf %83, %82 : vector<256x24xf32>
    %85 = arith.divf %83, %84 : vector<256x24xf32>
    %86 = arith.mulf %80, %85 : vector<256x24xf32>
    %cst_55 = arith.constant dense<0.000000e+00> : vector<24xf32>
    %87 = vector.multi_reduction <add>, %86, %cst_55 [0] : vector<256x24xf32> to vector<24xf32>
    %88 = vector.shape_cast %87 : vector<24xf32> to vector<1x24xf32>
    %cst_56 = arith.constant 2.560000e+02 : f32
    %89 = vector.broadcast %cst_56 : f32 to vector<1x24xf32>
    %90 = arith.divf %88, %89 : vector<1x24xf32>
    %c0_57 = arith.constant 0 : index
    %c0_58 = arith.constant 0 : index
    %91 = vector.load %arg6[%c0_57, %c0_58] : memref<24x1xf32, #tpu.memory_space<vmem>>, vector<24x1xf32>
    %cst_59 = arith.constant dense<0.000000e+00> : vector<1x1xf32>
    %92 = tpu.matmul %90, %91, %cst_59 {dimension_numbers = #tpu.dot_dimension_numbers<[1], [0], [0], [1], [0, 0, 1, 1], [], []>} : vector<1x24xf32>, vector<24x1xf32>, vector<1x1xf32> -> vector<1x1xf32>
    %c0_60 = arith.constant 0 : index
    %c0_61 = arith.constant 0 : index
    %93 = vector.load %arg7[%c0_60, %c0_61] : memref<1x1xf32, #tpu.memory_space<vmem>>, vector<1x1xf32>
    %94 = arith.addf %92, %93 : vector<1x1xf32>
    %95 = arith.negf %94 : vector<1x1xf32>
    %96 = math.exp %95 : vector<1x1xf32>
    %cst_62 = arith.constant 1.000000e+00 : f32
    %97 = vector.broadcast %cst_62 : f32 to vector<1x1xf32>
    %98 = arith.addf %97, %96 : vector<1x1xf32>
    %99 = arith.divf %97, %98 : vector<1x1xf32>
    %100 = arith.mulf %94, %99 : vector<1x1xf32>
    %c0_63 = arith.constant 0 : index
    %c0_64 = arith.constant 0 : index
    %101 = vector.load %arg8[%c0_63, %c0_64] : memref<1x24xf32, #tpu.memory_space<vmem>>, vector<1x24xf32>
    %cst_65 = arith.constant dense<0.000000e+00> : vector<1x24xf32>
    %102 = tpu.matmul %100, %101, %cst_65 {dimension_numbers = #tpu.dot_dimension_numbers<[1], [0], [0], [1], [0, 0, 1, 1], [], []>} : vector<1x1xf32>, vector<1x24xf32>, vector<1x24xf32> -> vector<1x24xf32>
    %c0_66 = arith.constant 0 : index
    %c0_67 = arith.constant 0 : index
    %103 = vector.load %arg9[%c0_66, %c0_67] : memref<1x24xf32, #tpu.memory_space<vmem>>, vector<1x24xf32>
    %104 = arith.addf %102, %103 : vector<1x24xf32>
    %105 = arith.negf %104 : vector<1x24xf32>
    %106 = math.exp %105 : vector<1x24xf32>
    %cst_68 = arith.constant 1.000000e+00 : f32
    %107 = vector.broadcast %cst_68 : f32 to vector<1x24xf32>
    %108 = arith.addf %107, %106 : vector<1x24xf32>
    %109 = arith.divf %107, %108 : vector<1x24xf32>
    %110 = vector.broadcast %109 : vector<1x24xf32> to vector<256x24xf32>
    %111 = arith.mulf %86, %110 : vector<256x24xf32>
    %112 = arith.truncf %111 : vector<256x24xf32> to vector<256x24xbf16>
    %c0_69 = arith.constant 0 : index
    %c0_70 = arith.constant 0 : index
    %113 = vector.load %arg10[%c0_69, %c0_70] : memref<24x4xbf16, #tpu.memory_space<vmem>>, vector<24x4xbf16>
    %cst_71 = arith.constant dense<0.000000e+00> : vector<256x4xf32>
    %114 = tpu.matmul %112, %113, %cst_71 {dimension_numbers = #tpu.dot_dimension_numbers<[1], [0], [0], [1], [0, 0, 1, 1], [], []>} : vector<256x24xbf16>, vector<24x4xbf16>, vector<256x4xf32> -> vector<256x4xf32>
    %c0_72 = arith.constant 0 : index
    %c0_73 = arith.constant 0 : index
    %115 = vector.load %arg11[%c0_72, %c0_73] : memref<1x4xf32, #tpu.memory_space<vmem>>, vector<1x4xf32>
    %116 = vector.broadcast %115 : vector<1x4xf32> to vector<256x4xf32>
    %117 = arith.addf %114, %116 : vector<256x4xf32>
    %118 = arith.extf %1 : vector<256x4xbf16> to vector<256x4xf32>
    %119 = arith.addf %117, %118 : vector<256x4xf32>
    %c0_74 = arith.constant 0 : index
    %c0_75 = arith.constant 0 : index
    %c0_76 = arith.constant 0 : index
    %120 = vector.load %arg12[%c0_74, %c0_75, %c0_76] : memref<1x256x4xf32, #tpu.memory_space<vmem>>, vector<1x256x4xf32>
    %121 = vector.shape_cast %120 : vector<1x256x4xf32> to vector<256x4xf32>
    %122 = vector.shape_cast %119 : vector<256x4xf32> to vector<1x256x4xf32>
    tpu.vector_store %arg12[%c0_74, %c0_75, %c0_76], %122 {strides = array<i32>} : memref<1x256x4xf32, #tpu.memory_space<vmem>>, vector<1x256x4xf32>,
    return
  }
  func.func @transform_0(%arg0: i32) -> (i32, i32, i32) {
    %c0_i32 = arith.constant 0 : i32
    %c0_i32_0 = arith.constant 0 : i32
    %c0_i32_1 = arith.constant 0 : i32
    return %arg0, %c0_i32, %c0_i32_0 : i32, i32, i32
  }
  func.func @transform_1(%arg0: i32) -> (i32, i32) {
    %c0_i32 = arith.constant 0 : i32
    %c0_i32_0 = arith.constant 0 : i32
    %c0_i32_1 = arith.constant 0 : i32
    return %c0_i32, %c0_i32_0 : i32, i32
  }
  func.func @transform_2(%arg0: i32) -> (i32, i32) {
    %c0_i32 = arith.constant 0 : i32
    %c0_i32_0 = arith.constant 0 : i32
    %c0_i32_1 = arith.constant 0 : i32
    return %c0_i32, %c0_i32_0 : i32, i32
  }
  func.func @transform_3(%arg0: i32) -> (i32, i32) {
    %c0_i32 = arith.constant 0 : i32
    %c0_i32_0 = arith.constant 0 : i32
    %c0_i32_1 = arith.constant 0 : i32
    return %c0_i32, %c0_i32_0 : i32, i32
  }
  func.func @transform_4(%arg0: i32) -> (i32, i32) {
    %c0_i32 = arith.constant 0 : i32
    %c0_i32_0 = arith.constant 0 : i32
    %c0_i32_1 = arith.constant 0 : i32
    return %c0_i32, %c0_i32_0 : i32, i32
  }
  func.func @transform_5(%arg0: i32) -> (i32, i32) {
    %c0_i32 = arith.constant 0 : i32
    %c0_i32_0 = arith.constant 0 : i32
    %c0_i32_1 = arith.constant 0 : i32
    return %c0_i32, %c0_i32_0 : i32, i32
  }
  func.func @transform_6(%arg0: i32) -> (i32, i32) {
    %c0_i32 = arith.constant 0 : i32
    %c0_i32_0 = arith.constant 0 : i32
    %c0_i32_1 = arith.constant 0 : i32
    return %c0_i32, %c0_i32_0 : i32, i32
  }
  func.func @transform_7(%arg0: i32) -> (i32, i32) {
    %c0_i32 = arith.constant 0 : i32
    %c0_i32_0 = arith.constant 0 : i32
    %c0_i32_1 = arith.constant 0 : i32
    return %c0_i32, %c0_i32_0 : i32, i32
  }
  func.func @transform_8(%arg0: i32) -> (i32, i32) {
    %c0_i32 = arith.constant 0 : i32
    %c0_i32_0 = arith.constant 0 : i32
    %c0_i32_1 = arith.constant 0 : i32
    return %c0_i32, %c0_i32_0 : i32, i32
  }
  func.func @transform_9(%arg0: i32) -> (i32, i32) {
    %c0_i32 = arith.constant 0 : i32
    %c0_i32_0 = arith.constant 0 : i32
    %c0_i32_1 = arith.constant 0 : i32
    return %c0_i32, %c0_i32_0 : i32, i32
  }
  func.func @transform_10(%arg0: i32) -> (i32, i32) {
    %c0_i32 = arith.constant 0 : i32
    %c0_i32_0 = arith.constant 0 : i32
    %c0_i32_1 = arith.constant 0 : i32
    return %c0_i32, %c0_i32_0 : i32, i32
  }
  func.func @transform_11(%arg0: i32) -> (i32, i32, i32) {
    %c0_i32 = arith.constant 0 : i32
    %c0_i32_0 = arith.constant 0 : i32
    %c0_i32_1 = arith.constant 0 : i32
    return %arg0, %c0_i32, %c0_i32_0 : i32, i32, i32
  }
}

</mosaic_0001>

<bundles_post_ra>
// kernel: tpu_custom_call.1
= control target key start
LH: loop header
LB: loop body
LE: loop exit
PB: predicated region body
PF: predicated region fallthrough
CT: control target
= control target key end

     0   :  { %s3980_s19 = smov 0   ;;  %s7214_s0 = inlined_call_operand.vmem [shape: bf16[2,256,4], index: 0, kind: input, shape index: {}]   ;;  %s7215_s1 = inlined_call_operand.vmem [shape: bf16[4,24], index: 1, kind: input, shape index: {}]   ;;  %s7216_s2 = inlined_call_operand.vmem [shape: f32[1,24], index: 2, kind: input, shape index: {}]   ;;  %s7217_s3 = inlined_call_operand.vmem [shape: f32[9,24], index: 3, kind: input, shape index: {}]   ;;  %s7218_s4 = inlined_call_operand.vmem [shape: f32[1,24], index: 4, kind: input, shape index: {}]   ;;  %s7219_s5 = inlined_call_operand.vmem [shape: f32[24,1], index: 5, kind: input, shape index: {}]   ;;  %s7220_s6 = inlined_call_operand.<no memory space> [shape: f32[1,1], index: 6, kind: input, shape index: {}]   ;;  %s7221_s7 = inlined_call_operand.vmem [shape: f32[1,24], index: 7, kind: input, shape index: {}]   ;;  %s7222_s8 = inlined_call_operand.vmem [shape: f32[1,24], index: 8, kind: input, shape index: {}]   ;;  %s7223_s9 = inlined_call_operand.vmem [shape: bf16[24,4], index: 9, kind: input, shape index: {}]   ;;  %s7224_s10 = inlined_call_operand.vmem [shape: f32[1,4], index: 10, kind: input, shape index: {}]   ;;  %s7225_s11 = inlined_call_operand.vmem [shape: f32[2,256,4], index: 11, kind: output, shape index: {}]  }
   0x1   :  { %v16_v0 = vstv %s7220_s6 }
   0x2   :  { %17 = vst [vmem:[#allocation3] sm:$0x1] %v16_v0 }
   0x3 LB: > { %s3418_s20 = sadd.s32 4294967295, %s3913_s19   ;;  %p3422_p0 = scmp.ge.s32.totalorder %s3913_s19, 1  ;;  %s3913_s19 = sphi %s3980_s19, %s23_s19  }
   0x4   : > { %p339_p1 = scmp.lt.s32.totalorder %s3913_s19, 3 }
   0x6   : > { %p340_p2 = pnand %p3422_p0, %p339_p1 }
   0x8   : > { %343 = sbr.rel (%p340_p2) target bundleno = 1207 (0x4b7), region = 64 }
   0xd   : > { %v422_v1 = vld [vmem:[%s7215_s1] sm:$0x3]  ;;  %vm556_vm0 = vcmask 1041408   ;;  %p379_p3 = scmp.lt.s32.totalorder %s3418_s20, 1  ;;  %vm507_vm1 = vcmask 31744   ;;  %vm1289_vm2 = vcmask 195584  }
   0xe   : > { %v558_v2 = vsel %vm556_vm0, %v422_v1, 0  ;;  %v3915_v18 = vmov 0.0   ;;  %vm1298_vm3 = vcmask 188416   ;;  %v4034_v19 = vld [vmem:[%s7216_s2] ss:$0 sm:$0xff]  ;;  %vm1292_vm13 = vcmask 189440  }
   0xf   : > { %567 = vmatpush.bf16.msra.mxu0 %v558_v2  ;;  %3617 = vmatpush.bf16.msra.mxu1 %v558_v2  ;;  %s7495_s20 = smov (!%p379_p3, %s3418_s20), 1  ;;  %1290 = vst.msk [vmem:[#allocation2] sm:$0xff] %vm1289_vm2, %v3915_v18 }
  0x10   : > { %s3598_s6 = sshll.u32 %s7495_s20, 7  ;;  %1291 = vst.msk [vmem:[#allocation2 + $0x8] sm:$0xff] %vm1289_vm2, %v3915_v18  ;;  %s3599_s28 = sshll.u32 %s7495_s20, 8 }
  0x11   : > { %s3997_s25 = scalar_lea.vmem %s7214_s0, %s3598_s6  ;;  %1299 = vst.msk [vmem:[#allocation2] sm:$0x1] %vm1298_vm3, %v3915_v18  ;;  %s7101_s12 = scalar_lea.vmem %s7225_s11, %s3599_s28 }
  0x12   : > { %v3600_v3 = vld [vmem:[%s3997_s25] sm:$0xff]  ;;  %v3609_v4 = vld [vmem:[%s3997_s25 + $0x48] sm:$0xff]  ;;  %v3610_v6 = vld [vmem:[%s3997_s25 + $0x50] sm:$0xff]  ;;  %1300 = vst.msk [vmem:[#allocation2 + $0x18] sm:$0x1] %vm1298_vm3, %v3915_v18 }
  0x13   : > { %3491 = vmatmul.msk.bf16.vlgmr.msra.gmra.mxu0 %vm507_vm1, %v3600_v3  ;;  %3500 = vmatmul.msk.bf16.vlgmr.msra.gmra.mxu1 %vm507_vm1, %v3609_v4  ;;  %v3601_v5 = vld [vmem:[%s3997_s25 + $0x8] sm:$0xff]  ;;  %v3602_v7 = vld [vmem:[%s3997_s25 + $0x10] sm:$0xff]  ;;  %v3611_v8 = vld [vmem:[%s3997_s25 + $0x58] sm:$0xff]  ;;  %1295 = vst.msk [vmem:[#allocation2 + $0x198] sm:$0xff] %vm1289_vm2, %v3915_v18 }
  0x14   : > { %v3603_v9 = vld [vmem:[%s3997_s25 + $0x18] sm:$0xff]  ;;  %v3612_v10 = vld [vmem:[%s3997_s25 + $0x60] sm:$0xff]  ;;  %v3613_v12 = vld [vmem:[%s3997_s25 + $0x68] sm:$0xff]  ;;  %1296 = vst.msk [vmem:[#allocation2 + $0x1a0] sm:$0xff] %vm1289_vm2, %v3915_v18 }
  0x15   : > { %v3604_v11 = vld [vmem:[%s3997_s25 + $0x20] sm:$0xff]  ;;  %v3605_v13 = vld [vmem:[%s3997_s25 + $0x28] sm:$0xff]  ;;  %v3614_v14 = vld [vmem:[%s3997_s25 + $0x70] sm:$0xff]  ;;  %1301 = vst.msk [vmem:[#allocation2 + $0x30] sm:$0x1] %vm1298_vm3, %v3915_v18 }
  0x16   : > { %v3606_v15 = vld [vmem:[%s3997_s25 + $0x30] sm:$0xff]  ;;  %v3615_v16 = vld [vmem:[%s3997_s25 + $0x78] sm:$0xff]  ;;  %v3608_v20 = vld [vmem:[%s3997_s25 + $0x40] sm:$0xff]  ;;  %1302 = vst.msk [vmem:[#allocation2 + $0x48] sm:$0x1] %vm1298_vm3, %v3915_v18 }
  0x17   : > { %v3607_v17 = vld [vmem:[%s3997_s25 + $0x38] sm:$0xff]  ;;  %1303 = vst.msk [vmem:[#allocation2 + $0x60] sm:$0x1] %vm1298_vm3, %v3915_v18 }
  0x18   : > { %1304 = vst.msk [vmem:[#allocation2 + $0x78] sm:$0x1] %vm1298_vm3, %v3915_v18 }
  0x19   : > { %1305 = vst.msk [vmem:[#allocation2 + $0x90] sm:$0x1] %vm1298_vm3, %v3915_v18 }
  0x1a   : > { %1306 = vst.msk [vmem:[#allocation2 + $0xa8] sm:$0x1] %vm1298_vm3, %v3915_v18 }
  0x1b   : > { %1307 = vst.msk [vmem:[#allocation2 + $0xc0] sm:$0x1] %vm1298_vm3, %v3915_v18 }
  0x1c   : > { %1308 = vst.msk [vmem:[#allocation2 + $0xd8] sm:$0x1] %vm1298_vm3, %v3915_v18 }
  0x1d   : > { %1309 = vst.msk [vmem:[#allocation2 + $0xf0] sm:$0x1] %vm1298_vm3, %v3915_v18 }
  0x1e   : > { %1310 = vst.msk [vmem:[#allocation2 + $0x108] sm:$0x1] %vm1298_vm3, %v3915_v18 }
  0x1f   : > { %1311 = vst.msk [vmem:[#allocation2 + $0x120] sm:$0x1] %vm1298_vm3, %v3915_v18 }
  0x20   : > { %1312 = vst.msk [vmem:[#allocation2 + $0x138] sm:$0x1] %vm1298_vm3, %v3915_v18 }
  0x21   : > { %1313 = vst.msk [vmem:[#allocation2 + $0x150] sm:$0x1] %vm1298_vm3, %v3915_v18 }
  0x22   : > { %1314 = vst.msk [vmem:[#allocation2 + $0x168] sm:$0x1] %vm1298_vm3, %v3915_v18 }
  0x23   : > { %3492 = vmatmul.msk.bf16.gmra.mxu0 %vm507_vm1, %v3601_v5  ;;  %3501 = vmatmul.msk.bf16.gmra.mxu1 %vm507_vm1, %v3610_v6  ;;  %1315 = vst.msk [vmem:[#allocation2 + $0x180] sm:$0x1] %vm1298_vm3, %v3915_v18 }
  0x24   : > { %1318 = vst.msk [vmem:[#allocation2 + $0x29] sm:$0x1] %vm1298_vm3, %v3915_v18 }
  0x25   : > { %1319 = vst.msk [vmem:[#allocation2 + $0x41] sm:$0x1] %vm1298_vm3, %v3915_v18 }
  0x26   : > { %1320 = vst.msk [vmem:[#allocation2 + $0x59] sm:$0x1] %vm1298_vm3, %v3915_v18 }
  0x27   : > { %1321 = vst.msk [vmem:[#allocation2 + $0x71] sm:$0x1] %vm1298_vm3, %v3915_v18 }
  0x28   : > { %1322 = vst.msk [vmem:[#allocation2 + $0x89] sm:$0x1] %vm1298_vm3, %v3915_v18 }
  0x29   : > { %1323 = vst.msk [vmem:[#allocation2 + $0xa1] sm:$0x1] %vm1298_vm3, %v3915_v18 }
  0x2a   : > { %1324 = vst.msk [vmem:[#allocation2 + $0xb9] sm:$0x1] %vm1298_vm3, %v3915_v18 }
  0x2b   : > { %1325 = vst.msk [vmem:[#allocation2 + $0xd1] sm:$0x1] %vm1298_vm3, %v3915_v18 }
  0x2c   : > { %1326 = vst.msk [vmem:[#allocation2 + $0xe9] sm:$0x1] %vm1298_vm3, %v3915_v18 }
  0x2d   : > { %1327 = vst.msk [vmem:[#allocation2 + $0x101] sm:$0x1] %vm1298_vm3, %v3915_v18 }
  0x2e   : > { %1328 = vst.msk [vmem:[#allocation2 + $0x119] sm:$0x1] %vm1298_vm3, %v3915_v18 }
  0x2f   : > { %1329 = vst.msk [vmem:[#allocation2 + $0x131] sm:$0x1] %vm1298_vm3, %v3915_v18 }
  0x30   : > { %1330 = vst.msk [vmem:[#allocation2 + $0x149] sm:$0x1] %vm1298_vm3, %v3915_v18 }
  0x31   : > { %1331 = vst.msk [vmem:[#allocation2 + $0x161] sm:$0x1] %vm1298_vm3, %v3915_v18 }
  0x32   : > { %1332 = vst.msk [vmem:[#allocation2 + $0x179] sm:$0x1] %vm1298_vm3, %v3915_v18 }
  0x33   : > { %3493 = vmatmul.msk.bf16.gmra.mxu0 %vm507_vm1, %v3602_v7  ;;  %3502 = vmatmul.msk.bf16.gmra.mxu1 %vm507_vm1, %v3611_v8  ;;  %1333 = vst.msk [vmem:[#allocation2 + $0x191] sm:$0x1] %vm1298_vm3, %v3915_v18 }
  0x34   : > { %1316 = vst.msk [vmem:[#allocation2 + $0x198] sm:$0x1] %vm1298_vm3, %v3915_v18 }
  0x35   : > { %1293 = vst.msk [vmem:[#allocation2 + $0x10] sm:$0x3] %vm1292_vm13, %v3915_v18 }
  0x36   : > { %1317 = vst.msk [vmem:[#allocation2 + $0x11] sm:$0x1] %vm1298_vm3, %v3915_v18 }
  0x37   : > { %1297 = vst.msk [vmem:[#allocation2 + $0x1a8] sm:$0x3] %vm1292_vm13, %v3915_v18 }
  0x38   : > { %1334 = vst.msk [vmem:[#allocation2 + $0x1a9] sm:$0x1] %vm1298_vm3, %v3915_v18 }
  0x43   : > { %3494 = vmatmul.msk.bf16.gmra.mxu0 %vm507_vm1, %v3603_v9  ;;  %3503 = vmatmul.msk.bf16.gmra.mxu1 %vm507_vm1, %v3612_v10 }
  0x53   : > { %3495 = vmatmul.msk.bf16.gmra.mxu0 %vm507_vm1, %v3604_v11  ;;  %3504 = vmatmul.msk.bf16.gmra.mxu1 %vm507_vm1, %v3613_v12 }
  0x63   : > { %3496 = vmatmul.msk.bf16.gmra.mxu0 %vm507_vm1, %v3605_v13  ;;  %3505 = vmatmul.msk.bf16.gmra.mxu1 %vm507_vm1, %v3614_v14 }
  0x73   : > { %3497 = vmatmul.msk.bf16.gmra.mxu0 %vm507_vm1, %v3606_v15  ;;  %3506 = vmatmul.msk.bf16.gmra.mxu1 %vm507_vm1, %v3615_v16 }
  0x83   : > { %3498 = vmatmul.msk.bf16.gmra.mxu0 %vm507_vm1, %v3607_v17 }
  0x90   : > { %v569_v21 = vpop.f32.mrf.mxu0  ;;  %v614_v22 = vpop.f32.mrf.mxu1 }
  0x91   : > { %v4046_v23 = vadd.f32 %v4034_v19, %v569_v21  ;;  %v4051_v24 = vadd.f32 %v4034_v19, %v614_v22 }
  0x93   : > { %v3507_v25 = vmul.f32 -1.442695, %v4046_v23  ;;  %3499 = vmatmul.msk.bf16.gmra.mxu0 %vm507_vm1, %v3608_v20  ;;  %v3525_v26 = vmul.f32 -1.442695, %v4051_v24 }
  0x95   : > { %3634 = vpow2.f32 %v3507_v25 }
  0x96   : > { %3636 = vpow2.f32 %v3525_v26 }
  0x98   : > { %v571_v27 = vpop.f32.mrf.mxu0  ;;  %v616_v28 = vpop.f32.mrf.mxu1 }
  0x99   : > { %v4073_v29 = vadd.f32 %v4034_v19, %v571_v27  ;;  %v4076_v30 = vadd.f32 %v4034_v19, %v616_v28 }
  0x9b   : > { %v3635_v31 = vpop.eup %3634  ;;  %v3508_v32 = vmul.f32 -1.442695, %v4073_v29  ;;  %v3526_v36 = vmul.f32 -1.442695, %v4076_v30 }
  0x9c   : > { %v3637_v33 = vpop.eup %3636  ;;  %v4083_v34 = vadd.f32 1.0, %v3635_v31 }
  0x9d   : > { %v763_v35 = vadd.f32 1.0, %v3637_v33  ;;  %3638 = vpow2.f32 %v3508_v32 }
  0x9e   : > { %3640 = vrcp.f32 %v4083_v34  ;;  %v788_v48 = vand.u32 2147483648, %v4083_v34  ;;  %v786_v58 = vand.u32 2147483647, %v4083_v34  ;;  %vm782_vm7 = vweird.f32 %v4083_v34 }
  0x9f   : > { %3642 = vrcp.f32 %v763_v35  ;;  %vm1052_vm4 = vweird.f32 %v763_v35  ;;  %v1058_v52 = vand.u32 2147483648, %v763_v35  ;;  %v1056_v54 = vand.u32 2147483647, %v763_v35 }
  0xa0   : > { %v574_v37 = vpop.f32.mrf.mxu0  ;;  %3644 = vpow2.f32 %v3526_v36  ;;  %v619_v39 = vpop.f32.mrf.mxu1  ;;  %v789_v2 = vor.u32 1.1754944e-38, %v788_v48  ;;  %vm787_vm11 = vcmp.eq.f32.partialorder %v786_v58, 8.507059e+37 }
  0xa1   : > { %v4100_v38 = vadd.f32 %v4034_v19, %v574_v37  ;;  %v4105_v40 = vadd.f32 %v4034_v19, %v619_v39  ;;  %v1059_v0 = vor.u32 1.1754944e-38, %v1058_v52  ;;  %vm1057_vm10 = vcmp.eq.f32.partialorder %v1056_v54, 8.507059e+37 }
  0xa3   : > { %v3639_v41 = vpop.eup %3638  ;;  %v3509_v42 = vmul.f32 -1.442695, %v4100_v38  ;;  %v3527_v45 = vmul.f32 -1.442695, %v4105_v40 }
  0xa4   : > { %v3641_v43 = vpop.eup %3640  ;;  %v4112_v44 = vadd.f32 1.0, %v3639_v41 }
  0xa5   : > { %v3643_v46 = vpop.eup %3642  ;;  %v778_v47 = vmul.f32 %v3641_v43, %v4083_v34  ;;  %3646 = vpow2.f32 %v3509_v42  ;;  %vm783_vm6 = vweird.f32 %v3641_v43 }
  0xa6   : > { %v1048_v49 = vmul.f32 %v3643_v46, %v763_v35  ;;  %3648 = vrcp.f32 %v4112_v44  ;;  %v3645_v50 = vpop.eup %3644  ;;  %vm1053_vm5 = vweird.f32 %v3643_v46  ;;  %vm784_vm9 = vmor %vm782_vm7, %vm783_vm6  ;;  %v801_v14 = vand.u32 2147483647, %v4112_v44 }
  0xa7   : > { %v779_v51 = vsub.f32 1.0, %v778_v47  ;;  %3650 = vpow2.f32 %v3527_v45  ;;  %v4126_v55 = vadd.f32 1.0, %v3645_v50  ;;  %vm4142_vm8 = vmor %vm1052_vm4, %vm1053_vm5  ;;  %v803_v20 = vand.u32 2147483648, %v4112_v44 }
  0xa8   : > { %v1049_v53 = vsub.f32 1.0, %v1048_v49  ;;  %v576_v56 = vpop.f32.mrf.mxu0  ;;  %v621_v15 = vpop.f32.mrf.mxu1  ;;  %vm797_vm14 = vweird.f32 %v4112_v44  ;;  %vm802_vm0 = vcmp.eq.f32.partialorder %v801_v14, 8.507059e+37 }
  0xa9   : > { %v780_v57 = vmul.f32 %v3641_v43, %v779_v51  ;;  %3652 = vrcp.f32 %v4126_v55  ;;  %v4135_v60 = vadd.f32 %v4034_v19, %v576_v56  ;;  %v4170_v22 = vadd.f32 %v4034_v19, %v621_v15 }
  0xaa   : > { %v1050_v59 = vmul.f32 %v3643_v46, %v1049_v53  ;;  %v804_v28 = vor.u32 1.1754944e-38, %v803_v20  ;;  %v1073_v34 = vand.u32 2147483648, %v4126_v55  ;;  %vm1067_vm4 = vweird.f32 %v4126_v55  ;;  %v1435_v20 = vld [vmem:[#allocation2 + $0x1] sm:$0xff] }
  0xab   : > { %v3647_v61 = vpop.eup %3646  ;;  %v781_v62 = vadd.f32 %v3641_v43, %v780_v57  ;;  %v3510_v10 = vmul.f32 -1.442695, %v4135_v60  ;;  %v3528_v31 = vmul.f32 -1.442695, %v4170_v22  ;;  %v1071_v37 = vand.u32 2147483647, %v4126_v55 }
  0xac   : > { %v3649_v1 = vpop.eup %3648  ;;  %v1051_v3 = vadd.f32 %v3643_v46, %v1050_v59  ;;  %v4148_v4 = vadd.f32 1.0, %v3647_v61 }
  0xad   : > { %v3651_v5 = vpop.eup %3650  ;;  %v785_v6 = vsel %vm784_vm9, %v3641_v43, %v781_v62  ;;  %v793_v7 = vmul.f32 %v3649_v1, %v4112_v44  ;;  %vm798_vm12 = vweird.f32 %v3649_v1  ;;  %v1074_v44 = vor.u32 1.1754944e-38, %v1073_v34 }
  0xae   : > { %v790_v8 = vsel %vm787_vm11, %v789_v2, %v785_v6  ;;  %v1055_v9 = vsel %vm4142_vm8, %v3643_v46, %v1051_v3  ;;  %3654 = vrcp.f32 %v4148_v4  ;;  %v4167_v21 = vadd.f32 1.0, %v3651_v5  ;;  %vm799_vm15 = vmor %vm797_vm14, %vm798_vm12  ;;  %v4222_v6 = vld [vmem:[%s7217_s3] sm:$0xff] }
  0xaf   : > { %v1257_v11 = vmul.f32 %v790_v8, %v4046_v23  ;;  %v1060_v12 = vsel %vm1057_vm10, %v1059_v0, %v1055_v9  ;;  %v794_v13 = vsub.f32 1.0, %v793_v7  ;;  %v3653_v16 = vpop.eup %3652  ;;  %3656 = vpow2.f32 %v3510_v10 }
  0xb0   : > { %v1275_v17 = vmul.f32 %v1060_v12, %v4051_v24  ;;  %v1063_v25 = vmul.f32 %v3653_v16, %v4126_v55  ;;  %3658 = vrcp.f32 %v4167_v21  ;;  %vm1068_vm5 = vweird.f32 %v3653_v16  ;;  %v579_v49 = vpop.f32.mrf.mxu0  ;;  %v624_v3 = vpop.f32.mrf.mxu1 }
  0xb1   : > { %1336 = vst.msk [vmem:[#allocation2 + $0x19] sm:$0xff] %vm1289_vm2, %v1257_v11  ;;  %v795_v23 = vmul.f32 %v3649_v1, %v794_v13  ;;  %3660 = vpow2.f32 %v3528_v31  ;;  %vm1069_vm6 = vmor %vm1067_vm4, %vm1068_vm5  ;;  %vm1072_vm7 = vcmp.eq.f32.partialorder %v1071_v37, 8.507059e+37  ;;  %v818_v50 = vand.u32 2147483648, %v4148_v4 }
  0xb2   : > { %1354 = vst.msk [vmem:[#allocation2 + $0xf1] sm:$0xff] %vm1289_vm2, %v1275_v17  ;;  %v1064_v26 = vsub.f32 1.0, %v1063_v25  ;;  %vm812_vm3 = vweird.f32 %v4148_v4  ;;  %v816_v54 = vand.u32 2147483647, %v4148_v4  ;;  %v4203_v55 = vadd.f32 %v4034_v19, %v579_v49 }
  0xb3   : > { %v796_v24 = vadd.f32 %v3649_v1, %v795_v23  ;;  %v819_v58 = vor.u32 1.1754944e-38, %v818_v50  ;;  %v1088_v0 = vand.u32 2147483648, %v4167_v21  ;;  %vm1082_vm11 = vweird.f32 %v4167_v21 }
  0xb4   : > { %v3655_v27 = vpop.eup %3654  ;;  %v1065_v33 = vmul.f32 %v3653_v16, %v1064_v26  ;;  %vm817_vm10 = vcmp.eq.f32.partialorder %v816_v54, 8.507059e+37  ;;  %v3511_v61 = vmul.f32 -1.442695, %v4203_v55  ;;  %v1086_v2 = vand.u32 2147483647, %v4167_v21  ;;  %v1436_v26 = vld [vmem:[#allocation2 + $0x9] sm:$0xff] }
  0xb5   : > { %v800_v32 = vsel %vm799_vm15, %v3649_v1, %v796_v24  ;;  %v808_v35 = vmul.f32 %v3655_v27, %v4148_v4  ;;  %v3657_v41 = vpop.eup %3656  ;;  %vm813_vm8 = vweird.f32 %v3655_v27  ;;  %v4216_v4 = vadd.f32 %v4034_v19, %v624_v3 }
  0xb6   : > { %v805_v36 = vsel %vm802_vm0, %v804_v28, %v800_v32  ;;  %v1066_v42 = vadd.f32 %v3653_v16, %v1065_v33  ;;  %v3659_v45 = vpop.eup %3658  ;;  %v4194_v46 = vadd.f32 1.0, %v3657_v41  ;;  %vm814_vm9 = vmor %vm812_vm3, %vm813_vm8  ;;  %v1089_v7 = vor.u32 1.1754944e-38, %v1088_v0  ;;  %v1370_v28 = vld [vmem:[#allocation2] sm:$0xff] }
  0xb7   : > { %v1258_v39 = vmul.f32 %v805_v36, %v4073_v29  ;;  %v809_v43 = vsub.f32 1.0, %v808_v35  ;;  %v1078_v18 = vmul.f32 %v3659_v45, %v4167_v21  ;;  %v3661_v51 = vpop.eup %3660  ;;  %vm1083_vm12 = vweird.f32 %v3659_v45  ;;  %v1371_v21 = vld [vmem:[#allocation2 + $0x8] sm:$0xff] }
  0xb8   : > { %v1070_v47 = vsel %vm1069_vm6, %v3653_v16, %v1066_v42  ;;  %3662 = vrcp.f32 %v4194_v46  ;;  %v4206_v59 = vadd.f32 1.0, %v3661_v51  ;;  %vm1084_vm13 = vmor %vm1082_vm11, %vm1083_vm12  ;;  %vm1087_vm14 = vcmp.eq.f32.partialorder %v1086_v2, 8.507059e+37  ;;  %v626_v54 = vpop.f32.mrf.mxu1 }
  0xb9   : > { %1337 = vst.msk [vmem:[#allocation2 + $0x21] sm:$0xff] %vm1289_vm2, %v1258_v39  ;;  %v810_v48 = vmul.f32 %v3655_v27, %v809_v43  ;;  %v1075_v29 = vsel %vm1072_vm7, %v1074_v44, %v1070_v47  ;;  %v1079_v57 = vsub.f32 1.0, %v1078_v18  ;;  %v3529_v8 = vmul.f32 -1.442695, %v4216_v4  ;;  %v1533_v44 = vld [vmem:[#allocation2 + $0xa] sm:$0xff]  ;;  %v581_v18 = vpop.f32.mrf.mxu0 }
  0xba   : > { %v1276_v52 = vmul.f32 %v1075_v29, %v4076_v30  ;;  %3664 = vrcp.f32 %v4206_v59  ;;  %v4226_v10 = vperm.slane %v4222_v6, 0  ;;  %v4229_v13 = vperm.slane %v4222_v6, 1 }
  0xbb   : > { %v811_v53 = vadd.f32 %v3655_v27, %v810_v48  ;;  %v1080_v63 = vmul.f32 %v3659_v45, %v1079_v57  ;;  %3666 = vpow2.f32 %v3511_v61  ;;  %v833_v15 = vand.u32 2147483648, %v4194_v46  ;;  %v1532_v48 = vld [vmem:[#allocation2 + $0x2] sm:$0xff] }
  0xbc   : > { %1355 = vst.msk [vmem:[#allocation2 + $0xf9] sm:$0xff] %vm1289_vm2, %v1276_v52  ;;  %v831_v24 = vand.u32 2147483647, %v4194_v46  ;;  %vm827_vm0 = vweird.f32 %v4194_v46  ;;  %vm1097_vm4 = vweird.f32 %v4206_v59  ;;  %3668 = vpow2.f32 %v3529_v8 }
  0xbd   : > { %v815_v56 = vsel %vm814_vm9, %v3655_v27, %v811_v53  ;;  %v1081_v5 = vadd.f32 %v3659_v45, %v1080_v63  ;;  %v1103_v27 = vand.u32 2147483648, %v4206_v59  ;;  %v1468_v33 = vmul.f32 %v4229_v13, %v1435_v20 }
  0xbe   : > { %v820_v30 = vsel %vm817_vm10, %v819_v58, %v815_v56  ;;  %v3663_v1 = vpop.eup %3662  ;;  %v1404_v34 = vmul.f32 %v4226_v10, %v1371_v21  ;;  %v834_v35 = vor.u32 1.1754944e-38, %v833_v15  ;;  %v1469_v37 = vmul.f32 %v4229_v13, %v1436_v26  ;;  %v4300_v15 = vld [vmem:[#allocation2 + $0x19] sm:$0xff] }
  0xbf   : > { %v1259_v62 = vmul.f32 %v820_v30, %v4100_v38  ;;  %v823_v38 = vmul.f32 %v3663_v1, %v4194_v46  ;;  %v1085_v11 = vsel %vm1084_vm13, %v3659_v45, %v1081_v5  ;;  %vm828_vm15 = vweird.f32 %v3663_v1 }
  0xc0   : > { %v3665_v9 = vpop.eup %3664  ;;  %v1090_v14 = vsel %vm1087_vm14, %v1089_v7, %v1085_v11  ;;  %vm829_vm6 = vmor %vm827_vm0, %vm828_vm15  ;;  %vm832_vm7 = vcmp.eq.f32.partialorder %v831_v24, 8.507059e+37  ;;  %v1403_v42 = vmul.f32 %v4226_v10, %v1370_v28  ;;  %v4248_v43 = vperm.slane %v4222_v6, 2  ;;  %v4264_v57 = vld [vmem:[#allocation2 + $0x20] sm:$0xff] }
  0xc1   : > { %1338 = vst.msk [vmem:[#allocation2 + $0x31] sm:$0xff] %vm1289_vm2, %v1259_v62  ;;  %v824_v12 = vsub.f32 1.0, %v823_v38  ;;  %v1093_v16 = vmul.f32 %v3665_v9, %v4206_v59  ;;  %v3667_v17 = vpop.eup %3666  ;;  %v1277_v23 = vmul.f32 %v1090_v14, %v4105_v40  ;;  %vm1098_vm5 = vweird.f32 %v3665_v9  ;;  %v4274_v62 = vld [vmem:[#allocation2 + $0x18] sm:$0xff] }
  0xc2   : > { %v1101_v40 = vand.u32 2147483647, %v4206_v59  ;;  %v4243_v36 = vadd.f32 1.0, %v3667_v17  ;;  %vm4253_vm8 = vmor %vm1097_vm4, %vm1098_vm5  ;;  %v1104_v47 = vor.u32 1.1754944e-38, %v1103_v27  ;;  %v3669_v50 = vpop.eup %3668  ;;  %v1501_v51 = vadd.f32 %v1469_v37, %v1404_v34 }
  0xc3   : > { %v825_v25 = vmul.f32 %v3663_v1, %v824_v12  ;;  %1356 = vst.msk [vmem:[#allocation2 + $0x109] sm:$0xff] %vm1289_vm2, %v1277_v23  ;;  %v1094_v32 = vsub.f32 1.0, %v1093_v16  ;;  %v1566_v52 = vmul.f32 %v4248_v43, %v1533_v44  ;;  %v1565_v56 = vmul.f32 %v4248_v43, %v1532_v48  ;;  %v4302_v16 = vld [vmem:[#allocation2 + $0x1a] sm:$0xff]  ;;  %v584_v23 = vpop.f32.mrf.mxu0 }
  0xc4   : > { %vm1102_vm3 = vcmp.eq.f32.partialorder %v1101_v40, 8.507059e+37  ;;  %3670 = vrcp.f32 %v4243_v36  ;;  %v1500_v58 = vadd.f32 %v1468_v33, %v1403_v42  ;;  %v4267_v59 = vperm.slane %v4222_v6, 3 }
  0xc5   : > { %v826_v31 = vadd.f32 %v3663_v1, %v825_v25  ;;  %v1095_v41 = vmul.f32 %v3665_v9, %v1094_v32  ;;  %v4269_v30 = vadd.f32 1.0, %v3669_v50  ;;  %v4272_v61 = vadd.f32 %v4034_v19, %v581_v18  ;;  %v4309_v25 = vld [vmem:[#allocation2 + $0x22] sm:$0xff] }
  0xc6   : > { %v4278_v0 = vadd.f32 %v4034_v19, %v626_v54  ;;  %v1598_v2 = vadd.f32 %v1566_v52, %v1501_v51  ;;  %v1663_v3 = vmul.f32 %v4267_v59, %v4264_v57  ;;  %v1597_v5 = vadd.f32 %v1565_v56, %v1500_v58  ;;  %v4350_v54 = vld [vmem:[%s7217_s3 + $0x8] ss:$0 sm:$0xff] }
  0xc7   : > { %v830_v39 = vsel %vm829_vm6, %v3663_v1, %v826_v31  ;;  %v1096_v29 = vadd.f32 %v3665_v9, %v1095_v41  ;;  %v1662_v38 = vmul.f32 %v4267_v59, %v4274_v62  ;;  %3672 = vrcp.f32 %v4269_v30 }
  0xc8   : > { %v835_v45 = vsel %vm832_vm7, %v834_v35, %v830_v39  ;;  %v3512_v7 = vmul.f32 -1.442695, %v4272_v61  ;;  %v4295_v11 = vperm.slane %v4222_v6, 4  ;;  %v1695_v12 = vadd.f32 %v1663_v3, %v1598_v2  ;;  %v4311_v24 = vld [vmem:[#allocation2 + $0x30] sm:$0xff] }
  0xc9   : > { %v1260_v49 = vmul.f32 %v835_v45, %v4135_v60  ;;  %v1100_v53 = vsel %vm4253_vm8, %v3665_v9, %v1096_v29  ;;  %v3530_v9 = vmul.f32 -1.442695, %v4278_v0  ;;  %v4298_v14 = vperm.slane %v4222_v6, 5  ;;  %v4329_v39 = vld [vmem:[#allocation2 + $0x31] sm:$0xff] }
  0xca   : > { %v1105_v60 = vsel %vm1102_vm3, %v1104_v47, %v1100_v53  ;;  %v4280_v1 = vpop.eup %3670  ;;  %v1694_v17 = vadd.f32 %v1662_v38, %v1597_v5  ;;  %v4305_v20 = vperm.slane %v4222_v6, 6  ;;  %3674 = vpow2.f32 %v3512_v7 }
  0xcb   : > { %1339 = vst.msk [vmem:[#allocation2 + $0x39] sm:$0xff] %vm1289_vm2, %v1260_v49  ;;  %v1278_v63 = vmul.f32 %v1105_v60, %v4170_v22  ;;  %v4289_v22 = vld [vmem:[#allocation2 + $0x21] sm:$0xff]  ;;  %v838_v8 = vmul.f32 %v4280_v1, %v4243_v36  ;;  %3676 = vpow2.f32 %v3530_v9  ;;  %v1759_v28 = vmul.f32 %v4295_v11, %v4300_v15 }
  0xcc   : > { %v1760_v21 = vmul.f32 %v4295_v11, %v4289_v22  ;;  %v1856_v32 = vmul.f32 %v4298_v14, %v4302_v16  ;;  %v4320_v40 = vperm.slane %v4222_v6, 7  ;;  %v4325_v34 = vadd.f32 %v4034_v19, %v584_v23 }
  0xcd   : > { %1357 = vst.msk [vmem:[#allocation2 + $0x111] sm:$0xff] %vm1289_vm2, %v1278_v63  ;;  %v839_v26 = vsub.f32 1.0, %v838_v8  ;;  %v4313_v27 = vpop.eup %3672  ;;  %v1791_v35 = vadd.f32 %v1759_v28, %v1694_v17  ;;  %v1857_v37 = vmul.f32 %v4298_v14, %v4309_v25  ;;  %v1954_v41 = vmul.f32 %v4305_v20, %v4311_v24 }
  0xce   : > { %v1792_v31 = vadd.f32 %v1760_v21, %v1695_v12  ;;  %v1108_v6 = vmul.f32 %v4313_v27, %v4269_v30  ;;  %v848_v48 = vand.u32 2147483648, %v4243_v36  ;;  %v2051_v29 = vmul.f32 %v4320_v40, %v4329_v39 }
  0xcf   : > { %v840_v42 = vmul.f32 %v4280_v1, %v839_v26  ;;  %v1888_v45 = vadd.f32 %v1856_v32, %v1791_v35  ;;  %vm843_vm9 = vweird.f32 %v4280_v1  ;;  %v846_v50 = vand.u32 2147483647, %v4243_v36  ;;  %v1390_v35 = vld [vmem:[#allocation2 + $0xf0] sm:$0xff] }
  0xd0   : > { %v3675_v44 = vpop.eup %3674  ;;  %v1889_v46 = vadd.f32 %v1857_v37, %v1792_v31  ;;  %v3513_v18 = vmul.f32 -1.442695, %v4325_v34  ;;  %vm842_vm10 = vweird.f32 %v4243_v36  ;;  %v1116_v52 = vand.u32 2147483647, %v4269_v30 }
  0xd1   : > { %v3677_v49 = vpop.eup %3676  ;;  %v1986_v51 = vadd.f32 %v1954_v41, %v1888_v45  ;;  %v1118_v53 = vand.u32 2147483648, %v4269_v30  ;;  %v841_v60 = vadd.f32 %v4280_v1, %v840_v42  ;;  %v1109_v58 = vsub.f32 1.0, %v1108_v6  ;;  %vm844_vm13 = vmor %vm842_vm10, %vm843_vm9  ;;  %v1455_v45 = vld [vmem:[#allocation2 + $0xf1] sm:$0xff] }
  0xd2   : > { %v4322_v33 = vld [vmem:[#allocation2 + $0x38] sm:$0xff]  ;;  %vm1112_vm11 = vweird.f32 %v4269_v30  ;;  %vm1113_vm12 = vweird.f32 %v4313_v27  ;;  %v849_v2 = vor.u32 1.1754944e-38, %v848_v48  ;;  %v4361_v3 = vadd.f32 1.0, %v3675_v44 }
  0xd3   : > { %v1955_v47 = vmul.f32 %v4305_v20, %v4322_v33  ;;  %v4352_v56 = vld [vmem:[#allocation2 + $0x39] sm:$0xff]  ;;  %v4363_v5 = vadd.f32 1.0, %v3677_v49  ;;  %v845_v38 = vsel %vm844_vm13, %v4280_v1, %v841_v60  ;;  %vm847_vm14 = vcmp.eq.f32.partialorder %v846_v50, 8.507059e+37  ;;  %vm4369_vm15 = vmor %vm1112_vm11, %vm1113_vm12 }
  0xd4   : > { %v4357_v63 = vld [vmem:[#allocation2 + $0x32] sm:$0xff]  ;;  %v1110_v7 = vmul.f32 %v4313_v27, %v1109_v58  ;;  %3678 = vpow2.f32 %v3513_v18  ;;  %v2052_v30 = vmul.f32 %v4320_v40, %v4352_v56  ;;  %v850_v8 = vsel %vm847_vm14, %v849_v2, %v845_v38  ;;  %v4377_v21 = vld [vmem:[#allocation2 + $0x3a] sm:$0xff] }
  0xd5   : > { %v1987_v36 = vadd.f32 %v1955_v47, %v1889_v46  ;;  %vm4373_vm0 = vcmp.eq.f32.partialorder %v1116_v52, 8.507059e+37  ;;  %v1119_v17 = vor.u32 1.1754944e-38, %v1118_v53  ;;  %v2148_v1 = vmul.f32 %v4350_v54, %v4357_v63  ;;  %v1391_v53 = vld [vmem:[#allocation2 + $0xf8] sm:$0xff] }
  0xd6   : > { %v1261_v23 = vmul.f32 %v850_v8, %v4203_v55  ;;  %v1111_v26 = vadd.f32 %v4313_v27, %v1110_v7  ;;  %3680 = vrcp.f32 %v4361_v3  ;;  %v2083_v31 = vadd.f32 %v2051_v29, %v1986_v51  ;;  %v4430_v2 = vld [vmem:[#allocation2 + $0xf2] sm:$0xff] }
  0xd7   : > { %v2084_v28 = vadd.f32 %v2052_v30, %v1987_v36  ;;  %3682 = vrcp.f32 %v4363_v5  ;;  %v1406_v37 = vmul.f32 %v4226_v10, %v4264_v57  ;;  %v1471_v55 = vmul.f32 %v4229_v13, %v4289_v22  ;;  %v4404_v57 = vld [vmem:[%s7218_s4] ss:$0 sm:$0xff] }
  0xd8   : > { %1340 = vst.msk [vmem:[#allocation2 + $0x49] sm:$0xff] %vm1289_vm2, %v1261_v23  ;;  %v1115_v32 = vsel %vm4369_vm15, %v4313_v27, %v1111_v26  ;;  %v2149_v41 = vmul.f32 %v4350_v54, %v4377_v21  ;;  %v1405_v44 = vmul.f32 %v4226_v10, %v4274_v62  ;;  %v1470_v27 = vmul.f32 %v4229_v13, %v4300_v15  ;;  %v4428_v36 = vld [vmem:[#allocation2 + $0xf9] sm:$0xff] }
  0xd9   : > { %v1120_v42 = vsel %vm4373_vm0, %v1119_v17, %v1115_v32  ;;  %v2180_v46 = vadd.f32 %v2148_v1, %v2083_v31  ;;  %v1423_v49 = vmul.f32 %v4226_v10, %v1390_v35  ;;  %v1488_v15 = vmul.f32 %v4229_v13, %v1455_v45 }
  0xda   : > { %v3679_v6 = vpop.eup %3678  ;;  %v1279_v22 = vmul.f32 %v1120_v42, %v4216_v4  ;;  %v2181_v47 = vadd.f32 %v2149_v41, %v2084_v28  ;;  %v1503_v50 = vadd.f32 %v1471_v55, %v1406_v37  ;;  %v1567_v18 = vmul.f32 %v4248_v43, %v4302_v16 }
  0xdb   : > { %v4411_v62 = vadd.f32 1.0, %v3679_v6  ;;  %v1502_v51 = vadd.f32 %v1470_v27, %v1405_v44  ;;  %v4421_v52 = vmul.f32 %v4267_v59, %v1390_v35  ;;  %v4424_v60 = vadd.f32 %v4404_v57, %v2180_v46 }
  0xdc   : > { %v4407_v48 = vpop.eup %3680  ;;  %1358 = vst.msk [vmem:[#allocation2 + $0x121] sm:$0xff] %vm1289_vm2, %v1279_v22  ;;  %v1568_v58 = vmul.f32 %v4248_v43, %v4309_v25  ;;  %v4433_v16 = vadd.f32 %v4404_v57, %v2181_v47  ;;  %v4437_v7 = vmul.f32 %v4295_v11, %v1455_v45  ;;  %v4440_v30 = vmul.f32 %v4305_v20, %v1390_v35  ;;  %v4445_v25 = vld [vmem:[#allocation2 + $0xfa] sm:$0xff] }
  0xdd   : > { %v4413_v29 = vpop.eup %3682  ;;  %v853_v4 = vmul.f32 %v4407_v48, %v4361_v3  ;;  %7254 = vst [vmem:[#allocation4_spill] sm:$0xff] %v4421_v52  ;;  %3684 = vrcp.f32 %v4411_v62  ;;  %v4443_v8 = vmul.f32 %v4320_v40, %v1455_v45  ;;  %v1520_v12 = vadd.f32 %v1488_v15, %v1423_v49  ;;  %v629_v45 = vpop.f32.mrf.mxu1 }
  0xde   : > { %7255 = vst [vmem:[#allocation5_spill] sm:$0xff] %v4437_v7  ;;  %v1123_v9 = vmul.f32 %v4413_v29, %v4363_v5  ;;  %v1599_v17 = vadd.f32 %v1567_v18, %v1502_v51  ;;  %v4449_v1 = vadd.f32 %v1568_v58, %v1503_v50  ;;  %v1424_v23 = vmul.f32 %v4226_v10, %v1391_v53 }
  0xdf   : > { %v854_v38 = vsub.f32 1.0, %v853_v4  ;;  %7256 = vst [vmem:[#allocation6_spill] sm:$0xff] %v4440_v30  ;;  %v1489_v26 = vmul.f32 %v4229_v13, %v4428_v36  ;;  %v1585_v28 = vmul.f32 %v4248_v43, %v4430_v2  ;;  %v4457_v31 = vmul.f32 %v4267_v59, %v1391_v53 }
  0xe0   : > { %7257 = vst [vmem:[#allocation7_spill] sm:$0xff] %v4443_v8  ;;  %v3539_v32 = vmul.f32 -1.442695, %v4424_v60  ;;  %v4462_v35 = vmul.f32 %v4248_v43, %v4445_v25  ;;  %v4466_v37 = vmul.f32 %v4295_v11, %v4428_v36  ;;  %v3540_v55 = vmul.f32 -1.442695, %v4433_v16 }
  0xe1   : > { %7258 = vst [vmem:[#allocation8_spill] sm:$0xff] %v4457_v31  ;;  %v855_v41 = vmul.f32 %v4407_v48, %v854_v38  ;;  %v4472_v42 = vmul.f32 %v4298_v14, %v4430_v2  ;;  %v4476_v6 = vmul.f32 %v4298_v14, %v4445_v25  ;;  %v863_v44 = vand.u32 2147483648, %v4361_v3 }
  0xe2   : > { %7259 = vst [vmem:[#allocation9_spill] sm:$0xff] %v4466_v37  ;;  %v1124_v27 = vsub.f32 1.0, %v1123_v9  ;;  %vm858_vm4 = vweird.f32 %v4407_v48  ;;  %v861_v22 = vand.u32 2147483647, %v4361_v3  ;;  %v1133_v47 = vand.u32 2147483648, %v4363_v5 }
  0xe3   : > { %7260 = vst [vmem:[#allocation10_spill] sm:$0xff] %v4472_v42  ;;  %v4479_v46 = vpop.eup %3684  ;;  %v4485_v49 = vadd.f32 %v4034_v19, %v629_v45  ;;  %3686 = vpow2.f32 %v3539_v32  ;;  %vm1127_vm5 = vweird.f32 %v4363_v5  ;;  %vm1128_vm6 = vweird.f32 %v4413_v29 }
  0xe4   : > { %7261 = vst [vmem:[#allocation11_spill] sm:$0xff] %v4476_v6  ;;  %v1131_v15 = vand.u32 2147483647, %v4363_v5  ;;  %v1521_v50 = vadd.f32 %v1489_v26, %v1424_v23  ;;  %3688 = vpow2.f32 %v3540_v55  ;;  %v856_v18 = vadd.f32 %v4407_v48, %v855_v41  ;;  %vm4498_vm9 = vmor %vm1127_vm5, %vm1128_vm6  ;;  %v1457_v5 = vld [vmem:[#allocation2 + $0x109] sm:$0xff]  ;;  %v586_v55 = vpop.f32.mrf.mxu0 }
  0xe5   : > { %vm857_vm7 = vweird.f32 %v4361_v3  ;;  %v1664_v4 = vmul.f32 %v4267_v59, %v4311_v24  ;;  %v864_v51 = vor.u32 1.1754944e-38, %v863_v44  ;;  %v1125_v58 = vmul.f32 %v4413_v29, %v1124_v27 }
  0xe6   : > { %vm859_vm8 = vmor %vm857_vm7, %vm858_vm4  ;;  %v868_v38 = vmul.f32 %v4479_v46, %v4411_v62  ;;  %vm862_vm3 = vcmp.eq.f32.partialorder %v861_v22, 8.507059e+37  ;;  %v1134_v23 = vor.u32 1.1754944e-38, %v1133_v47  ;;  %v3531_v3 = vmul.f32 -1.442695, %v4485_v49  ;;  %v1392_v47 = vld [vmem:[#allocation2 + $0x108] sm:$0xff] }
  0xe7   : > { %v860_v9 = vsel %vm859_vm8, %v4407_v48, %v856_v18  ;;  %v1126_v32 = vadd.f32 %v4413_v29, %v1125_v58  ;;  %vm4504_vm10 = vcmp.eq.f32.partialorder %v1131_v15, 8.507059e+37  ;;  %v1617_v44 = vadd.f32 %v1585_v28, %v1520_v12 }
  0xe8   : > { %v865_v26 = vsel %vm862_vm3, %v864_v51, %v860_v9  ;;  %v869_v41 = vsub.f32 1.0, %v868_v38  ;;  %v4509_v27 = vmul.f32 %v4305_v20, %v1391_v53  ;;  %v1407_v48 = vmul.f32 %v4226_v10, %v4311_v24 }
  0xe9   : > { %v1262_v45 = vmul.f32 %v865_v26, %v4272_v61  ;;  %v3687_v22 = vpop.eup %3686  ;;  %v1130_v18 = vsel %vm4498_vm9, %v4413_v29, %v1126_v32  ;;  %vm873_vm11 = vweird.f32 %v4479_v46  ;;  %v876_v12 = vand.u32 2147483647, %v4411_v62 }
  0xea   : > { %7266 = vst [vmem:[#allocation12_spill] sm:$0xff] %v4509_v27  ;;  %v870_v15 = vmul.f32 %v4479_v46, %v869_v41  ;;  %v3689_v28 = vpop.eup %3688  ;;  %v1472_v53 = vmul.f32 %v4229_v13, %v4329_v39  ;;  %v1696_v51 = vadd.f32 %v1664_v4, %v1599_v17  ;;  %v1135_v61 = vsel %vm4504_vm10, %v1134_v23, %v1130_v18 }
  0xeb   : > { %1341 = vst.msk [vmem:[#allocation2 + $0x51] sm:$0xff] %vm1289_vm2, %v1262_v45  ;;  %v878_v24 = vand.u32 2147483648, %v4411_v62  ;;  %v1280_v29 = vmul.f32 %v1135_v61, %v4278_v0  ;;  %vm872_vm12 = vweird.f32 %v4411_v62  ;;  %3690 = vpow2.f32 %v3531_v3 }
  0xec   : > { %v871_v58 = vadd.f32 %v4479_v46, %v870_v15  ;;  %v1761_v38 = vmul.f32 %v4295_v11, %v4329_v39  ;;  %v1682_v9 = vmul.f32 %v4267_v59, %v1392_v47  ;;  %v4532_v17 = vadd.f32 1.0, %v3687_v22  ;;  %vm874_vm13 = vmor %vm872_vm12, %vm873_vm11 }
  0xed   : > { %v879_v4 = vor.u32 1.1754944e-38, %v878_v24  ;;  %v1665_v0 = vmul.f32 %v4267_v59, %v4322_v33  ;;  %v4538_v23 = vadd.f32 1.0, %v3689_v28  ;;  %1359 = vst.msk [vmem:[#allocation2 + $0x129] sm:$0xff] %vm1289_vm2, %v1280_v29  ;;  %vm877_vm14 = vcmp.eq.f32.partialorder %v876_v12, 8.507059e+37 }
  0xee   : > { %v875_v62 = vsel %vm874_vm13, %v4479_v46, %v871_v58  ;;  %v4544_v39 = vmul.f32 %v4320_v40, %v4428_v36  ;;  %v4548_v3 = vmul.f32 %v4350_v54, %v4430_v2  ;;  %v4552_v26 = vmul.f32 %v4350_v54, %v4445_v25  ;;  %v1393_v2 = vld [vmem:[#allocation2 + $0x110] sm:$0xff] }
  0xef   : > { %v880_v32 = vsel %vm877_vm14, %v879_v4, %v875_v62  ;;  %v1618_v41 = vadd.f32 %v4462_v35, %v1521_v50  ;;  %v1504_v45 = vadd.f32 %v1472_v53, %v1407_v48  ;;  %v1793_v22 = vadd.f32 %v1761_v38, %v1696_v51  ;;  %v1554_v4 = vld [vmem:[#allocation2 + $0x10a] sm:$0xff] }
  0xf0   : > { %7267 = vst [vmem:[#allocation13_spill] sm:$0xff] %v4544_v39  ;;  %v1263_v46 = vmul.f32 %v880_v32, %v4325_v34  ;;  %v1425_v18 = vmul.f32 %v4226_v10, %v1392_v47  ;;  %v1490_v36 = vmul.f32 %v4229_v13, %v1457_v5  ;;  %v1779_v15 = vmul.f32 %v4295_v11, %v1457_v5 }
  0xf1   : > { %7268 = vst [vmem:[#allocation14_spill] sm:$0xff] %v4548_v3  ;;  %3692 = vrcp.f32 %v4532_v17  ;;  %v3691_v12 = vpop.eup %3690  ;;  %v1714_v25 = vadd.f32 %v1682_v9, %v1617_v44  ;;  %v1697_v28 = vadd.f32 %v1665_v0, %v4449_v1  ;;  %v4564_v35 = vadd.f32 %v4034_v19, %v586_v55  ;;  %v1458_v1 = vld [vmem:[#allocation2 + $0x111] sm:$0xff]  ;;  %v4591_v0 = vld [vmem:[#allocation2 + $0x48] sm:$0xff]  ;;  %v1394_v3 = vld [vmem:[#allocation2 + $0x120] sm:$0xff] }
  0xf2   : > { %7269 = vst [vmem:[#allocation15_spill] sm:$0xff] %v4552_v26  ;;  %3694 = vrcp.f32 %v4538_v23  ;;  %v4567_v34 = vmul.f32 %v4305_v20, %v1392_v47  ;;  %v4570_v50 = vmul.f32 %v4320_v40, %v1457_v5  ;;  %v1408_v48 = vmul.f32 %v4226_v10, %v4322_v33  ;;  %v4585_v29 = vld [vmem:[#allocation2 + $0x50] sm:$0xff] }
  0xf3   : > { %1342 = vst.msk [vmem:[#allocation2 + $0x61] sm:$0xff] %vm1289_vm2, %v1263_v46  ;;  %v1473_v44 = vmul.f32 %v4229_v13, %v4352_v56  ;;  %v1762_v53 = vmul.f32 %v4295_v11, %v4352_v56  ;;  %v1426_v51 = vmul.f32 %v4226_v10, %v1393_v2  ;;  %v1491_v19 = vmul.f32 %v4229_v13, %v1458_v1  ;;  %v1555_v5 = vld [vmem:[#allocation2 + $0x112] sm:$0xff] }
  0xf4   : > { %7270 = vst [vmem:[#allocation16_spill] sm:$0xff] %v4567_v34  ;;  %v1683_v47 = vmul.f32 %v4267_v59, %v1393_v2  ;;  %v1522_v61 = vadd.f32 %v1490_v36, %v1425_v18  ;;  %v1569_v24 = vmul.f32 %v4248_v43, %v4357_v63  ;;  %v1858_v33 = vmul.f32 %v4298_v14, %v4357_v63 }
  0xf5   : > { %7271 = vst [vmem:[#allocation17_spill] sm:$0xff] %v4570_v50  ;;  %v4587_v58 = vadd.f32 1.0, %v3691_v12  ;;  %v1811_v38 = vadd.f32 %v1779_v15, %v1714_v25  ;;  %v1570_v56 = vmul.f32 %v4248_v43, %v4377_v21  ;;  %v1794_v9 = vadd.f32 %v1762_v53, %v1697_v28  ;;  %v631_v53 = vpop.f32.mrf.mxu1 }
  0xf6   : > { %v3514_v62 = vmul.f32 -1.442695, %v4564_v35  ;;  %v1505_v55 = vadd.f32 %v1473_v44, %v1408_v48  ;;  %v1859_v63 = vmul.f32 %v4298_v14, %v4377_v21  ;;  %v1587_v46 = vmul.f32 %v4248_v43, %v1554_v4 }
  0xf7   : > { %v4594_v32 = vpop.eup %3692  ;;  %v1588_v18 = vmul.f32 %v4248_v43, %v1555_v5  ;;  %v1523_v15 = vadd.f32 %v1491_v19, %v1426_v51  ;;  %v1715_v12 = vadd.f32 %v1683_v47, %v1618_v41  ;;  %v1780_v25 = vmul.f32 %v4295_v11, %v1458_v1  ;;  %v4624_v47 = vld [vmem:[%s7216_s2] ss:$0 sm:$0xff] }
  0xf8   : > { %v4600_v36 = vpop.eup %3694  ;;  %v1957_v28 = vmul.f32 %v4305_v20, %v4585_v29  ;;  %v4605_v50 = vadd.f32 %v1569_v24, %v1504_v45  ;;  %v1890_v48 = vadd.f32 %v1858_v33, %v1793_v22  ;;  %v1956_v21 = vmul.f32 %v4305_v20, %v4591_v0  ;;  %v4619_v22 = vld [vmem:[#allocation2 + $0x51] sm:$0xff] }
  0xf9   : > { %3696 = vrcp.f32 %v4587_v58  ;;  %v1891_v44 = vadd.f32 %v1859_v63, %v1794_v9  ;;  %v2377_v34 = vmul.f32 %v4594_v32, %v4532_v17  ;;  %v1876_v41 = vmul.f32 %v4298_v14, %v1554_v4 }
  0xfa   : > { %3698 = vpow2.f32 %v3514_v62  ;;  %v4613_v51 = vadd.f32 %v1570_v56, %v1505_v55  ;;  %v2392_v19 = vmul.f32 %v4600_v36, %v4538_v23  ;;  %v4617_v45 = vadd.f32 %v1587_v46, %v1522_v61  ;;  %v4632_v62 = vld [vmem:[#allocation2 + $0x49] sm:$0xff] }
  0xfb   : > { %v4627_v24 = vadd.f32 %v4624_v47, %v631_v53  ;;  %v4629_v33 = vadd.f32 %v1588_v18, %v1523_v15  ;;  %v1812_v9 = vadd.f32 %v1780_v25, %v1715_v12  ;;  %v1877_v56 = vmul.f32 %v4298_v14, %v1555_v5  ;;  %v4634_v55 = vld [vmem:[#allocation2 + $0x4a] sm:$0xff]  ;;  %v589_v25 = vpop.f32.mrf.mxu0 }
  0xfc   : > { %v1989_v61 = vadd.f32 %v1957_v28, %v1891_v44  ;;  %v2387_v63 = vand.u32 2147483648, %v4532_v17  ;;  %v4638_v46 = vmul.f32 %v4305_v20, %v1393_v2  ;;  %v4641_v6 = vmul.f32 %v4320_v40, %v1458_v1 }
  0xfd   : > { %v1988_v53 = vadd.f32 %v1956_v21, %v1890_v48  ;;  %v2378_v26 = vsub.f32 1.0, %v2377_v34  ;;  %v4643_v18 = vadd.f32 %v1876_v41, %v1811_v38  ;;  %v4646_v15 = vmul.f32 %v4350_v54, %v1554_v4 }
  0xfe   : > { %7272 = vst [vmem:[#allocation18_spill] sm:$0xff] %v4638_v46  ;;  %v2054_v12 = vmul.f32 %v4320_v40, %v4619_v22  ;;  %v2393_v44 = vsub.f32 1.0, %v2392_v19  ;;  %v2053_v2 = vmul.f32 %v4320_v40, %v4632_v62  ;;  %v4654_v46 = vld [vmem:[#allocation2 + $0x52] sm:$0xff]  ;;  %v2150_v34 = vmul.f32 %v4350_v54, %v4634_v55 }
  0xff   : > { %7273 = vst [vmem:[#allocation19_spill] sm:$0xff] %v4641_v6  ;;  %v4650_v28 = vpop.eup %3696  ;;  %v3532_v1 = vmul.f32 -1.442695, %v4627_v24  ;;  %v2385_v4 = vand.u32 2147483647, %v4532_v17  ;;  %v4660_v48 = vadd.f32 %v1877_v56, %v1812_v9  ;;  %v4663_v21 = vmul.f32 %v4350_v54, %v1555_v5 }
 0x100   : > { %7274 = vst [vmem:[#allocation20_spill] sm:$0xff] %v4646_v15  ;;  %v3699_v38 = vpop.eup %3698  ;;  %v2086_v41 = vadd.f32 %v2054_v12, %v1989_v61  ;;  %vm2381_vm15 = vweird.f32 %v4532_v17  ;;  %v4666_v19 = vor.u32 1.1754944e-38, %v2387_v63  ;;  %v2400_v15 = vand.u32 2147483647, %v4538_v23 }
 0x101   : > { %7275 = vst [vmem:[#allocation21_spill] sm:$0xff] %v4663_v21  ;;  %v2085_v6 = vadd.f32 %v2053_v2, %v1988_v53  ;;  %v4670_v42 = vadd.f32 %v4624_v47, %v589_v25  ;;  %v2379_v37 = vmul.f32 %v4594_v32, %v2378_v26  ;;  %v2402_v39 = vand.u32 2147483648, %v4538_v23  ;;  %v634_v53 = vpop.f32.mrf.mxu1 }
 0x102   : > { %v2151_v9 = vmul.f32 %v4350_v54, %v4654_v46  ;;  %v1138_v5 = vmul.f32 %v4650_v28, %v4587_v58  ;;  %v2394_v56 = vmul.f32 %v4600_v36, %v2393_v44  ;;  %v4679_v63 = vadd.f32 1.0, %v3699_v38 }
 0x103   : > { %v2182_v61 = vadd.f32 %v2150_v34, %v2085_v6  ;;  %3700 = vpow2.f32 %v3532_v1  ;;  %v1148_v2 = vand.u32 2147483648, %v4587_v58  ;;  %v4683_v26 = vadd.f32 %v4624_v47, %v634_v53 }
 0x104   : > { %v2183_v12 = vadd.f32 %v2151_v9, %v2086_v41  ;;  %v1139_v25 = vsub.f32 1.0, %v1138_v5  ;;  %vm1142_vm0 = vweird.f32 %v4587_v58  ;;  %vm1143_vm4 = vweird.f32 %v4650_v28 }
 0x105   : > { %v1146_v21 = vand.u32 2147483647, %v4587_v58  ;;  %v3515_v44 = vmul.f32 -1.442695, %v4670_v42  ;;  %vm2382_vm5 = vweird.f32 %v4594_v32  ;;  %vm4690_vm6 = vcmp.eq.f32.partialorder %v2385_v4, 8.507059e+37  ;;  %vm4712_vm3 = vmor %vm1142_vm0, %vm1143_vm4 }
 0x106   : > { %vm2396_vm7 = vweird.f32 %v4538_v23  ;;  %v1140_v34 = vmul.f32 %v4650_v28, %v1139_v25  ;;  %3702 = vrcp.f32 %v4679_v63  ;;  %v2380_v1 = vadd.f32 %v4594_v32, %v2379_v37  ;;  %vm4728_vm11 = vmor %vm2381_vm15, %vm2382_vm5  ;;  %v1459_v37 = vld [vmem:[#allocation2 + $0x121] sm:$0xff] }
 0x107   : > { %vm2397_vm8 = vweird.f32 %v4600_v36  ;;  %v4700_v38 = vadd.f32 %v4404_v57, %v2182_v61  ;;  %v3533_v41 = vmul.f32 -1.442695, %v4683_v26  ;;  %v2395_v4 = vadd.f32 %v4600_v36, %v2394_v56 }
 0x108   : > { %v4705_v9 = vadd.f32 %v4404_v57, %v2183_v12  ;;  %v1141_v5 = vadd.f32 %v4650_v28, %v1140_v34  ;;  %v1149_v53 = vor.u32 1.1754944e-38, %v1148_v2  ;;  %vm4716_vm9 = vcmp.eq.f32.partialorder %v2400_v15, 8.507059e+37  ;;  %vm4744_vm12 = vmor %vm2396_vm7, %vm2397_vm8 }
 0x109   : > { %v3701_v61 = vpop.eup %3700  ;;  %v2403_v56 = vor.u32 1.1754944e-38, %v2402_v39  ;;  %vm4720_vm10 = vcmp.eq.f32.partialorder %v1146_v21, 8.507059e+37  ;;  %3704 = vpow2.f32 %v3515_v44  ;;  %v1409_v15 = vmul.f32 %v4226_v10, %v4591_v0  ;;  %v591_v44 = vpop.f32.mrf.mxu0 }
 0x10a   : > { %v1474_v2 = vmul.f32 %v4229_v13, %v4632_v62  ;;  %v1666_v39 = vmul.f32 %v4267_v59, %v4591_v0  ;;  %v1763_v21 = vmul.f32 %v4295_v11, %v4632_v62  ;;  %v3541_v34 = vmul.f32 -1.442695, %v4700_v38 }
 0x10b   : > { %v1145_v7 = vsel %vm4712_vm3, %v4650_v28, %v1141_v5  ;;  %v4752_v31 = vadd.f32 1.0, %v3701_v61  ;;  %3706 = vpow2.f32 %v3533_v41  ;;  %v2384_v62 = vsel %vm4728_vm11, %v4594_v32, %v2380_v1 }
 0x10c   : > { %v3703_v0 = vpop.eup %3702  ;;  %v2399_v23 = vsel %vm4744_vm12, %v4600_v36, %v2395_v4  ;;  %v3542_v27 = vmul.f32 -1.442695, %v4705_v9  ;;  %v1150_v52 = vsel %vm4720_vm10, %v1149_v53, %v1145_v7  ;;  %v4767_v5 = vadd.f32 %v4624_v47, %v591_v44 }
 0x10d   : > { %v1281_v28 = vmul.f32 %v1150_v52, %v4485_v49  ;;  %v883_v41 = vmul.f32 %v3703_v0, %v4679_v63  ;;  %3708 = vrcp.f32 %v4752_v31  ;;  %v1698_v32 = vadd.f32 %v1666_v39, %v4605_v50 }
 0x10e   : > { %v1427_v36 = vmul.f32 %v4226_v10, %v1394_v3  ;;  %v1492_v1 = vmul.f32 %v4229_v13, %v1459_v37  ;;  %v1684_v4 = vmul.f32 %v4267_v59, %v1394_v3  ;;  %v2389_v52 = vsel %vm4690_vm6, %v4666_v19, %v2384_v62 }
 0x10f   : > { %v3705_v61 = vpop.eup %3704  ;;  %v1974_v7 = vmul.f32 %v4305_v20, %v1394_v3  ;;  %3710 = vpow2.f32 %v3541_v34  ;;  %1360 = vst.msk [vmem:[#allocation2 + $0x139] sm:$0xff] %vm1289_vm2, %v1281_v28  ;;  %v884_v49 = vsub.f32 1.0, %v883_v41  ;;  %v2404_v50 = vsel %vm4716_vm9, %v2403_v56, %v2399_v23 }
 0x110   : > { %3712 = vpow2.f32 %v3542_v27  ;;  %v893_v53 = vand.u32 2147483648, %v4679_v63  ;;  %v4781_v12 = vadd.f32 1.0, %v3705_v61  ;;  %vm888_vm13 = vweird.f32 %v3703_v0 }
 0x111   : > { %v3707_v58 = vpop.eup %3706  ;;  %v885_v39 = vmul.f32 %v3703_v0, %v884_v49  ;;  %v891_v6 = vand.u32 2147483647, %v4679_v63  ;;  %v3516_v19 = vmul.f32 -1.442695, %v4767_v5  ;;  %v1716_v3 = vadd.f32 %v1684_v4, %v4617_v45 }
 0x112   : > { %v1781_v44 = vmul.f32 %v4295_v11, %v1459_v37  ;;  %v2071_v17 = vmul.f32 %v4320_v40, %v1459_v37  ;;  %3714 = vrcp.f32 %v4781_v12  ;;  %v4792_v25 = vmul.f32 %v2404_v50, %v4433_v16 }
 0x113   : > { %v4789_v27 = vpop.eup %3708  ;;  %v2006_v56 = vadd.f32 %v1974_v7, %v4643_v18  ;;  %v886_v34 = vadd.f32 %v3703_v0, %v885_v39  ;;  %vm887_vm14 = vweird.f32 %v4679_v63  ;;  %v4797_v62 = vmul.f32 %v2389_v52, %v4424_v60 }
 0x114   : > { %7288 = vst [vmem:[#allocation22_spill] sm:$0xff] %v4792_v25  ;;  %vm889_vm15 = vmor %vm887_vm14, %vm888_vm13  ;;  %v894_v45 = vor.u32 1.1754944e-38, %v893_v53  ;;  %v1153_v23 = vmul.f32 %v4789_v27, %v4752_v31  ;;  %v4801_v37 = vadd.f32 1.0, %v3707_v58  ;;  %v1506_v41 = vadd.f32 %v1474_v2, %v1409_v15 }
 0x115   : > { %7289 = vst [vmem:[#allocation23_spill] sm:$0xff] %v4797_v62  ;;  %v3711_v28 = vpop.eup %3710  ;;  %v890_v4 = vsel %vm889_vm15, %v3703_v0, %v886_v34  ;;  %vm892_vm0 = vcmp.eq.f32.partialorder %v891_v6, 8.507059e+37  ;;  %3716 = vpow2.f32 %v3516_v19  ;;  %v1795_v18 = vadd.f32 %v1763_v21, %v1698_v32 }
 0x116   : > { %v3713_v16 = vpop.eup %3712  ;;  %v4803_v61 = vadd.f32 %v1492_v1, %v1427_v36  ;;  %v895_v63 = vsel %vm892_vm0, %v894_v45, %v890_v4  ;;  %3718 = vrcp.f32 %v4801_v37  ;;  %v2889_v60 = vsel %vm1289_vm2, %v4792_v25, 0.0 }
 0x117   : > { %v4808_v52 = vadd.f32 %v1781_v44, %v1716_v3  ;;  %v2103_v7 = vadd.f32 %v2071_v17, %v2006_v56  ;;  %v1154_v49 = vsub.f32 1.0, %v1153_v23  ;;  %v2888_v15 = vsel %vm1289_vm2, %v4797_v62, 0.0  ;;  %v4835_v3 = vld [vmem:[#allocation2 + $0x122] sm:$0xff] }
 0x118   : > { %v4810_v50 = vpop.eup %3714  ;;  %v1667_v2 = vmul.f32 %v4267_v59, %v4585_v29  ;;  %v4816_v21 = vadd.f32 1.0, %v3711_v28  ;;  %v1163_v0 = vand.u32 2147483648, %v4752_v31  ;;  %v1264_v32 = vmul.f32 %v895_v63, %v4564_v35  ;;  %v1395_v63 = vld [vmem:[#allocation2 + $0x128] sm:$0xff]  ;;  %v4884_v23 = vld [vmem:[#allocation2 + $0x60] sm:$0xff] }
 0x119   : > { %vm1157_vm4 = vweird.f32 %v4752_v31  ;;  %vm1158_vm5 = vweird.f32 %v4789_v27  ;;  %v1161_v36 = vand.u32 2147483647, %v4752_v31  ;;  %v4823_v1 = vadd.f32 %v2889_v60, %v2888_v15 }
 0x11a   : > { %v1410_v53 = vmul.f32 %v4226_v10, %v4585_v29  ;;  %v1475_v58 = vmul.f32 %v4229_v13, %v4619_v22  ;;  %v1571_v39 = vmul.f32 %v4248_v43, %v4634_v55  ;;  %v1572_v35 = vmul.f32 %v4248_v43, %v4654_v46  ;;  %1343 = vst.msk [vmem:[#allocation2 + $0x69] sm:$0xff] %vm1289_vm2, %v1264_v32  ;;  %vm4852_vm6 = vmor %vm1157_vm4, %vm1158_vm5  ;;  %v1460_v32 = vld [vmem:[#allocation2 + $0x129] sm:$0xff] }
 0x11b   : > { %v3717_v6 = vpop.eup %3716  ;;  %v4833_v19 = vadd.f32 1.0, %v3713_v16  ;;  %v1155_v44 = vmul.f32 %v4789_v27, %v1154_v49  ;;  %v898_v29 = vmul.f32 %v4810_v50, %v4781_v12  ;;  %v1699_v56 = vadd.f32 %v1667_v2, %v4613_v51 }
 0x11c   : > { %v4841_v17 = vpop.eup %3718  ;;  %v1764_v34 = vmul.f32 %v4295_v11, %v4619_v22  ;;  %v1860_v45 = vmul.f32 %v4298_v14, %v4634_v55  ;;  %v1164_v28 = vor.u32 1.1754944e-38, %v1163_v0  ;;  %3720 = vrcp.f32 %v4816_v21 }
 0x11d   : > { %v1156_v4 = vadd.f32 %v4789_v27, %v1155_v44  ;;  %vm1162_vm7 = vcmp.eq.f32.partialorder %v1161_v36, 8.507059e+37  ;;  %v899_v51 = vsub.f32 1.0, %v898_v29  ;;  %v1507_v16 = vadd.f32 %v1475_v58, %v1410_v53  ;;  %v636_v53 = vpop.f32.mrf.mxu1 }
 0x11e   : > { %v1861_v22 = vmul.f32 %v4298_v14, %v4654_v46  ;;  %v2168_v55 = vmul.f32 %v4350_v54, %v4835_v3  ;;  %v1168_v31 = vmul.f32 %v4841_v17, %v4801_v37  ;;  %3722 = vrcp.f32 %v4833_v19 }
 0x11f   : > { %v1160_v60 = vsel %vm4852_vm6, %v4789_v27, %v1156_v4  ;;  %v900_v49 = vmul.f32 %v4810_v50, %v899_v51  ;;  %v4869_v15 = vadd.f32 1.0, %v3717_v6  ;;  %v4871_v2 = vadd.f32 %v1571_v39, %v1506_v41 }
 0x120   : > { %v1796_v46 = vadd.f32 %v1764_v34, %v1699_v56  ;;  %v1428_v0 = vmul.f32 %v4226_v10, %v1395_v63  ;;  %v1165_v36 = vsel %vm1162_vm7, %v1164_v28, %v1160_v60  ;;  %v1493_v58 = vmul.f32 %v4229_v13, %v1460_v32  ;;  %v4882_v34 = vld [vmem:[#allocation2 + $0x12a] sm:$0xff] }
 0x121   : > { %v1589_v44 = vmul.f32 %v4248_v43, %v4835_v3  ;;  %v1282_v29 = vmul.f32 %v1165_v36, %v4627_v24  ;;  %3724 = vrcp.f32 %v4869_v15  ;;  %v1892_v27 = vadd.f32 %v1860_v45, %v1795_v18 }
 0x122   : > { %v2200_v6 = vadd.f32 %v2168_v55, %v2103_v7  ;;  %v908_v41 = vand.u32 2147483648, %v4781_v12  ;;  %v1169_v39 = vsub.f32 1.0, %v1168_v31  ;;  %v4880_v56 = vpop.eup %3720  ;;  %v901_v28 = vadd.f32 %v4810_v50, %v900_v49 }
 0x123   : > { %1361 = vst.msk [vmem:[#allocation2 + $0x141] sm:$0xff] %vm1289_vm2, %v1282_v29  ;;  %vm903_vm8 = vweird.f32 %v4810_v50  ;;  %v906_v24 = vand.u32 2147483647, %v4781_v12  ;;  %v4891_v18 = vadd.f32 %v4624_v47, %v636_v53  ;;  %v4893_v7 = vadd.f32 %v1572_v35, %v1507_v16 }
 0x124   : > { %v1893_v45 = vadd.f32 %v1861_v22, %v1796_v46  ;;  %v1590_v4 = vmul.f32 %v4248_v43, %v4882_v34  ;;  %v1685_v51 = vmul.f32 %v4267_v59, %v1395_v63  ;;  %v4898_v55 = vpop.eup %3722  ;;  %v1525_v31 = vadd.f32 %v1493_v58, %v1428_v0  ;;  %v4919_v58 = vld [vmem:[#allocation2 + $0x68] sm:$0xff] }
 0x125   : > { %v4901_v60 = vadd.f32 %v1589_v44, %v4803_v61  ;;  %v1782_v49 = vmul.f32 %v4295_v11, %v1460_v32  ;;  %vm902_vm3 = vweird.f32 %v4781_v12  ;;  %v2407_v35 = vmul.f32 %v4880_v56, %v4816_v21 }
 0x126   : > { %v1958_v16 = vmul.f32 %v4305_v20, %v4884_v23  ;;  %vm904_vm9 = vmor %vm902_vm3, %vm903_vm8  ;;  %v909_v22 = vor.u32 1.1754944e-38, %v908_v41  ;;  %v1170_v46 = vmul.f32 %v4841_v17, %v1169_v39  ;;  %v4913_v0 = vadd.f32 %v4404_v57, %v2200_v6 }
 0x127   : > { %v4910_v36 = vpop.eup %3724  ;;  %v905_v61 = vsel %vm904_vm9, %v4810_v50, %v901_v28  ;;  %vm907_vm10 = vcmp.eq.f32.partialorder %v906_v24, 8.507059e+37  ;;  %v3534_v12 = vmul.f32 -1.442695, %v4891_v18  ;;  %v2422_v53 = vmul.f32 %v4898_v55, %v4833_v19  ;;  %v4932_v24 = vld [vmem:[#allocation2 + $0x61] sm:$0xff] }
 0x128   : > { %7292 = vst [vmem:[#allocation24_spill] sm:$0xff] %v4913_v0  ;;  %v910_v44 = vsel %vm907_vm10, %v909_v22, %v905_v61  ;;  %vm1172_vm11 = vweird.f32 %v4801_v37  ;;  %vm1173_vm12 = vweird.f32 %v4841_v17  ;;  %v4925_v29 = vmul.f32 %v4298_v14, %v4835_v3 }
 0x129   : > { %v1265_v6 = vmul.f32 %v910_v44, %v4670_v42  ;;  %v1178_v50 = vand.u32 2147483648, %v4801_v37  ;;  %v913_v41 = vmul.f32 %v4910_v36, %v4869_v15  ;;  %v2408_v39 = vsub.f32 1.0, %v2407_v35  ;;  %vm4942_vm13 = vmor %vm1172_vm11, %vm1173_vm12 }
 0x12a   : > { %v1717_v28 = vadd.f32 %v1685_v51, %v4629_v33  ;;  %v1171_v22 = vadd.f32 %v4841_v17, %v1170_v46  ;;  %v1176_v61 = vand.u32 2147483647, %v4801_v37  ;;  %v1975_v25 = vmul.f32 %v4305_v20, %v1395_v63 }
 0x12b   : > { %v1990_v3 = vadd.f32 %v1958_v16, %v1892_v27  ;;  %v1959_v42 = vmul.f32 %v4305_v20, %v4919_v58  ;;  %1344 = vst.msk [vmem:[#allocation2 + $0x79] sm:$0xff] %vm1289_vm2, %v1265_v6  ;;  %3726 = vpow2.f32 %v3534_v12  ;;  %v2423_v33 = vsub.f32 1.0, %v2422_v53 }
 0x12c   : > { %v4946_v51 = vadd.f32 %v1590_v4, %v1525_v31  ;;  %v4950_v46 = vmul.f32 %v4298_v14, %v4882_v34  ;;  %v3559_v63 = vmul.f32 -1.442695, %v4913_v0  ;;  %v4954_v27 = vmul.f32 %v4320_v40, %v1460_v32  ;;  %v4961_v4 = vld [vmem:[#allocation2 + $0x69] sm:$0xff] }
 0x12d   : > { %v2055_v37 = vmul.f32 %v4320_v40, %v4932_v24  ;;  %v1179_v16 = vor.u32 1.1754944e-38, %v1178_v50  ;;  %v914_v44 = vsub.f32 1.0, %v913_v41  ;;  %v2409_v6 = vmul.f32 %v4880_v56, %v2408_v39  ;;  %v4963_v31 = vld [vmem:[#allocation2 + $0x62] sm:$0xff] }
 0x12e   : > { %v4959_v12 = vadd.f32 %v1782_v49, %v1717_v28  ;;  %v1175_v53 = vsel %vm4942_vm13, %v4841_v17, %v1171_v22  ;;  %vm1177_vm14 = vcmp.eq.f32.partialorder %v1176_v61, 8.507059e+37  ;;  %v2417_v32 = vand.u32 2147483648, %v4816_v21 }
 0x12f   : > { %v4970_v62 = vadd.f32 %v1975_v25, %v4660_v48  ;;  %v2087_v50 = vadd.f32 %v2055_v37, %v1990_v3  ;;  %v1991_v41 = vadd.f32 %v1959_v42, %v1893_v45  ;;  %vm2411_vm15 = vweird.f32 %v4816_v21  ;;  %v4981_v45 = vld [vmem:[#allocation2 + $0x6a] sm:$0xff] }
 0x130   : > { %vm2412_vm0 = vweird.f32 %v4880_v56  ;;  %v2424_v49 = vmul.f32 %v4898_v55, %v2423_v33  ;;  %3728 = vpow2.f32 %v3559_v63  ;;  %v2056_v28 = vmul.f32 %v4320_v40, %v4961_v4 }
 0x131   : > { %v3727_v39 = vpop.eup %3726  ;;  %v2152_v17 = vmul.f32 %v4350_v54, %v4963_v31  ;;  %v1180_v22 = vsel %vm1177_vm14, %v1179_v16, %v1175_v53  ;;  %v915_v48 = vmul.f32 %v4910_v36, %v914_v44  ;;  %v2410_v25 = vadd.f32 %v4880_v56, %v2409_v6  ;;  %vm4992_vm5 = vmor %vm2411_vm15, %vm2412_vm0 }
 0x132   : > { %v1283_v61 = vmul.f32 %v1180_v22, %v4683_v26  ;;  %vm918_vm4 = vweird.f32 %v4910_v36  ;;  %v923_v3 = vand.u32 2147483648, %v4869_v15  ;;  %v2415_v42 = vand.u32 2147483647, %v4816_v21 }
 0x133   : > { %v2418_v35 = vor.u32 1.1754944e-38, %v2417_v32  ;;  %v2088_v33 = vadd.f32 %v2056_v28, %v1991_v41  ;;  %v921_v63 = vand.u32 2147483647, %v4869_v15  ;;  %v2432_v26 = vand.u32 2147483648, %v4833_v19 }
 0x134   : > { %1362 = vst.msk [vmem:[#allocation2 + $0x151] sm:$0xff] %vm1289_vm2, %v1283_v61  ;;  %v916_v16 = vadd.f32 %v4910_v36, %v915_v48  ;;  %vm917_vm6 = vweird.f32 %v4869_v15  ;;  %v5000_v44 = vadd.f32 1.0, %v3727_v39  ;;  %v2425_v6 = vadd.f32 %v4898_v55, %v2424_v49 }
 0x135   : > { %vm2427_vm7 = vweird.f32 %v4898_v55  ;;  %v2153_v21 = vmul.f32 %v4350_v54, %v4981_v45  ;;  %v2184_v53 = vadd.f32 %v2152_v17, %v2087_v50  ;;  %vm919_vm8 = vmor %vm917_vm6, %vm918_vm4  ;;  %v2414_v41 = vsel %vm4992_vm5, %v4880_v56, %v2410_v25  ;;  %v594_v25 = vpop.f32.mrf.mxu0 }
 0x136   : > { %v3729_v32 = vpop.eup %3728  ;;  %v920_v15 = vsel %vm919_vm8, %v4910_v36, %v916_v16  ;;  %v924_v39 = vor.u32 1.1754944e-38, %v923_v3  ;;  %3730 = vrcp.f32 %v5000_v44  ;;  %vm2426_vm3 = vweird.f32 %v4833_v19  ;;  %v1461_v16 = vld [vmem:[#allocation2 + $0x139] sm:$0xff] }
 0x137   : > { %v2430_v49 = vand.u32 2147483647, %v4833_v19  ;;  %v2185_v28 = vadd.f32 %v2153_v21, %v2088_v33  ;;  %vm922_vm9 = vcmp.eq.f32.partialorder %v921_v63, 8.507059e+37  ;;  %vm2416_vm10 = vcmp.eq.f32.partialorder %v2415_v42, 8.507059e+37  ;;  %vm5015_vm11 = vmor %vm2426_vm3, %vm2427_vm7 }
 0x138   : > { %v1411_v50 = vmul.f32 %v4226_v10, %v4884_v23  ;;  %v1476_v56 = vmul.f32 %v4229_v13, %v4932_v24  ;;  %v925_v36 = vsel %vm922_vm9, %v924_v39, %v920_v15  ;;  %v2419_v17 = vsel %vm2416_vm10, %v2418_v35, %v2414_v41  ;;  %v1396_v35 = vld [vmem:[#allocation2 + $0x138] sm:$0xff] }
 0x139   : > { %v2429_v22 = vsel %vm5015_vm11, %v4898_v55, %v2425_v6  ;;  %v5027_v19 = vadd.f32 %v4404_v57, %v2184_v53  ;;  %v1266_v48 = vmul.f32 %v925_v36, %v4767_v5  ;;  %v2433_v61 = vor.u32 1.1754944e-38, %v2432_v26  ;;  %v5043_v5 = vld [vmem:[%s7217_s3 + $0x8] ss:$0 sm:$0xff] }
 0x13a   : > { %v1910_v3 = vadd.f32 %v4925_v29, %v4808_v52  ;;  %v5032_v42 = vadd.f32 1.0, %v3729_v32  ;;  %v1668_v33 = vmul.f32 %v4267_v59, %v4884_v23  ;;  %vm2431_vm12 = vcmp.eq.f32.partialorder %v2430_v49, 8.507059e+37 }
 0x13b   : > { %v5038_v55 = vadd.f32 %v4950_v46, %v4959_v12  ;;  %v2169_v63 = vmul.f32 %v5043_v5, %v4882_v34  ;;  %v5048_v52 = vadd.f32 %v4404_v57, %v2185_v28  ;;  %1345 = vst.msk [vmem:[#allocation2 + $0x81] sm:$0xff] %vm1289_vm2, %v1266_v48  ;;  %v2434_v29 = vsel %vm2431_vm12, %v2433_v61, %v2429_v22 }
 0x13c   : > { %7299 = vst [vmem:[#allocation25_spill] sm:$0xff] %v5032_v42  ;;  %v5051_v23 = vpop.eup %3730  ;;  %v5054_v37 = vmul.f32 %v2419_v17, %v4700_v38  ;;  %v2104_v46 = vadd.f32 %v4954_v27, %v4970_v62  ;;  %v5059_v12 = vadd.f32 %v4624_v47, %v594_v25  ;;  %v1508_v26 = vadd.f32 %v1476_v56, %v1411_v50  ;;  %v639_v27 = vpop.f32.mrf.mxu1 }
 0x13d   : > { %v1686_v34 = vmul.f32 %v4267_v59, %v1396_v35  ;;  %v1976_v57 = vmul.f32 %v4305_v20, %v1396_v35  ;;  %v3543_v6 = vmul.f32 -1.442695, %v5027_v19  ;;  %3732 = vrcp.f32 %v5032_v42 }
 0x13e   : > { %7300 = vst [vmem:[#allocation26_spill] sm:$0xff] %v5054_v37  ;;  %v1700_v21 = vadd.f32 %v1668_v33, %v4871_v2  ;;  %v1765_v38 = vmul.f32 %v4295_v11, %v4932_v24  ;;  %v1183_v62 = vmul.f32 %v5051_v23, %v5000_v44  ;;  %v5071_v53 = vmul.f32 %v2434_v29, %v4705_v9 }
 0x13f   : > { %v1429_v32 = vmul.f32 %v4226_v10, %v1396_v35  ;;  %v1494_v41 = vmul.f32 %v4229_v13, %v1461_v16  ;;  %v3544_v15 = vmul.f32 -1.442695, %v5048_v52  ;;  %v2891_v39 = vsel %vm1289_vm2, %v5054_v37, 0.0 }
 0x140   : > { %7301 = vst [vmem:[#allocation27_spill] sm:$0xff] %v5071_v53  ;;  %v1783_v2 = vmul.f32 %v4295_v11, %v1461_v16  ;;  %v2073_v24 = vmul.f32 %v4320_v40, %v1461_v16  ;;  %v3517_v49 = vmul.f32 -1.442695, %v5059_v12  ;;  %v1718_v28 = vadd.f32 %v1686_v34, %v4901_v60 }
 0x141   : > { %v2008_v54 = vadd.f32 %v1976_v57, %v1910_v3  ;;  %v1669_v9 = vmul.f32 %v4267_v59, %v4919_v58  ;;  %3734 = vpow2.f32 %v3543_v6  ;;  %v5084_v50 = vadd.f32 %v2169_v63, %v2104_v46 }
 0x142   : > { %v5086_v56 = vadd.f32 %v1765_v38, %v1700_v21  ;;  %v1184_v36 = vsub.f32 1.0, %v1183_v62  ;;  %3736 = vpow2.f32 %v3517_v49  ;;  %v2892_v17 = vadd.f32 %v2891_v39, %v4823_v1  ;;  %v596_v21 = vpop.f32.mrf.mxu0 }
 0x143   : > { %7302 = vst [vmem:[#allocation28_spill] sm:$0xff] %v5084_v50  ;;  %v2893_v22 = vsel %vm1289_vm2, %v5071_v53, 0.0  ;;  %v5091_v48 = vadd.f32 %v1494_v41, %v1429_v32  ;;  %3738 = vpow2.f32 %v3544_v15  ;;  %v5093_v60 = vpop.eup %3732  ;;  %v1412_v25 = vmul.f32 %v4226_v10, %v4919_v58  ;;  %v1397_v41 = vld [vmem:[#allocation2 + $0x140] sm:$0xff] }
 0x144   : > { %7303 = vst [vmem:[#allocation29_spill] sm:$0xff] %v5093_v60  ;;  %v1477_v61 = vmul.f32 %v4229_v13, %v4961_v4  ;;  %v1573_v3 = vmul.f32 %v4248_v43, %v4963_v31  ;;  %v5102_v33 = vadd.f32 %v4624_v47, %v639_v27  ;;  %v5104_v1 = vadd.f32 %v1783_v2, %v1718_v28  ;;  %v1462_v15 = vld [vmem:[#allocation2 + $0x141] sm:$0xff]  ;;  %v641_v2 = vpop.f32.mrf.mxu1 }
 0x145   : > { %v5106_v35 = vadd.f32 %v2073_v24, %v2008_v54  ;;  %v1701_v63 = vadd.f32 %v1669_v9, %v4893_v7  ;;  %v1193_v29 = vand.u32 2147483648, %v5000_v44  ;;  %v1185_v46 = vmul.f32 %v5051_v23, %v1184_v36  ;;  %v1558_v54 = vld [vmem:[#allocation2 + $0x13a] sm:$0xff] }
 0x146   : > { %vm1187_vm13 = vweird.f32 %v5000_v44  ;;  %vm1188_vm14 = vweird.f32 %v5051_v23  ;;  %v1191_v58 = vand.u32 2147483647, %v5000_v44  ;;  %v5114_v34 = vadd.f32 %v2893_v22, %v2892_v17  ;;  %v1559_v22 = vld [vmem:[#allocation2 + $0x142] sm:$0xff] }
 0x147   : > { %v3735_v16 = vpop.eup %3734  ;;  %v1574_v57 = vmul.f32 %v4248_v43, %v4981_v45  ;;  %v1766_v6 = vmul.f32 %v4295_v11, %v4961_v4  ;;  %v1862_v7 = vmul.f32 %v4298_v14, %v4963_v31  ;;  %v1509_v62 = vadd.f32 %v1477_v61, %v1412_v25  ;;  %vm5134_vm15 = vmor %vm1187_vm13, %vm1188_vm14 }
 0x148   : > { %v3737_v38 = vpop.eup %3736  ;;  %v5122_v27 = vadd.f32 %v1573_v3, %v1508_v26  ;;  %v1863_v32 = vmul.f32 %v4298_v14, %v4981_v45  ;;  %v3535_v39 = vmul.f32 -1.442695, %v5102_v33  ;;  %v1430_v49 = vmul.f32 %v4226_v10, %v1397_v41 }
 0x149   : > { %v3739_v24 = vpop.eup %3738  ;;  %v1495_v4 = vmul.f32 %v4229_v13, %v1462_v15  ;;  %v1687_v31 = vmul.f32 %v4267_v59, %v1397_v41  ;;  %v1194_v45 = vor.u32 1.1754944e-38, %v1193_v29  ;;  %v1798_v28 = vadd.f32 %v1766_v6, %v1701_v63  ;;  %v1380_v6 = vld [vmem:[#allocation2 + $0x78] sm:$0xff] }
 0x14a   : > { %v1186_v9 = vadd.f32 %v5051_v23, %v1185_v46  ;;  %vm1192_vm0 = vcmp.eq.f32.partialorder %v1191_v58, 8.507059e+37  ;;  %v5140_v36 = vadd.f32 %v4624_v47, %v596_v21  ;;  %v5142_v17 = vadd.f32 1.0, %v3735_v16 }
 0x14b   : > { %v1591_v25 = vmul.f32 %v4248_v43, %v1558_v54  ;;  %v5145_v61 = vadd.f32 1.0, %v3737_v38  ;;  %v5148_v44 = vadd.f32 %v4624_v47, %v641_v2  ;;  %v5150_v3 = vadd.f32 1.0, %v3739_v24  ;;  %v5159_v2 = vld [vmem:[#allocation2 + $0x80] sm:$0xff] }
 0x14c   : > { %v1592_v63 = vmul.f32 %v4248_v43, %v1559_v22  ;;  %v1190_v29 = vsel %vm5134_vm15, %v5051_v23, %v1186_v9  ;;  %3740 = vpow2.f32 %v3535_v39  ;;  %v1527_v46 = vadd.f32 %v1495_v4, %v1430_v49 }
 0x14d   : > { %v1719_v58 = vadd.f32 %v1687_v31, %v4946_v51  ;;  %v1784_v16 = vmul.f32 %v4295_v11, %v1462_v15  ;;  %v1195_v21 = vsel %vm1192_vm0, %v1194_v45, %v1190_v29  ;;  %v1880_v38 = vmul.f32 %v4298_v14, %v1558_v54 }
 0x14e   : > { %v1284_v24 = vmul.f32 %v1195_v21, %v4891_v18  ;;  %3742 = vrcp.f32 %v5145_v61  ;;  %v3518_v53 = vmul.f32 -1.442695, %v5140_v36  ;;  %v1894_v23 = vadd.f32 %v1862_v7, %v5086_v56 }
 0x14f   : > { %3744 = vrcp.f32 %v5142_v17  ;;  %v1977_v51 = vmul.f32 %v4305_v20, %v1397_v41  ;;  %v3536_v39 = vmul.f32 -1.442695, %v5148_v44  ;;  %v5168_v49 = vadd.f32 %v1574_v57, %v1509_v62  ;;  %v599_v41 = vpop.f32.mrf.mxu0 }
 0x150   : > { %v1895_v4 = vadd.f32 %v1863_v32, %v1798_v28  ;;  %3746 = vrcp.f32 %v5150_v3  ;;  %v1960_v31 = vmul.f32 %v4305_v20, %v1380_v6  ;;  %1363 = vst.msk [vmem:[#allocation2 + $0x159] sm:$0xff] %vm1289_vm2, %v1284_v24  ;;  %v5174_v18 = vadd.f32 %v1591_v25, %v5091_v48  ;;  %v1445_v32 = vld [vmem:[#allocation2 + $0x79] sm:$0xff] }
 0x151   : > { %v1816_v26 = vadd.f32 %v1784_v16, %v1719_v58  ;;  %v1881_v56 = vmul.f32 %v4298_v14, %v1559_v22  ;;  %v1961_v7 = vmul.f32 %v4305_v20, %v5159_v2  ;;  %v5179_v57 = vadd.f32 %v1592_v63, %v1527_v46  ;;  %v5187_v25 = vld [vmem:[#allocation2 + $0x7a] sm:$0xff] }
 0x152   : > { %v3741_v45 = vpop.eup %3740  ;;  %v5182_v62 = vadd.f32 %v1880_v38, %v5104_v1  ;;  %v1670_v28 = vmul.f32 %v4267_v59, %v1380_v6  ;;  %3748 = vpow2.f32 %v3518_v53  ;;  %v2009_v48 = vadd.f32 %v1977_v51, %v5038_v55  ;;  %v5197_v16 = vld [vmem:[#allocation2 + $0x81] sm:$0xff] }
 0x153   : > { %v2074_v9 = vmul.f32 %v4320_v40, %v1462_v15  ;;  %v5189_v29 = vadd.f32 1.0, %v3741_v45  ;;  %3750 = vpow2.f32 %v3536_v39  ;;  %v2170_v63 = vmul.f32 %v5043_v5, %v1558_v54 }
 0x154   : > { %v5191_v58 = vpop.eup %3742  ;;  %v5195_v1 = vmul.f32 %v5043_v5, %v1559_v22  ;;  %v1992_v46 = vadd.f32 %v1960_v31, %v1894_v23  ;;  %v5200_v53 = vadd.f32 %v4624_v47, %v599_v41  ;;  %v5204_v15 = vadd.f32 %v1881_v56, %v1816_v26  ;;  %v5224_v41 = vld [vmem:[#allocation2 + $0x82] sm:$0xff] }
 0x155   : > { %v5202_v55 = vpop.eup %3744  ;;  %v1413_v21 = vmul.f32 %v4226_v10, %v1380_v6  ;;  %v1478_v38 = vmul.f32 %v4229_v13, %v1445_v32  ;;  %v1993_v24 = vadd.f32 %v1961_v7, %v1895_v4  ;;  %v1702_v54 = vadd.f32 %v1670_v28, %v5122_v27 }
 0x156   : > { %7306 = vst [vmem:[#allocation30_spill] sm:$0xff] %v5195_v1  ;;  %v5208_v51 = vpop.eup %3746  ;;  %v2057_v22 = vmul.f32 %v4320_v40, %v1445_v32  ;;  %v2154_v23 = vmul.f32 %v5043_v5, %v5187_v25  ;;  %3752 = vrcp.f32 %v5189_v29  ;;  %v2447_v39 = vand.u32 2147483648, %v5142_v17 }
 0x157   : > { %7307 = vst [vmem:[#allocation31_spill] sm:$0xff] %v5204_v15  ;;  %v5216_v31 = vadd.f32 %v2074_v9, %v2009_v48  ;;  %v2058_v6 = vmul.f32 %v4320_v40, %v5197_v16  ;;  %v928_v4 = vmul.f32 %v5191_v58, %v5145_v61  ;;  %v2462_v27 = vand.u32 2147483648, %v5150_v3 }
 0x158   : > { %v3749_v26 = vpop.eup %3748  ;;  %v1767_v56 = vmul.f32 %v4295_v11, %v1445_v32  ;;  %v2089_v7 = vadd.f32 %v2057_v22, %v1992_v46  ;;  %v3519_v45 = vmul.f32 -1.442695, %v5200_v53  ;;  %v2437_v48 = vmul.f32 %v5202_v55, %v5142_v17 }
 0x159   : > { %7308 = vst [vmem:[#allocation32_spill] sm:$0xff] %v5216_v31  ;;  %v3751_v28 = vpop.eup %3750  ;;  %v2452_v9 = vmul.f32 %v5208_v51, %v5150_v3  ;;  %v5232_v37 = vadd.f32 %v2170_v63, %v5106_v35  ;;  %v2090_v0 = vadd.f32 %v2058_v6, %v1993_v24  ;;  %v5235_v42 = vadd.f32 %v1478_v38, %v1413_v21  ;;  %v5250_v24 = vld [vmem:[#allocation2 + $0x150] sm:$0xff]  ;;  %v5261_v6 = vld [vmem:[%s7218_s4] ss:$0 sm:$0xff] }
 0x15a   : > { %v5237_v32 = vadd.f32 %v1767_v56, %v1702_v54  ;;  %v2186_v46 = vadd.f32 %v2154_v23, %v2089_v7  ;;  %v5239_v22 = vor.u32 1.1754944e-38, %v2447_v39  ;;  %v2155_v50 = vmul.f32 %v5043_v5, %v5224_v41 }
 0x15b   : > { %7309 = vst [vmem:[#allocation33_spill] sm:$0xff] %v5232_v37  ;;  %v929_v1 = vsub.f32 1.0, %v928_v4  ;;  %v5243_v31 = vadd.f32 1.0, %v3749_v26  ;;  %v5248_v63 = vor.u32 1.1754944e-38, %v2462_v27  ;;  %v5252_v21 = vadd.f32 1.0, %v3751_v28 }
 0x15c   : > { %v5245_v15 = vpop.eup %3752  ;;  %3754 = vpow2.f32 %v3519_v45  ;;  %v2438_v38 = vsub.f32 1.0, %v2437_v48  ;;  %v2453_v54 = vsub.f32 1.0, %v2452_v9  ;;  %v5256_v23 = vmul.f32 %v4226_v10, %v5250_v24  ;;  %v601_v9 = vpop.f32.mrf.mxu0 }
 0x15d   : > { %v2187_v39 = vadd.f32 %v2155_v50, %v2090_v0  ;;  %v5264_v4 = vadd.f32 %v5261_v6, %v2186_v46  ;;  %vm932_vm4 = vweird.f32 %v5145_v61  ;;  %v936_v26 = vand.u32 2147483647, %v5145_v61  ;;  %v644_v50 = vpop.f32.mrf.mxu1 }
 0x15e   : > { %v938_v27 = vand.u32 2147483648, %v5145_v61  ;;  %v930_v56 = vmul.f32 %v5191_v58, %v929_v1  ;;  %vm933_vm5 = vweird.f32 %v5191_v58  ;;  %v1198_v0 = vmul.f32 %v5245_v15, %v5189_v29 }
 0x15f   : > { %3756 = vrcp.f32 %v5243_v31  ;;  %vm2442_vm6 = vweird.f32 %v5202_v55  ;;  %vm1202_vm7 = vweird.f32 %v5189_v29  ;;  %v1208_v7 = vand.u32 2147483648, %v5189_v29  ;;  %vm934_vm9 = vmor %vm932_vm4, %vm933_vm5 }
 0x160   : > { %3758 = vrcp.f32 %v5252_v21  ;;  %v5279_v45 = vadd.f32 %v4624_v47, %v644_v50  ;;  %v931_v1 = vadd.f32 %v5191_v58, %v930_v56  ;;  %v1199_v28 = vsub.f32 1.0, %v1198_v0 }
 0x161   : > { %vm1203_vm8 = vweird.f32 %v5245_v15  ;;  %v1206_v48 = vand.u32 2147483647, %v5189_v29  ;;  %v2439_v35 = vmul.f32 %v5202_v55, %v2438_v38  ;;  %vm2441_vm3 = vweird.f32 %v5142_v17 }
 0x162   : > { %v3755_v46 = vpop.eup %3754  ;;  %v2454_v60 = vmul.f32 %v5208_v51, %v2453_v54  ;;  %v5288_v37 = vadd.f32 %v5261_v6, %v2187_v39  ;;  %v939_v47 = vor.u32 1.1754944e-38, %v938_v27  ;;  %vm2456_vm10 = vweird.f32 %v5150_v3  ;;  %vm5302_vm12 = vmor %vm1202_vm7, %vm1203_vm8  ;;  %v5310_v27 = vld [vmem:[%s7216_s2] ss:$0 sm:$0xff] }
 0x163   : > { %v3545_v56 = vmul.f32 -1.442695, %v5264_v4  ;;  %v935_v0 = vsel %vm934_vm9, %v5191_v58, %v931_v1  ;;  %vm937_vm11 = vcmp.eq.f32.partialorder %v936_v26, 8.507059e+37  ;;  %v1200_v38 = vmul.f32 %v5245_v15, %v1199_v28  ;;  %vm5361_vm5 = vmor %vm2441_vm3, %vm2442_vm6 }
 0x164   : > { %v940_v50 = vsel %vm937_vm11, %v939_v47, %v935_v0  ;;  %v1209_v61 = vor.u32 1.1754944e-38, %v1208_v7  ;;  %v3537_v39 = vmul.f32 -1.442695, %v5279_v45  ;;  %v5313_v58 = vadd.f32 %v5310_v27, %v601_v9 }
 0x165   : > { %v5315_v26 = vpop.eup %3756  ;;  %v1267_v1 = vmul.f32 %v940_v50, %v5059_v12  ;;  %v1201_v29 = vadd.f32 %v5245_v15, %v1200_v38  ;;  %vm1207_vm13 = vcmp.eq.f32.partialorder %v1206_v48, 8.507059e+37  ;;  %v5319_v28 = vadd.f32 1.0, %v3755_v46 }
 0x166   : > { %v5321_v7 = vpop.eup %3758  ;;  %v2440_v47 = vadd.f32 %v5202_v55, %v2439_v35  ;;  %v5325_v0 = vadd.f32 %v5208_v51, %v2454_v60  ;;  %vm2457_vm14 = vweird.f32 %v5208_v51  ;;  %v943_v9 = vmul.f32 %v5315_v26, %v5243_v31 }
 0x167   : > { %v7312_v8 = vand.u32 2147483647, %v5142_v17  ;;  %3760 = vpow2.f32 %v3545_v56  ;;  %v3546_v48 = vmul.f32 -1.442695, %v5288_v37  ;;  %1346 = vst.msk [vmem:[#allocation2 + $0x91] sm:$0xff] %vm1289_vm2, %v1267_v1  ;;  %v1205_v60 = vsel %vm5302_vm12, %v5245_v15, %v1201_v29  ;;  %vm5374_vm9 = vmor %vm2456_vm10, %vm2457_vm14 }
 0x168   : > { %v1213_v35 = vmul.f32 %v5321_v7, %v5252_v21  ;;  %v1210_v46 = vsel %vm1207_vm13, %v1209_v61, %v1205_v60  ;;  %v944_v38 = vsub.f32 1.0, %v943_v9  ;;  %3762 = vpow2.f32 %v3537_v39 }
 0x169   : > { %vm5332_vm15 = vcmp.eq.f32.partialorder %v7312_v8, 8.507059e+37  ;;  %v3520_v8 = vmul.f32 -1.442695, %v5313_v58  ;;  %v7315_v50 = vand.u32 2147483647, %v5150_v3  ;;  %v1285_v1 = vmul.f32 %v1210_v46, %v5102_v33  ;;  %v1463_v33 = vld [vmem:[#allocation2 + $0x151] sm:$0xff]  ;;  %v646_v3 = vpop.f32.mrf.mxu1 }
 0x16a   : > { %v951_v30 = vand.u32 2147483647, %v5243_v31  ;;  %v1214_v54 = vsub.f32 1.0, %v1213_v35  ;;  %3764 = vrcp.f32 %v5319_v28  ;;  %v945_v15 = vmul.f32 %v5315_v26, %v944_v38 }
 0x16b   : > { %vm5346_vm0 = vcmp.eq.f32.partialorder %v7315_v50, 8.507059e+37  ;;  %vm948_vm4 = vweird.f32 %v5315_v26  ;;  %v953_v61 = vand.u32 2147483648, %v5243_v31  ;;  %v1223_v39 = vand.u32 2147483648, %v5252_v21  ;;  %1364 = vst.msk [vmem:[#allocation2 + $0x169] sm:$0xff] %vm1289_vm2, %v1285_v1 }
 0x16c   : > { %v1215_v9 = vmul.f32 %v5321_v7, %v1214_v54  ;;  %vm1217_vm7 = vweird.f32 %v5252_v21  ;;  %vm1218_vm8 = vweird.f32 %v5321_v7  ;;  %v1221_v60 = vand.u32 2147483647, %v5252_v21 }
 0x16d   : > { %v1496_v35 = vmul.f32 %v4229_v13, %v1463_v33  ;;  %v946_v46 = vadd.f32 %v5315_v26, %v945_v15  ;;  %vm947_vm6 = vweird.f32 %v5243_v31  ;;  %3766 = vpow2.f32 %v3520_v8  ;;  %v3761_v38 = vpop.eup %3760  ;;  %vm5401_vm10 = vmor %vm1217_vm7, %vm1218_vm8 }
 0x16e   : > { %v2444_v50 = vsel %vm5361_vm5, %v5202_v55, %v2440_v47  ;;  %v1688_v1 = vmul.f32 %v4267_v59, %v5250_v24  ;;  %3768 = vpow2.f32 %v3546_v48  ;;  %vm5388_vm3 = vmor %vm947_vm6, %vm948_vm4  ;;  %v1216_v54 = vadd.f32 %v5321_v7, %v1215_v9  ;;  %v3763_v15 = vpop.eup %3762 }
 0x16f   : > { %v1785_v31 = vmul.f32 %v4295_v11, %v1463_v33  ;;  %v950_v8 = vsel %vm5388_vm3, %v5315_v26, %v946_v46  ;;  %v954_v55 = vor.u32 1.1754944e-38, %v953_v61  ;;  %v1224_v48 = vor.u32 1.1754944e-38, %v1223_v39 }
 0x170   : > { %v5405_v29 = vpop.eup %3764  ;;  %v2459_v9 = vsel %vm5374_vm9, %v5208_v51, %v5325_v0  ;;  %v1978_v26 = vmul.f32 %v4305_v20, %v5250_v24  ;;  %vm952_vm11 = vcmp.eq.f32.partialorder %v951_v30, 8.507059e+37  ;;  %vm1222_vm12 = vcmp.eq.f32.partialorder %v1221_v60, 8.507059e+37 }
 0x171   : > { %v2449_v21 = vsel %vm5332_vm15, %v5239_v22, %v2444_v50  ;;  %v5417_v61 = vmul.f32 %v4320_v40, %v1463_v33  ;;  %v1671_v39 = vmul.f32 %v4267_v59, %v5159_v2  ;;  %v955_v46 = vsel %vm952_vm11, %v954_v55, %v950_v8 }
 0x172   : > { %v5422_v17 = vadd.f32 %v1496_v35, %v5256_v23  ;;  %v5424_v51 = vadd.f32 1.0, %v3761_v38  ;;  %v1268_v30 = vmul.f32 %v955_v46, %v5140_v36  ;;  %v1220_v24 = vsel %vm5401_vm10, %v5321_v7, %v1216_v54  ;;  %v5450_v38 = vld [vmem:[#allocation2 + $0x90] sm:$0xff] }
 0x173   : > { %7326 = vst [vmem:[#allocation34_spill] sm:$0xff] %v5417_v61  ;;  %v3767_v22 = vpop.eup %3766  ;;  %v2464_v0 = vsel %vm5346_vm0, %v5248_v63, %v2459_v9  ;;  %v1720_v12 = vadd.f32 %v1688_v1, %v5174_v18  ;;  %v1225_v33 = vsel %vm1222_vm12, %v1224_v48, %v1220_v24  ;;  %v958_v23 = vmul.f32 %v5405_v29, %v5319_v28 }
 0x174   : > { %v3769_v60 = vpop.eup %3768  ;;  %v5437_v35 = vmul.f32 %v2449_v21, %v5027_v19  ;;  %v1414_v36 = vmul.f32 %v4226_v10, %v5159_v2  ;;  %v1479_v7 = vmul.f32 %v4229_v13, %v5197_v16  ;;  %1347 = vst.msk [vmem:[#allocation2 + $0x99] sm:$0xff] %vm1289_vm2, %v1268_v30  ;;  %v5445_v63 = vadd.f32 %v5310_v27, %v646_v3  ;;  %v5493_v30 = vld [vmem:[#allocation2 + $0x91] sm:$0xff] }
 0x175   : > { %v1703_v18 = vadd.f32 %v1671_v39, %v5168_v49  ;;  %v1864_v56 = vmul.f32 %v4298_v14, %v5187_v25  ;;  %v1286_v19 = vmul.f32 %v1225_v33, %v5148_v44  ;;  %v5453_v50 = vadd.f32 1.0, %v3763_v15  ;;  %v604_v39 = vpop.f32.mrf.mxu0 }
 0x176   : > { %7327 = vst [vmem:[#allocation35_spill] sm:$0xff] %v5437_v35  ;;  %v5456_v2 = vmul.f32 %v2464_v0, %v5048_v52  ;;  %3770 = vrcp.f32 %v5424_v51  ;;  %v959_v1 = vsub.f32 1.0, %v958_v23  ;;  %v5459_v54 = vadd.f32 1.0, %v3767_v22  ;;  %v5501_v0 = vld [vmem:[#allocation2 + $0x158] sm:$0xff] }
 0x177   : > { %v5462_v8 = vadd.f32 %v1978_v26, %v5182_v62  ;;  %v1575_v49 = vmul.f32 %v4248_v43, %v5187_v25  ;;  %v1768_v55 = vmul.f32 %v4295_v11, %v5197_v16  ;;  %v5468_v44 = vadd.f32 1.0, %v3769_v60  ;;  %1365 = vst.msk [vmem:[#allocation2 + $0x171] sm:$0xff] %vm1289_vm2, %v1286_v19 }
 0x178   : > { %7328 = vst [vmem:[#allocation36_spill] sm:$0xff] %v5456_v2  ;;  %v2895_v52 = vsel %vm1289_vm2, %v5437_v35, 0.0  ;;  %v1511_v15 = vadd.f32 %v1479_v7, %v1414_v36  ;;  %v1962_v47 = vmul.f32 %v4305_v20, %v5450_v38  ;;  %v3538_v62 = vmul.f32 -1.442695, %v5445_v63  ;;  %v5515_v7 = vld [vmem:[#allocation2 + $0x159] sm:$0xff] }
 0x179   : > { %7329 = vst [vmem:[#allocation37_spill] sm:$0xff] %v5462_v8  ;;  %v5476_v48 = vadd.f32 %v1785_v31, %v1720_v12  ;;  %v1576_v25 = vmul.f32 %v4248_v43, %v5224_v41  ;;  %v1800_v9 = vadd.f32 %v1768_v55, %v1703_v18  ;;  %3772 = vrcp.f32 %v5453_v50 }
 0x17a   : > { %v2897_v16 = vsel %vm1289_vm2, %v5456_v2, 0.0  ;;  %v1896_v26 = vadd.f32 %v1864_v56, %v5237_v32  ;;  %v960_v21 = vmul.f32 %v5405_v29, %v959_v1  ;;  %3774 = vrcp.f32 %v5459_v54 }
 0x17b   : > { %7330 = vst [vmem:[#allocation38_spill] sm:$0xff] %v5476_v48  ;;  %v2896_v46 = vadd.f32 %v2895_v52, %v5114_v34  ;;  %v5488_v31 = vadd.f32 %v1575_v49, %v5235_v42  ;;  %v1865_v3 = vmul.f32 %v4298_v14, %v5224_v41  ;;  %3776 = vrcp.f32 %v5468_v44  ;;  %v5495_v24 = vld [vmem:[#allocation2 + $0x98] sm:$0xff] }
 0x17c   : > { %v5497_v32 = vpop.eup %3770  ;;  %v5499_v22 = vadd.f32 %v1576_v25, %v1511_v15  ;;  %v1994_v12 = vadd.f32 %v1962_v47, %v1896_v26  ;;  %v5503_v34 = vld [vmem:[#allocation2 + $0x92] sm:$0xff]  ;;  %v966_v42 = vand.u32 2147483647, %v5319_v28  ;;  %3778 = vpow2.f32 %v3538_v62  ;;  %v5519_v56 = vld [vmem:[#allocation2 + $0x9a] sm:$0xff] }
 0x17d   : > { %v5506_v33 = vadd.f32 %v2897_v16, %v2896_v46  ;;  %v1897_v41 = vadd.f32 %v1865_v3, %v1800_v9  ;;  %v5510_v23 = vmul.f32 %v4226_v10, %v5501_v0  ;;  %v5512_v60 = vld [vmem:[#allocation2 + $0x99] sm:$0xff]  ;;  %v968_v36 = vand.u32 2147483648, %v5319_v28  ;;  %v606_v8 = vpop.f32.mrf.mxu0 }
 0x17e   : > { %v2059_v18 = vmul.f32 %v4320_v40, %v5493_v30  ;;  %v1963_v19 = vmul.f32 %v4305_v20, %v5495_v24  ;;  %v961_v1 = vadd.f32 %v5405_v29, %v960_v21  ;;  %vm963_vm13 = vweird.f32 %v5405_v29 }
 0x17f   : > { %v3773_v49 = vpop.eup %3772  ;;  %v5527_v55 = vmul.f32 %v5497_v32, %v5424_v51  ;;  %v5531_v52 = vmul.f32 %v4229_v13, %v5515_v7  ;;  %v2156_v15 = vmul.f32 %v5043_v5, %v5503_v34  ;;  %vm962_vm14 = vweird.f32 %v5319_v28 }
 0x180   : > { %v5536_v47 = vpop.eup %3774  ;;  %v2091_v62 = vadd.f32 %v2059_v18, %v1994_v12  ;;  %v1995_v25 = vadd.f32 %v1963_v19, %v1897_v41  ;;  %v2060_v9 = vmul.f32 %v4320_v40, %v5512_v60  ;;  %vm967_vm15 = vcmp.eq.f32.partialorder %v966_v42, 8.507059e+37  ;;  %vm964_vm0 = vmor %vm962_vm14, %vm963_vm13 }
 0x181   : > { %v5540_v16 = vpop.eup %3776  ;;  %v2157_v26 = vmul.f32 %v5043_v5, %v5519_v56  ;;  %v969_v21 = vor.u32 1.1754944e-38, %v968_v36  ;;  %vm1232_vm4 = vweird.f32 %v5453_v50  ;;  %v5546_v46 = vadd.f32 %v5310_v27, %v604_v39 }
 0x182   : > { %v3779_v28 = vpop.eup %3778  ;;  %v2092_v3 = vadd.f32 %v2060_v9, %v1995_v25  ;;  %v2188_v12 = vadd.f32 %v2156_v15, %v2091_v62  ;;  %v965_v41 = vsel %vm964_vm0, %v5405_v29, %v961_v1  ;;  %v1228_v18 = vmul.f32 %v3773_v49, %v5453_v50 }
 0x183   : > { %v970_v42 = vsel %vm967_vm15, %v969_v21, %v965_v41  ;;  %v1236_v19 = vand.u32 2147483647, %v5453_v50  ;;  %v1238_v2 = vand.u32 2147483648, %v5453_v50  ;;  %v973_v36 = vmul.f32 %v5536_v47, %v5459_v54  ;;  %v5581_v50 = vld [vmem:[#allocation2 + $0x15a] sm:$0xff] }
 0x184   : > { %v2189_v35 = vadd.f32 %v2157_v26, %v2092_v3  ;;  %v1269_v61 = vmul.f32 %v970_v42, %v5200_v53  ;;  %v1229_v39 = vsub.f32 1.0, %v1228_v18  ;;  %vm1233_vm5 = vweird.f32 %v3773_v49 }
 0x185   : > { %v2482_v15 = vmul.f32 %v5540_v16, %v5468_v44  ;;  %v974_v29 = vsub.f32 1.0, %v973_v36  ;;  %v5557_v1 = vadd.f32 1.0, %v3779_v28  ;;  %v3521_v62 = vmul.f32 -1.442695, %v5546_v46  ;;  %vm5568_vm7 = vmor %vm1232_vm4, %vm1233_vm5 }
 0x186   : > { %v2468_v25 = vsub.f32 1.0, %v5527_v55  ;;  %v5562_v9 = vadd.f32 %v5261_v6, %v2188_v12  ;;  %1348 = vst.msk [vmem:[#allocation2 + $0xa9] sm:$0xff] %vm1289_vm2, %v1269_v61  ;;  %v1230_v26 = vmul.f32 %v3773_v49, %v1229_v39  ;;  %v983_v53 = vand.u32 2147483648, %v5459_v54  ;;  %v5575_v12 = vld [vmem:[#allocation2 + $0x152] sm:$0xff] }
 0x187   : > { %v1239_v28 = vor.u32 1.1754944e-38, %v1238_v2  ;;  %v975_v3 = vmul.f32 %v5536_v47, %v974_v29  ;;  %vm978_vm8 = vweird.f32 %v5536_v47  ;;  %v981_v55 = vand.u32 2147483647, %v5459_v54 }
 0x188   : > { %v5578_v61 = vadd.f32 %v5261_v6, %v2189_v35  ;;  %v1231_v41 = vadd.f32 %v3773_v49, %v1230_v26  ;;  %vm1237_vm9 = vcmp.eq.f32.partialorder %v1236_v19, 8.507059e+37  ;;  %3780 = vrcp.f32 %v5557_v1 }
 0x189   : > { %v5585_v2 = vmul.f32 %v4248_v43, %v5575_v12  ;;  %v976_v18 = vadd.f32 %v5536_v47, %v975_v3  ;;  %vm977_vm6 = vweird.f32 %v5459_v54  ;;  %3782 = vpow2.f32 %v3521_v62 }
 0x18a   : > { %v5591_v42 = vmul.f32 %v4248_v43, %v5581_v50  ;;  %v3547_v35 = vmul.f32 -1.442695, %v5562_v9  ;;  %v1235_v19 = vsel %vm5568_vm7, %v3773_v49, %v1231_v41  ;;  %vm979_vm3 = vmor %vm977_vm6, %vm978_vm8  ;;  %v984_v36 = vor.u32 1.1754944e-38, %v983_v53 }
 0x18b   : > { %v2483_v39 = vsub.f32 1.0, %v2482_v15  ;;  %v1240_v29 = vsel %vm1237_vm9, %v1239_v28, %v1235_v19  ;;  %v980_v26 = vsel %vm979_vm3, %v5536_v47, %v976_v18  ;;  %vm982_vm10 = vcmp.eq.f32.partialorder %v981_v55, 8.507059e+37  ;;  %v609_v55 = vpop.f32.mrf.mxu0 }
 0x18c   : > { %7333 = vst [vmem:[#allocation39_spill] sm:$0xff] %v5591_v42  ;;  %v2469_v54 = vmul.f32 %v5497_v32, %v2468_v25  ;;  %v3548_v62 = vmul.f32 -1.442695, %v5578_v61  ;;  %v1287_v3 = vmul.f32 %v1240_v29, %v5279_v45  ;;  %v985_v48 = vsel %vm982_vm10, %v984_v36, %v980_v26 }
 0x18d   : > { %v5604_v21 = vmul.f32 %v4267_v59, %v5501_v0  ;;  %v1672_v49 = vmul.f32 %v4267_v59, %v5450_v38  ;;  %v1270_v15 = vmul.f32 %v985_v48, %v5313_v58  ;;  %v5610_v53 = vadd.f32 %v5310_v27, %v606_v8 }
 0x18e   : > { %v5612_v47 = vpop.eup %3780  ;;  %v2475_v25 = vand.u32 2147483647, %v5424_v51  ;;  %v5617_v45 = vmul.f32 %v4295_v11, %v5515_v7  ;;  %v1673_v28 = vmul.f32 %v4267_v59, %v5495_v24  ;;  %3784 = vpow2.f32 %v3547_v35  ;;  %1366 = vst.msk [vmem:[#allocation2 + $0x181] sm:$0xff] %vm1289_vm2, %v1287_v3 }
 0x18f   : > { %v3783_v41 = vpop.eup %3782  ;;  %vm2471_vm11 = vweird.f32 %v5424_v51  ;;  %v2477_v58 = vand.u32 2147483648, %v5424_v51  ;;  %v2490_v8 = vand.u32 2147483647, %v5468_v44  ;;  %1349 = vst.msk [vmem:[#allocation2 + $0xb1] sm:$0xff] %vm1289_vm2, %v1270_v15  ;;  %v1243_v48 = vmul.f32 %v5612_v47, %v5557_v1 }
 0x190   : > { %7334 = vst [vmem:[#allocation40_spill] sm:$0xff] %v5617_v45  ;;  %v2470_v18 = vadd.f32 %v5497_v32, %v2469_v54  ;;  %vm2472_vm12 = vweird.f32 %v5497_v32  ;;  %v2484_v35 = vmul.f32 %v5540_v16, %v2483_v39  ;;  %vm2486_vm13 = vweird.f32 %v5468_v44 }
 0x191   : > { %3786 = vpow2.f32 %v3548_v62  ;;  %v2492_v19 = vand.u32 2147483648, %v5468_v44  ;;  %v1704_v36 = vadd.f32 %v1672_v49, %v5488_v31  ;;  %v3522_v29 = vmul.f32 -1.442695, %v5610_v53  ;;  %vm5647_vm15 = vmor %vm2471_vm11, %vm2472_vm12 }
 0x192   : > { %v5636_v26 = vadd.f32 %v5310_v27, %v609_v55  ;;  %vm5638_vm14 = vcmp.eq.f32.partialorder %v2475_v25, 8.507059e+37  ;;  %v1705_v54 = vadd.f32 %v1673_v28, %v5499_v22  ;;  %v1244_v15 = vsub.f32 1.0, %v1243_v48  ;;  %v5658_v22 = vld [vmem:[#allocation2 + $0xa8] sm:$0xff] }
 0x193   : > { %v5643_v39 = vadd.f32 1.0, %v3783_v41  ;;  %v2478_v31 = vor.u32 1.1754944e-38, %v2477_v58  ;;  %vm2487_vm0 = vweird.f32 %v5540_v16  ;;  %v5654_v49 = vadd.f32 %v5531_v52, %v5510_v23 }
 0x194   : > { %v1769_v25 = vmul.f32 %v4295_v11, %v5493_v30  ;;  %v3785_v28 = vpop.eup %3784  ;;  %v2474_v51 = vsel %vm5647_vm15, %v5497_v32, %v2470_v18  ;;  %v2485_v55 = vadd.f32 %v5540_v16, %v2484_v35  ;;  %v1770_v41 = vmul.f32 %v4295_v11, %v5512_v60  ;;  %vm5695_vm8 = vmor %vm2486_vm13, %vm2487_vm0 }
 0x195   : > { %v1866_v58 = vmul.f32 %v4298_v14, %v5503_v34  ;;  %v1245_v52 = vmul.f32 %v5612_v47, %v1244_v15  ;;  %3788 = vpow2.f32 %v3522_v29  ;;  %v3523_v48 = vmul.f32 -1.442695, %v5636_v26 }
 0x196   : > { %v1801_v23 = vadd.f32 %v1769_v25, %v1704_v36  ;;  %v1802_v42 = vadd.f32 %v1770_v41, %v1705_v54  ;;  %v1964_v62 = vmul.f32 %v4305_v20, %v5658_v22  ;;  %v1253_v32 = vand.u32 2147483648, %v5557_v1  ;;  %v5689_v25 = vld [vmem:[#allocation2 + $0xb0] sm:$0xff] }
 0x197   : > { %v3787_v45 = vpop.eup %3786  ;;  %3790 = vrcp.f32 %v5643_v39  ;;  %v5674_v18 = vadd.f32 1.0, %v3785_v28  ;;  %vm1247_vm4 = vweird.f32 %v5557_v1  ;;  %vm1248_vm5 = vweird.f32 %v5612_v47 }
 0x198   : > { %v1251_v35 = vand.u32 2147483647, %v5557_v1  ;;  %v2479_v36 = vsel %vm5638_vm14, %v2478_v31, %v2474_v51  ;;  %vm5681_vm7 = vcmp.eq.f32.partialorder %v2490_v8, 8.507059e+37  ;;  %v5687_v54 = vadd.f32 %v5585_v2, %v5422_v17  ;;  %v5703_v31 = vld [vmem:[#allocation2 + $0xa9] sm:$0xff]  ;;  %vm5715_vm9 = vmor %vm1247_vm4, %vm1248_vm5 }
 0x199   : > { %v1898_v15 = vadd.f32 %v1866_v58, %v1801_v23  ;;  %v1867_v8 = vmul.f32 %v4298_v14, %v5519_v56  ;;  %v5701_v3 = vadd.f32 1.0, %v3787_v45  ;;  %v5705_v17 = vld [vmem:[#allocation2 + $0xaa] sm:$0xff]  ;;  %v1246_v2 = vadd.f32 %v5612_v47, %v1245_v52 }
 0x19a   : > { %7341 = vst [vmem:[#allocation41_spill] sm:$0xff] %v5687_v54  ;;  %3792 = vpow2.f32 %v3523_v48  ;;  %v2489_v44 = vsel %vm5695_vm8, %v5540_v16, %v2485_v55  ;;  %v2493_v51 = vor.u32 1.1754944e-38, %v2492_v19  ;;  %v1254_v58 = vor.u32 1.1754944e-38, %v1253_v32  ;;  %v5720_v52 = vld [vmem:[#allocation2 + $0xb1] sm:$0xff] }
 0x19b   : > { %v1996_v41 = vadd.f32 %v1964_v62, %v1898_v15  ;;  %v3789_v23 = vpop.eup %3788  ;;  %v1899_v54 = vadd.f32 %v1867_v8, %v1802_v42  ;;  %3794 = vrcp.f32 %v5674_v18  ;;  %v1965_v16 = vmul.f32 %v4305_v20, %v5689_v25 }
 0x19c   : > { %vm1252_vm6 = vcmp.eq.f32.partialorder %v1251_v35, 8.507059e+37  ;;  %v5725_v55 = vmul.f32 %v2479_v36, %v5264_v4  ;;  %v5729_v1 = vadd.f32 %v5604_v21, %v5179_v57  ;;  %v2061_v48 = vmul.f32 %v4320_v40, %v5703_v31 }
 0x19d   : > { %v3791_v19 = vpop.eup %3790  ;;  %v2158_v42 = vmul.f32 %v5043_v5, %v5705_v17  ;;  %v2494_v62 = vsel %vm5681_vm7, %v2493_v51, %v2489_v44  ;;  %3796 = vrcp.f32 %v5701_v3  ;;  %v1997_v32 = vadd.f32 %v1965_v16, %v1899_v54  ;;  %v5753_v54 = vld [vmem:[#allocation2 + $0xb2] sm:$0xff] }
 0x19e   : > { %7346 = vst [vmem:[#allocation42_spill] sm:$0xff] %v5725_v55  ;;  %v1250_v4 = vsel %vm5715_vm9, %v5612_v47, %v1246_v2  ;;  %v2093_v35 = vadd.f32 %v2061_v48, %v1996_v41  ;;  %v2062_v57 = vmul.f32 %v4320_v40, %v5720_v52  ;;  %v5743_v36 = vadd.f32 1.0, %v3789_v23 }
 0x19f   : > { %v1255_v21 = vsel %vm1252_vm6, %v1254_v58, %v1250_v4  ;;  %v5747_v28 = vmul.f32 %v4298_v14, %v5575_v12  ;;  %v5751_v29 = vmul.f32 %v4298_v14, %v5581_v50  ;;  %v988_v8 = vmul.f32 %v3791_v19, %v5643_v39 }
 0x1a0   : > { %v3793_v15 = vpop.eup %3792  ;;  %v1288_v47 = vmul.f32 %v1255_v21, %v5445_v63  ;;  %v5758_v2 = vmul.f32 %v2494_v62, %v5288_v37  ;;  %v2899_v44 = vsel %vm1289_vm2, %v5725_v55, 0.0  ;;  %v2094_v51 = vadd.f32 %v2062_v57, %v1997_v32 }
 0x1a1   : > { %v2190_v41 = vadd.f32 %v2158_v42, %v2093_v35  ;;  %v5762_v45 = vpop.eup %3794  ;;  %v5766_v50 = vmul.f32 %v4305_v20, %v5501_v0  ;;  %v5770_v58 = vmul.f32 %v4320_v40, %v5515_v7  ;;  %v5774_v63 = vmul.f32 %v5043_v5, %v5575_v12 }
 0x1a2   : > { %7347 = vst [vmem:[#allocation43_spill] sm:$0xff] %v5758_v2  ;;  %v989_v37 = vsub.f32 1.0, %v988_v8  ;;  %v2159_v23 = vmul.f32 %v5043_v5, %v5753_v54  ;;  %v998_v16 = vand.u32 2147483648, %v5643_v39  ;;  %3798 = vrcp.f32 %v5743_v36  ;;  %v611_v8 = vpop.f32.mrf.mxu0 }
 0x1a3   : > { %7348 = vst [vmem:[#allocation44_spill] sm:$0xff] %v5766_v50  ;;  %v5781_v0 = vadd.f32 1.0, %v3793_v15  ;;  %v5783_v48 = vpop.eup %3796  ;;  %v2900_v7 = vadd.f32 %v2899_v44, %v5506_v33  ;;  %vm993_vm3 = vweird.f32 %v3791_v19  ;;  %v996_v12 = vand.u32 2147483647, %v5643_v39 }
 0x1a4   : > { %7349 = vst [vmem:[#allocation45_spill] sm:$0xff] %v5770_v58  ;;  %v990_v42 = vmul.f32 %v3791_v19, %v989_v37  ;;  %v2901_v62 = vsel %vm1289_vm2, %v5758_v2, 0.0  ;;  %v2497_v5 = vmul.f32 %v5762_v45, %v5674_v18  ;;  %v2191_v32 = vadd.f32 %v2159_v23, %v2094_v51  ;;  %v5814_v37 = vld [vmem:[#allocation2 + $0x168] sm:$0xff] }
 0x1a5   : > { %7350 = vst [vmem:[#allocation46_spill] sm:$0xff] %v5774_v63  ;;  %v5792_v4 = vadd.f32 %v5261_v6, %v2190_v41  ;;  %v1416_v35 = vmul.f32 %v4226_v10, %v5495_v24  ;;  %v1481_v33 = vmul.f32 %v4229_v13, %v5512_v60  ;;  %vm992_vm10 = vweird.f32 %v5643_v39  ;;  %v5816_v23 = vld [vmem:[#allocation2 + $0x169] sm:$0xff] }
 0x1a6   : > { %1367 = vst.msk [vmem:[#allocation2 + $0x189] sm:$0xff] %vm1289_vm2, %v1288_v47  ;;  %v991_v57 = vadd.f32 %v3791_v19, %v990_v42  ;;  %v1415_v21 = vmul.f32 %v4226_v10, %v5450_v38  ;;  %v1480_v15 = vmul.f32 %v4229_v13, %v5493_v30  ;;  %vm994_vm11 = vmor %vm992_vm10, %vm993_vm3  ;;  %v999_v47 = vor.u32 1.1754944e-38, %v998_v16 }
 0x1a7   : > { %3800 = vrcp.f32 %v5781_v0  ;;  %v1577_v24 = vmul.f32 %v4248_v43, %v5503_v34  ;;  %v2512_v60 = vmul.f32 %v5783_v48, %v5701_v3  ;;  %vm997_vm12 = vcmp.eq.f32.partialorder %v996_v12, 8.507059e+37  ;;  %7351 = vst [vmem:[#allocation47_spill] sm:$0xff] %v5816_v23 }
 0x1a8   : > { %v995_v44 = vsel %vm994_vm11, %v3791_v19, %v991_v57  ;;  %v5808_v39 = vpop.eup %3798  ;;  %v2498_v51 = vsub.f32 1.0, %v2497_v5  ;;  %v5811_v38 = vadd.f32 %v5261_v6, %v2191_v32  ;;  %v3549_v30 = vmul.f32 -1.442695, %v5792_v4 }
 0x1a9   : > { %v1000_v41 = vsel %vm997_vm12, %v999_v47, %v995_v44  ;;  %v1513_v16 = vadd.f32 %v1481_v33, %v1416_v35  ;;  %v1003_v19 = vmul.f32 %v5808_v39, %v5743_v36  ;;  %v5822_v42 = vadd.f32 %v5310_v27, %v611_v8 }
 0x1aa   : > { %v1271_v34 = vmul.f32 %v1000_v41, %v5546_v46  ;;  %v5824_v12 = vadd.f32 %v2901_v62, %v2900_v7  ;;  %v1512_v6 = vadd.f32 %v1480_v15, %v1415_v21  ;;  %v5828_v5 = vmul.f32 %v4226_v10, %v5814_v37 }
 0x1ab   : > { %v5832_v32 = vmul.f32 %v4229_v13, %v5816_v23  ;;  %v1578_v46 = vmul.f32 %v4248_v43, %v5519_v56  ;;  %v2513_v35 = vsub.f32 1.0, %v2512_v60  ;;  %v1004_v33 = vsub.f32 1.0, %v1003_v19 }
 0x1ac   : > { %1350 = vst.msk [vmem:[#allocation2 + $0xc1] sm:$0xff] %vm1289_vm2, %v1271_v34  ;;  %v3524_v27 = vmul.f32 -1.442695, %v5822_v42  ;;  %v5842_v62 = vmul.f32 %v4267_v59, %v5814_v37  ;;  %v2499_v57 = vmul.f32 %v5762_v45, %v2498_v51  ;;  %3802 = vpow2.f32 %v3549_v30 }
 0x1ad   : > { %v5838_v7 = vpop.eup %3800  ;;  %v3550_v21 = vmul.f32 -1.442695, %v5811_v38  ;;  %v5848_v56 = vmul.f32 %v4295_v11, %v5816_v23  ;;  %v1609_v15 = vadd.f32 %v1577_v24, %v1512_v6  ;;  %v5850_v47 = vadd.f32 %v1578_v46, %v1513_v16 }
 0x1ae   : > { %v1674_v8 = vmul.f32 %v4267_v59, %v5658_v22  ;;  %v2505_v60 = vand.u32 2147483647, %v5674_v18  ;;  %v2507_v44 = vand.u32 2147483648, %v5674_v18  ;;  %v1005_v41 = vmul.f32 %v5808_v39, %v1004_v33 }
 0x1af   : > { %v1018_v51 = vmul.f32 %v5838_v7, %v5781_v0  ;;  %vm2502_vm13 = vweird.f32 %v5762_v45  ;;  %v2514_v30 = vmul.f32 %v5783_v48, %v2513_v35  ;;  %v5863_v24 = vmul.f32 %v4226_v10, %v5658_v22 }
 0x1b0   : > { %3804 = vpow2.f32 %v3524_v27  ;;  %v2500_v16 = vadd.f32 %v5762_v45, %v2499_v57  ;;  %v1011_v34 = vand.u32 2147483647, %v5743_v36  ;;  %v1013_v19 = vand.u32 2147483648, %v5743_v36 }
 0x1b1   : > { %3806 = vpow2.f32 %v3550_v21  ;;  %vm2501_vm14 = vweird.f32 %v5674_v18  ;;  %v1006_v6 = vadd.f32 %v5808_v39, %v1005_v41  ;;  %vm1008_vm15 = vweird.f32 %v5808_v39 }
 0x1b2   : > { %v1019_v46 = vsub.f32 1.0, %v1018_v51  ;;  %v3803_v35 = vpop.eup %3802  ;;  %vm5871_vm0 = vcmp.eq.f32.partialorder %v2505_v60, 8.507059e+37  ;;  %v2508_v22 = vor.u32 1.1754944e-38, %v2507_v44  ;;  %v2520_v27 = vand.u32 2147483647, %v5701_v3  ;;  %vm5878_vm4 = vmor %vm2501_vm14, %vm2502_vm13 }
 0x1b3   : > { %v1706_v57 = vadd.f32 %v1674_v8, %v1609_v15  ;;  %v2515_v18 = vadd.f32 %v5783_v48, %v2514_v30  ;;  %vm2517_vm5 = vweird.f32 %v5783_v48  ;;  %v2522_v41 = vand.u32 2147483648, %v5701_v3 }
 0x1b4   : > { %vm1007_vm7 = vweird.f32 %v5743_v36  ;;  %v2504_v60 = vsel %vm5878_vm4, %v5762_v45, %v2500_v16  ;;  %vm2516_vm8 = vweird.f32 %v5701_v3  ;;  %vm1012_vm6 = vcmp.eq.f32.partialorder %v1011_v34, 8.507059e+37 }
 0x1b5   : > { %vm1009_vm9 = vmor %vm1007_vm7, %vm1008_vm15  ;;  %v1014_v15 = vor.u32 1.1754944e-38, %v1013_v19  ;;  %v5890_v44 = vadd.f32 1.0, %v3803_v35  ;;  %v1020_v30 = vmul.f32 %v5838_v7, %v1019_v46  ;;  %v1028_v2 = vand.u32 2147483648, %v5781_v0 }
 0x1b6   : > { %v3805_v8 = vpop.eup %3804  ;;  %v1010_v51 = vsel %vm1009_vm9, %v5808_v39, %v1006_v6  ;;  %vm5895_vm3 = vmor %vm2516_vm8, %vm2517_vm5  ;;  %vm5899_vm10 = vcmp.eq.f32.partialorder %v2520_v27, 8.507059e+37  ;;  %vm1023_vm11 = vweird.f32 %v5838_v7  ;;  %v1026_v16 = vand.u32 2147483647, %v5781_v0 }
 0x1b7   : > { %v3807_v55 = vpop.eup %3806  ;;  %v1015_v3 = vsel %vm1012_vm6, %v1014_v15, %v1010_v51  ;;  %v2519_v39 = vsel %vm5895_vm3, %v5783_v48, %v2515_v18  ;;  %v2523_v34 = vor.u32 1.1754944e-38, %v2522_v41  ;;  %v1675_v19 = vmul.f32 %v4267_v59, %v5689_v25  ;;  %v5937_v41 = vld [vmem:[#allocation2 + $0x171] sm:$0xff] }
 0x1b8   : > { %v1272_v6 = vmul.f32 %v1015_v3, %v5610_v53  ;;  %v2509_v46 = vsel %vm5871_vm0, %v2508_v22, %v2504_v60  ;;  %v1021_v35 = vadd.f32 %v5838_v7, %v1020_v30  ;;  %vm1022_vm12 = vweird.f32 %v5781_v0  ;;  %v5927_v0 = vld [vmem:[#allocation2 + $0xc0] sm:$0xff]  ;;  %v5947_v51 = vld [vmem:[#allocation2 + $0x16a] sm:$0xff] }
 0x1b9   : > { %v5915_v27 = vadd.f32 1.0, %v3805_v8  ;;  %v1418_v21 = vmul.f32 %v4226_v10, %v5689_v25  ;;  %v5919_v15 = vadd.f32 1.0, %v3807_v55  ;;  %3808 = vrcp.f32 %v5890_v44  ;;  %vm1024_vm13 = vmor %vm1022_vm12, %vm1023_vm11 }
 0x1ba   : > { %1351 = vst.msk [vmem:[#allocation2 + $0xc9] sm:$0xff] %vm1289_vm2, %v1272_v6  ;;  %v1029_v53 = vor.u32 1.1754944e-38, %v1028_v2  ;;  %v2524_v48 = vsel %vm5899_vm10, %v2523_v34, %v2519_v39  ;;  %v1483_v33 = vmul.f32 %v4229_v13, %v5720_v52  ;;  %v1025_v22 = vsel %vm1024_vm13, %v5838_v7, %v1021_v35  ;;  %v5971_v34 = vld [vmem:[#allocation2 + $0x172] sm:$0xff] }
 0x1bb   : > { %vm1027_vm14 = vcmp.eq.f32.partialorder %v1026_v16, 8.507059e+37  ;;  %v5931_v25 = vmul.f32 %v2509_v46, %v5562_v9  ;;  %v1771_v55 = vmul.f32 %v4295_v11, %v5703_v31  ;;  %v1868_v2 = vmul.f32 %v4298_v14, %v5705_v17  ;;  %v5978_v46 = vld [vmem:[#allocation2 + $0xc1] sm:$0xff] }
 0x1bc   : > { %v1030_v18 = vsel %vm1027_vm14, %v1029_v53, %v1025_v22  ;;  %v1482_v60 = vmul.f32 %v4229_v13, %v5703_v31  ;;  %v1707_v8 = vadd.f32 %v1675_v19, %v5850_v47  ;;  %3810 = vrcp.f32 %v5915_v27  ;;  %v5956_v47 = vld [vmem:[#allocation2 + $0x170] sm:$0xff] }
 0x1bd   : > { %7360 = vst [vmem:[#allocation48_spill] sm:$0xff] %v5931_v25  ;;  %v1273_v7 = vmul.f32 %v1030_v18, %v5636_v26  ;;  %v5945_v9 = vmul.f32 %v2524_v48, %v5578_v61  ;;  %v1803_v30 = vadd.f32 %v1771_v55, %v1706_v57  ;;  %3812 = vrcp.f32 %v5919_v15 }
 0x1be   : > { %v1966_v36 = vmul.f32 %v4305_v20, %v5927_v0  ;;  %v5954_v31 = vmul.f32 %v4305_v20, %v5814_v37  ;;  %v1515_v26 = vadd.f32 %v1483_v33, %v1418_v21  ;;  %v1579_v45 = vmul.f32 %v4248_v43, %v5705_v17 }
 0x1bf   : > { %7361 = vst [vmem:[#allocation49_spill] sm:$0xff] %v5945_v9  ;;  %v1772_v61 = vmul.f32 %v4295_v11, %v5720_v52  ;;  %v5963_v57 = vpop.eup %3808  ;;  %v2903_v3 = vsel %vm1289_vm2, %v5931_v25, 0.0  ;;  %v1434_v37 = vmul.f32 %v4226_v10, %v5956_v47  ;;  %v1499_v16 = vmul.f32 %v4229_v13, %v5937_v41 }
 0x1c0   : > { %7362 = vst [vmem:[#allocation50_spill] sm:$0xff] %v5954_v31  ;;  %v1900_v39 = vadd.f32 %v1868_v2, %v1803_v30  ;;  %v1595_v17 = vmul.f32 %v4248_v43, %v5947_v51  ;;  %v1514_v52 = vadd.f32 %v1482_v60, %v5863_v24  ;;  %v1580_v19 = vmul.f32 %v4248_v43, %v5753_v54 }
 0x1c1   : > { %1352 = vst.msk [vmem:[#allocation2 + $0xd9] sm:$0xff] %vm1289_vm2, %v1273_v7  ;;  %v1804_v6 = vadd.f32 %v1772_v61, %v1707_v8  ;;  %v2905_v35 = vsel %vm1289_vm2, %v5945_v9, 0.0  ;;  %v1691_v21 = vmul.f32 %v4267_v59, %v5956_v47  ;;  %v1869_v53 = vmul.f32 %v4298_v14, %v5753_v54  ;;  %v5986_v33 = vld [vmem:[#allocation2 + $0xc8] sm:$0xff] }
 0x1c2   : > { %v1998_v48 = vadd.f32 %v1966_v36, %v1900_v39  ;;  %v5988_v22 = vpop.eup %3810  ;;  %v2904_v24 = vadd.f32 %v2903_v3, %v5824_v12  ;;  %v5991_v55 = vadd.f32 %v1579_v45, %v1514_v52  ;;  %v5993_v2 = vadd.f32 %v1580_v19, %v1515_v26  ;;  %v5997_v60 = vld [vmem:[#allocation2 + $0xc2] sm:$0xff]  ;;  %v6018_v25 = vld [vmem:[#allocation2 + $0xca] sm:$0xff] }
 0x1c3   : > { %v2527_v18 = vmul.f32 %v5963_v57, %v5890_v44  ;;  %v5999_v8 = vpop.eup %3812  ;;  %v2063_v54 = vmul.f32 %v4320_v40, %v5978_v46  ;;  %v6003_v7 = vld [vmem:[#allocation2 + $0xc9] sm:$0xff]  ;;  %v1530_v30 = vadd.f32 %v5832_v32, %v5828_v5  ;;  %v1531_v12 = vadd.f32 %v1499_v16, %v1434_v37  ;;  %v6011_v45 = vld [vmem:[#allocation2 + $0x180] sm:$0xff]  ;;  %v6023_v5 = vld [vmem:[%s7217_s3 + $0x8] ss:$0 sm:$0xff] }
 0x1c4   : > { %v1596_v36 = vmul.f32 %v4248_v43, %v5971_v34  ;;  %v6009_v26 = vadd.f32 %v2905_v35, %v2904_v24  ;;  %v1901_v61 = vadd.f32 %v1869_v53, %v1804_v6  ;;  %v1967_v3 = vmul.f32 %v4305_v20, %v5986_v33  ;;  %v7363_v39 = vld [vmem:[#allocation39_spill] sm:$0xff] }
 0x1c5   : > { %v1626_v52 = vadd.f32 %v7363_v39, %v5654_v49  ;;  %v2537_v19 = vand.u32 2147483648, %v5890_v44  ;;  %v2095_v9 = vadd.f32 %v2063_v54, %v1998_v48  ;;  %v2160_v32 = vmul.f32 %v6023_v5, %v5997_v60  ;;  %v6029_v16 = vld [vmem:[#allocation2 + $0x188] sm:$0xff] }
 0x1c6   : > { %v1033_v37 = vmul.f32 %v5988_v22, %v5915_v27  ;;  %v2528_v6 = vsub.f32 1.0, %v2527_v18  ;;  %v2542_v49 = vmul.f32 %v5999_v8, %v5919_v15  ;;  %v1999_v35 = vadd.f32 %v1967_v3, %v1901_v61 }
 0x1c7   : > { %v2064_v53 = vmul.f32 %v4320_v40, %v6003_v7  ;;  %v2192_v48 = vadd.f32 %v2160_v32, %v2095_v9  ;;  %v1627_v24 = vadd.f32 %v1595_v17, %v1530_v30  ;;  %v1628_v54 = vadd.f32 %v1596_v36, %v1531_v12  ;;  %v6046_v9 = vld [vmem:[%s7218_s4] ss:$0 sm:$0xff] }
 0x1c8   : > { %v1692_v39 = vmul.f32 %v4267_v59, %v6011_v45  ;;  %v2535_v63 = vand.u32 2147483647, %v5890_v44  ;;  %v2161_v23 = vmul.f32 %v6023_v5, %v6018_v25  ;;  %v1693_v18 = vmul.f32 %v4267_v59, %v6029_v16 }
 0x1c9   : > { %v2096_v58 = vadd.f32 %v2064_v53, %v1999_v35  ;;  %vm2531_vm15 = vweird.f32 %v5890_v44  ;;  %v2538_v61 = vor.u32 1.1754944e-38, %v2537_v19  ;;  %v6049_v17 = vadd.f32 %v6046_v9, %v2192_v48  ;;  %v7365_v53 = vld [vmem:[#allocation41_spill] sm:$0xff] }
 0x1ca   : > { %v1034_v30 = vsub.f32 1.0, %v1033_v37  ;;  %v2529_v12 = vmul.f32 %v5963_v57, %v2528_v6  ;;  %v2543_v36 = vsub.f32 1.0, %v2542_v49  ;;  %v1043_v32 = vand.u32 2147483648, %v5915_v27 }
 0x1cb   : > { %7364 = vst [vmem:[#allocation39_spill] sm:$0xff] %v6049_v17  ;;  %v2193_v3 = vadd.f32 %v2161_v23, %v2096_v58  ;;  %vm1038_vm0 = vweird.f32 %v5988_v22  ;;  %v1041_v19 = vand.u32 2147483647, %v5915_v27  ;;  %v1722_v31 = vadd.f32 %v5842_v62, %v7365_v53 }
 0x1cc   : > { %v1035_v35 = vmul.f32 %v5988_v22, %v1034_v30  ;;  %vm6058_vm4 = vcmp.eq.f32.partialorder %v2535_v63, 8.507059e+37  ;;  %v2550_v37 = vand.u32 2147483647, %v5919_v15  ;;  %v2552_v6 = vand.u32 2147483648, %v5919_v15 }
 0x1cd   : > { %v1676_v58 = vmul.f32 %v4267_v59, %v5927_v0  ;;  %v1723_v23 = vadd.f32 %v1691_v21, %v1626_v52  ;;  %vm2532_vm5 = vweird.f32 %v5963_v57  ;;  %vm2546_vm7 = vweird.f32 %v5919_v15 }
 0x1ce   : > { %v3551_v49 = vmul.f32 -1.442695, %v6049_v17  ;;  %v1036_v62 = vadd.f32 %v5988_v22, %v1035_v35  ;;  %vm1037_vm8 = vweird.f32 %v5915_v27  ;;  %v2530_v63 = vadd.f32 %v5963_v57, %v2529_v12  ;;  %v6079_v17 = vld [vmem:[#allocation2 + $0x181] sm:$0xff]  ;;  %vm6093_vm3 = vmor %vm2531_vm15, %vm2532_vm5 }
 0x1cf   : > { %v2544_v48 = vmul.f32 %v5999_v8, %v2543_v36  ;;  %v6074_v30 = vadd.f32 %v6046_v9, %v2193_v3  ;;  %vm1039_vm9 = vmor %vm1037_vm8, %vm1038_vm0  ;;  %v1044_v21 = vor.u32 1.1754944e-38, %v1043_v32  ;;  %vm1042_vm6 = vcmp.eq.f32.partialorder %v1041_v19, 8.507059e+37  ;;  %v1388_v19 = vld [vmem:[#allocation2 + $0xd8] sm:$0xff] }
 0x1d0   : > { %v1040_v52 = vsel %vm1039_vm9, %v5988_v22, %v1036_v62  ;;  %v1724_v53 = vadd.f32 %v1692_v39, %v1627_v24  ;;  %v1788_v27 = vmul.f32 %v4295_v11, %v5937_v41  ;;  %v1419_v12 = vmul.f32 %v4226_v10, %v5927_v0  ;;  %v6104_v24 = vld [vmem:[#allocation2 + $0x189] sm:$0xff]  ;;  %v7373_v22 = vld [vmem:[#allocation40_spill] sm:$0xff] }
 0x1d1   : > { %7368 = vst [vmem:[#allocation41_spill] sm:$0xff] %v6074_v30  ;;  %v1484_v36 = vmul.f32 %v4229_v13, %v5978_v46  ;;  %v1773_v3 = vmul.f32 %v4295_v11, %v5978_v46  ;;  %v1045_v35 = vsel %vm1042_vm6, %v1044_v21, %v1040_v52  ;;  %vm2547_vm10 = vweird.f32 %v5999_v8 }
 0x1d2   : > { %vm6098_vm11 = vcmp.eq.f32.partialorder %v2550_v37, 8.507059e+37  ;;  %v1708_v0 = vadd.f32 %v1676_v58, %v5991_v55  ;;  %3814 = vpow2.f32 %v3551_v49  ;;  %v1274_v46 = vmul.f32 %v1045_v35, %v5822_v42  ;;  %vm6135_vm12 = vmor %vm2546_vm7, %vm2547_vm10 }
 0x1d3   : > { %v2534_v44 = vsel %vm6093_vm3, %v5963_v57, %v2530_v63  ;;  %v2545_v39 = vadd.f32 %v5999_v8, %v2544_v48  ;;  %v3552_v32 = vmul.f32 -1.442695, %v6074_v30  ;;  %v1789_v37 = vmul.f32 %v4295_v11, %v6079_v17 }
 0x1d4   : > { %v1420_v55 = vmul.f32 %v4226_v10, %v5986_v33  ;;  %v1485_v42 = vmul.f32 %v4229_v13, %v6003_v7  ;;  %v1581_v58 = vmul.f32 %v4248_v43, %v5997_v60  ;;  %v1677_v57 = vmul.f32 %v4267_v59, %v5986_v33  ;;  %1353 = vst.msk [vmem:[#allocation2 + $0xe1] sm:$0xff] %vm1289_vm2, %v1274_v46 }
 0x1d5   : > { %v2553_v49 = vor.u32 1.1754944e-38, %v2552_v6  ;;  %v1516_v62 = vadd.f32 %v1484_v36, %v1419_v12  ;;  %v1725_v63 = vadd.f32 %v1693_v18, %v1628_v54  ;;  %v1790_v48 = vmul.f32 %v4295_v11, %v6104_v24  ;;  %v1453_v54 = vld [vmem:[#allocation2 + $0xd9] sm:$0xff] }
 0x1d6   : > { %v2539_v21 = vsel %vm6058_vm4, %v2538_v61, %v2534_v44  ;;  %v1805_v52 = vadd.f32 %v1773_v3, %v1708_v0  ;;  %v1678_v35 = vmul.f32 %v4267_v59, %v1388_v19  ;;  %v6129_v30 = vadd.f32 %v7373_v22, %v5729_v1 }
 0x1d7   : > { %3816 = vpow2.f32 %v3552_v32  ;;  %v6140_v50 = vadd.f32 %v5848_v56, %v1722_v31  ;;  %v6142_v18 = vadd.f32 %v1788_v27, %v1723_v23  ;;  %v6144_v61 = vadd.f32 %v1789_v37, %v1724_v53 }
 0x1d8   : > { %v3815_v6 = vpop.eup %3814  ;;  %v2549_v1 = vsel %vm6135_vm12, %v5999_v8, %v2545_v39  ;;  %v1517_v12 = vadd.f32 %v1485_v42, %v1420_v55  ;;  %v1613_v15 = vadd.f32 %v1581_v58, %v1516_v62  ;;  %v1709_v36 = vadd.f32 %v1677_v57, %v5993_v2 }
 0x1d9   : > { %v6151_v3 = vmul.f32 %v2539_v21, %v5792_v4  ;;  %v1582_v56 = vmul.f32 %v4248_v43, %v6018_v25  ;;  %v1774_v31 = vmul.f32 %v4295_v11, %v6003_v7  ;;  %v6157_v23 = vadd.f32 %v1790_v48, %v1725_v63 }
 0x1da   : > { %v1870_v53 = vmul.f32 %v4298_v14, %v5997_v60  ;;  %v1421_v8 = vmul.f32 %v4226_v10, %v1388_v19  ;;  %v1486_v27 = vmul.f32 %v4229_v13, %v1453_v54  ;;  %v1710_v0 = vadd.f32 %v1678_v35, %v1613_v15 }
 0x1db   : > { %v2554_v4 = vsel %vm6098_vm11, %v2553_v49, %v2549_v1  ;;  %v1871_v2 = vmul.f32 %v4298_v14, %v6018_v25  ;;  %v6167_v46 = vadd.f32 1.0, %v3815_v6  ;;  %v1389_v44 = vld [vmem:[#allocation2 + $0xe0] sm:$0xff]  ;;  %v1884_v32 = vmul.f32 %v4298_v14, %v5947_v51 }
 0x1dc   : > { %v1454_v7 = vld [vmem:[#allocation2 + $0xe1] sm:$0xff]  ;;  %v1614_v60 = vadd.f32 %v1582_v56, %v1517_v12  ;;  %v1806_v37 = vadd.f32 %v1774_v31, %v1709_v36  ;;  %v1775_v55 = vmul.f32 %v4295_v11, %v1453_v54  ;;  %v1968_v42 = vmul.f32 %v4305_v20, %v1388_v19 }
 0x1dd   : > { %v1550_v39 = vld [vmem:[#allocation2 + $0xda] sm:$0xff]  ;;  %v3817_v58 = vpop.eup %3816  ;;  %v1422_v41 = vmul.f32 %v4226_v10, %v1389_v44  ;;  %v1487_v57 = vmul.f32 %v4229_v13, %v1454_v7  ;;  %v1679_v49 = vmul.f32 %v4267_v59, %v1389_v44  ;;  %v1902_v62 = vadd.f32 %v1870_v53, %v1805_v52  ;;  %v1551_v21 = vld [vmem:[#allocation2 + $0xe2] sm:$0xff] }
 0x1de   : > { %v1583_v25 = vmul.f32 %v4248_v43, %v1550_v39  ;;  %v1518_v63 = vadd.f32 %v1486_v27, %v1421_v8  ;;  %v1807_v48 = vadd.f32 %v1775_v55, %v1710_v0  ;;  %v1872_v51 = vmul.f32 %v4298_v14, %v1550_v39  ;;  %v7376_v56 = vld [vmem:[#allocation6_spill] sm:$0xff]  ;;  %v6195_v55 = vld [vmem:[#allocation2 + $0x18a] sm:$0xff] }
 0x1df   : > { %3818 = vrcp.f32 %v6167_v46  ;;  %v1711_v35 = vadd.f32 %v1679_v49, %v1614_v60  ;;  %v1776_v19 = vmul.f32 %v4295_v11, %v1454_v7  ;;  %v1969_v22 = vmul.f32 %v4305_v20, %v1389_v44  ;;  %v6187_v11 = vld [vmem:[#allocation2 + $0x182] sm:$0xff] }
 0x1e0   : > { %v1903_v10 = vadd.f32 %v1871_v2, %v1806_v37  ;;  %v6181_v33 = vadd.f32 1.0, %v3817_v58  ;;  %v2000_v13 = vadd.f32 %v1968_v42, %v1902_v62  ;;  %v1904_v6 = vadd.f32 %v1872_v51, %v1807_v48  ;;  %v7378_v58 = vld [vmem:[#allocation4_spill] sm:$0xff] }
 0x1e1   : > { %v1519_v1 = vadd.f32 %v1487_v57, %v1422_v41  ;;  %v1615_v59 = vadd.f32 %v1583_v25, %v1518_v63  ;;  %v1808_v52 = vadd.f32 %v1776_v19, %v1711_v35  ;;  %v1873_v12 = vmul.f32 %v4298_v14, %v1551_v21  ;;  %v7380_v63 = vld [vmem:[#allocation14_spill] sm:$0xff] }
 0x1e2   : > { %v2065_v15 = vmul.f32 %v4320_v40, %v1453_v54  ;;  %v2001_v36 = vadd.f32 %v1969_v22, %v1903_v10  ;;  %v2002_v31 = vadd.f32 %v7376_v56, %v1904_v6  ;;  %v2066_v53 = vmul.f32 %v4320_v40, %v1454_v7  ;;  %v7377_v54 = vld [vmem:[#allocation7_spill] sm:$0xff] }
 0x1e3   : > { %v2907_v8 = vsel %vm1289_vm2, %v6151_v3, 0.0  ;;  %v1584_v27 = vmul.f32 %v4248_v43, %v1551_v21  ;;  %v1905_v0 = vadd.f32 %v1873_v12, %v1808_v52  ;;  %v2162_v2 = vmul.f32 %v6023_v5, %v1550_v39  ;;  %v7379_v39 = vld [vmem:[#allocation12_spill] sm:$0xff]  ;;  %v7384_v12 = vld [vmem:[#allocation13_spill] sm:$0xff] }
 0x1e4   : > { %3820 = vrcp.f32 %v6181_v33  ;;  %v2097_v44 = vadd.f32 %v2065_v15, %v2000_v13  ;;  %v2098_v60 = vadd.f32 %v2066_v53, %v2001_v36  ;;  %v2099_v37 = vadd.f32 %v7377_v54, %v2002_v31  ;;  %v1951_v52 = vld [vmem:[#allocation2 + $0x198] sm:$0xff]  ;;  %v7386_v54 = vld [vmem:[#allocation10_spill] sm:$0xff] }
 0x1e5   : > { %v6197_v42 = vpop.eup %3818  ;;  %v1616_v7 = vadd.f32 %v1584_v27, %v1519_v1  ;;  %v1712_v41 = vadd.f32 %v7378_v58, %v1615_v59  ;;  %v1885_v57 = vmul.f32 %v4298_v14, %v5971_v34  ;;  %v1886_v43 = vmul.f32 %v4298_v14, %v6187_v11  ;;  %v7381_v34 = vld [vmem:[#allocation38_spill] sm:$0xff] }
 0x1e6   : > { %v2003_v25 = vadd.f32 %v7379_v39, %v1905_v0  ;;  %v2163_v49 = vmul.f32 %v6023_v5, %v1551_v21  ;;  %v2194_v62 = vadd.f32 %v2162_v2, %v2097_v44  ;;  %v2196_v48 = vadd.f32 %v7380_v63, %v2099_v37  ;;  %v1952_v0 = vld [vmem:[#allocation2 + $0x1a0] sm:$0xff]  ;;  %v7388_v39 = vld [vmem:[#allocation31_spill] sm:$0xff] }
 0x1e7   : > { %v6208_v51 = vmul.f32 %v2554_v4, %v5811_v38  ;;  %v6211_v35 = vadd.f32 %v2907_v8, %v6009_v26  ;;  %v1887_v19 = vmul.f32 %v4298_v14, %v6195_v55  ;;  %v1914_v22 = vadd.f32 %v5747_v28, %v7381_v34  ;;  %v7382_v4 = vld [vmem:[#allocation8_spill] sm:$0xff]  ;;  %v7383_v26 = vld [vmem:[#allocation5_spill] sm:$0xff] }
 0x1e8   : > { %v2557_v10 = vmul.f32 %v6197_v42, %v6167_v46  ;;  %v2195_v13 = vadd.f32 %v2163_v49, %v2098_v60  ;;  %v6220_v21 = vadd.f32 %v6046_v9, %v2194_v62  ;;  %v1915_v38 = vadd.f32 %v5751_v29, %v6129_v30  ;;  %v2967_v30 = vld [vmem:[%s7219_s5 + $0x10] sm:$0xff]  ;;  %v7385_v44 = vld [vmem:[#allocation9_spill] sm:$0xff]  ;;  %v7390_v62 = vld [vmem:[#allocation50_spill] sm:$0xff] }
 0x1e9   : > { %v1713_v6 = vadd.f32 %v7382_v4, %v1616_v7  ;;  %v1809_v1 = vadd.f32 %v7383_v26, %v1712_v41  ;;  %v1916_v59 = vadd.f32 %v1884_v32, %v6140_v50  ;;  %v1917_v14 = vadd.f32 %v1885_v57, %v6142_v18  ;;  %v2966_v50 = vld [vmem:[%s7219_s5 + $0x8] sm:$0xff]  ;;  %2985 = vmatpush.msrb.mxu1 %v2967_v30  ;;  %v2045_v57 = vld [vmem:[#allocation2 + $0x171] sm:$0xff] }
 0x1ea   : > { %v6228_v28 = vpop.eup %3820  ;;  %v2100_v15 = vadd.f32 %v7384_v12, %v2003_v25  ;;  %v6232_v36 = vadd.f32 %v6046_v9, %v2195_v13  ;;  %v6235_v56 = vadd.f32 %v6046_v9, %v2196_v48  ;;  %v3553_v29 = vmul.f32 -1.442695, %v6220_v21  ;;  %v7387_v7 = vld [vmem:[#allocation15_spill] sm:$0xff]  ;;  %v7389_v25 = vld [vmem:[#allocation44_spill] sm:$0xff]  ;;  %v2048_v13 = vld [vmem:[#allocation2 + $0x199] sm:$0xff] }
 0x1eb   : > { %v1918_v18 = vadd.f32 %v1886_v43, %v6144_v61  ;;  %v1981_v32 = vmul.f32 %v4305_v20, %v5956_v47  ;;  %v1982_v31 = vmul.f32 %v4305_v20, %v6011_v45  ;;  %v1983_v53 = vmul.f32 %v4305_v20, %v6029_v16  ;;  %v2965_v16 = vld [vmem:[%s7219_s5] sm:$0xff]  ;;  %2986 = vmatpush.msrb.mxu1 %v2966_v50  ;;  %v7393_v12 = vld [vmem:[#allocation16_spill] sm:$0xff] }
 0x1ec   : > { %v2558_v8 = vsub.f32 1.0, %v2557_v10  ;;  %3822 = vpow2.f32 %v3553_v29  ;;  %v3554_v27 = vmul.f32 -1.442695, %v6232_v36  ;;  %v1984_v2 = vmul.f32 %v4305_v20, %v1951_v52  ;;  %v7394_v50 = vld [vmem:[#allocation37_spill] sm:$0xff] }
 0x1ed   : > { %v6255_v61 = vsel %vm1289_vm2, %v6208_v51, 0.0  ;;  %v2572_v47 = vmul.f32 %v6228_v28, %v6181_v33  ;;  %v1810_v45 = vadd.f32 %v7385_v44, %v1713_v6  ;;  %v6264_v60 = vadd.f32 %v1887_v19, %v6157_v23  ;;  %2987 = vmatpush.msrb.mxu1 %v2965_v16  ;;  %v7391_v6 = vld [vmem:[#allocation47_spill] sm:$0xff]  ;;  %v7397_v16 = vld [vmem:[#allocation18_spill] sm:$0xff] }
 0x1ee   : > { %v1906_v37 = vadd.f32 %v7386_v54, %v1809_v1  ;;  %v2197_v58 = vadd.f32 %v7387_v7, %v2100_v15  ;;  %3824 = vpow2.f32 %v3554_v27  ;;  %v3555_v41 = vmul.f32 -1.442695, %v6235_v56  ;;  %v2141_v44 = vld [vmem:[#allocation2 + $0x16a] sm:$0xff] }
 0x1ef   : > { %v6270_v43 = vmul.f32 %v4305_v20, %v1952_v0  ;;  %v2011_v49 = vadd.f32 %v7389_v25, %v7388_v39  ;;  %v2012_v63 = vadd.f32 %v7390_v62, %v1914_v22  ;;  %v2013_v48 = vadd.f32 %v1981_v32, %v1915_v38  ;;  %v7392_v38 = vld [vmem:[#allocation11_spill] sm:$0xff]  ;;  %v3906_v25 = vld [vmem:[#allocation2 + $0x15a] sm:$0xff] }
 0x1f0   : > { %v2559_v23 = vmul.f32 %v6197_v42, %v2558_v8  ;;  %v2014_v19 = vadd.f32 %v1982_v31, %v1916_v59  ;;  %v6276_v34 = vadd.f32 %v1983_v53, %v1917_v14  ;;  %v6278_v10 = vadd.f32 %v1984_v2, %v1918_v18  ;;  %v7395_v18 = vld [vmem:[#allocation34_spill] sm:$0xff]  ;;  %v7396_v8 = vld [vmem:[#allocation45_spill] sm:$0xff] }
 0x1f1   : > { %v2573_v4 = vsub.f32 1.0, %v2572_v47  ;;  %v2077_v20 = vmul.f32 %v4320_v40, %v7391_v6  ;;  %v2078_v26 = vmul.f32 %v4320_v40, %v2045_v57  ;;  %v2079_v1 = vmul.f32 %v4320_v40, %v6079_v17  ;;  %v7401_v6 = vld [vmem:[#allocation19_spill] sm:$0xff] }
 0x1f2   : > { %v3823_v22 = vpop.eup %3822  ;;  %v1907_v52 = vadd.f32 %v7392_v38, %v1810_v45  ;;  %v2004_v15 = vadd.f32 %v7393_v12, %v1906_v37  ;;  %v6288_v59 = vadd.f32 %v6046_v9, %v2197_v58  ;;  %3826 = vpow2.f32 %v3555_v41  ;;  %v2142_v45 = vld [vmem:[#allocation2 + $0x172] sm:$0xff] }
 0x1f3   : > { %v6290_v14 = vadd.f32 1.0, %v3823_v22  ;;  %v2080_v29 = vmul.f32 %v4320_v40, %v6104_v24  ;;  %v2081_v30 = vmul.f32 %v4320_v40, %v2048_v13  ;;  %v2107_v32 = vadd.f32 %v7395_v18, %v7394_v50  ;;  %v7398_v37 = vld [vmem:[#allocation17_spill] sm:$0xff] }
 0x1f4   : > { %v3825_v17 = vpop.eup %3824  ;;  %v2560_v31 = vadd.f32 %v6197_v42, %v2559_v23  ;;  %vm2562_vm13 = vweird.f32 %v6197_v42  ;;  %v2565_v53 = vand.u32 2147483647, %v6167_v46  ;;  %v2108_v27 = vadd.f32 %v7396_v8, %v2011_v49  ;;  %v2145_v50 = vld [vmem:[#allocation2 + $0x19a] sm:$0xff] }
 0x1f5   : > { %v2567_v0 = vand.u32 2147483648, %v6167_v46  ;;  %v2574_v2 = vmul.f32 %v6228_v28, %v2573_v4  ;;  %v6303_v47 = vadd.f32 1.0, %v3825_v17  ;;  %v2109_v24 = vadd.f32 %v2077_v20, %v2012_v63  ;;  %v7405_v17 = vld [vmem:[#allocation32_spill] sm:$0xff] }
 0x1f6   : > { %vm2561_vm14 = vweird.f32 %v6167_v46  ;;  %v2005_v54 = vadd.f32 %v7397_v16, %v1907_v52  ;;  %v2101_v7 = vadd.f32 %v7398_v37, %v2004_v15  ;;  %v3556_v58 = vmul.f32 -1.442695, %v6288_v59  ;;  %v7409_v16 = vld [vmem:[#allocation21_spill] sm:$0xff] }
 0x1f7   : > { %vm6309_vm15 = vmor %vm2561_vm14, %vm2562_vm13  ;;  %3828 = vrcp.f32 %v6290_v14  ;;  %v2110_v57 = vadd.f32 %v2078_v26, %v2013_v48  ;;  %v2111_v39 = vadd.f32 %v2079_v1, %v2014_v19  ;;  %v2173_v49 = vmul.f32 %v3906_v25, %v6023_v5  ;;  %v2049_v48 = vld [vmem:[#allocation2 + $0x1a1] sm:$0xff]  ;;  %v7402_v26 = vld [vmem:[#allocation20_spill] sm:$0xff] }
 0x1f8   : > { %v3827_v62 = vpop.eup %3826  ;;  %v2564_v46 = vsel %vm6309_vm15, %v6197_v42, %v2560_v31  ;;  %vm2566_vm0 = vcmp.eq.f32.partialorder %v2565_v53, 8.507059e+37  ;;  %v2174_v63 = vmul.f32 %v6023_v5, %v2141_v44  ;;  %v2175_v23 = vmul.f32 %v6023_v5, %v2142_v45  ;;  %v7406_v31 = vld [vmem:[#allocation30_spill] sm:$0xff]  ;;  %v7408_v45 = vld [vmem:[#allocation39_spill] sm:$0xff] }
 0x1f9   : > { %v2568_v13 = vor.u32 1.1754944e-38, %v2567_v0  ;;  %v2575_v4 = vadd.f32 %v6228_v28, %v2574_v2  ;;  %vm2577_vm4 = vweird.f32 %v6228_v28  ;;  %3830 = vrcp.f32 %v6303_v47  ;;  %v2146_v2 = vld [vmem:[#allocation2 + $0x1a2] sm:$0xff] }
 0x1fa   : > { %v2582_v19 = vand.u32 2147483648, %v6181_v33  ;;  %3832 = vpow2.f32 %v3556_v58  ;;  %v2102_v20 = vadd.f32 %v7401_v6, %v2005_v54  ;;  %v2198_v42 = vadd.f32 %v7402_v26, %v2101_v7 }
 0x1fb   : > { %v2569_v1 = vsel %vm2566_vm0, %v2568_v13, %v2564_v46  ;;  %vm2576_vm5 = vweird.f32 %v6181_v33  ;;  %v2580_v22 = vand.u32 2147483647, %v6181_v33  ;;  %v6328_v38 = vadd.f32 1.0, %v3827_v62  ;;  %v7410_v13 = vld [vmem:[#allocation28_spill] sm:$0xff] }
 0x1fc   : > { %vm6330_vm7 = vmor %vm2576_vm5, %vm2577_vm4  ;;  %v2017_v12 = vadd.f32 %v6270_v43, %v6264_v60  ;;  %v2082_v15 = vmul.f32 %v4320_v40, %v2049_v48  ;;  %v2176_v18 = vmul.f32 %v6023_v5, %v6187_v11  ;;  %v2203_v53 = vadd.f32 %v7406_v31, %v7405_v17  ;;  %v7407_v40 = vld [vmem:[#allocation46_spill] sm:$0xff] }
 0x1fd   : > { %v6341_v8 = vpop.eup %3828  ;;  %v2579_v33 = vsel %vm6330_vm7, %v6228_v28, %v2575_v4  ;;  %v2112_v0 = vadd.f32 %v2080_v29, %v6276_v34  ;;  %v2177_v60 = vmul.f32 %v6023_v5, %v6195_v55  ;;  %v2204_v43 = vadd.f32 %v7407_v40, %v2107_v32 }
 0x1fe   : > { %v2583_v44 = vor.u32 1.1754944e-38, %v2582_v19  ;;  %v6351_v11 = vmul.f32 %v2569_v1, %v7408_v45  ;;  %v2199_v54 = vadd.f32 %v7409_v16, %v2102_v20  ;;  %v6355_v37 = vadd.f32 %v6046_v9, %v2198_v42  ;;  %v7413_v20 = vld [vmem:[#allocation33_spill] sm:$0xff] }
 0x1ff   : > { %v6357_v7 = vpop.eup %3830  ;;  %vm2581_vm8 = vcmp.eq.f32.partialorder %v2580_v22, 8.507059e+37  ;;  %3834 = vrcp.f32 %v6328_v38  ;;  %v2113_v28 = vadd.f32 %v2081_v30, %v6278_v10  ;;  %v2178_v55 = vmul.f32 %v6023_v5, %v2145_v50 }
 0x200   : > { %v3833_v34 = vpop.eup %3832  ;;  %v2584_v29 = vsel %vm2581_vm8, %v2583_v44, %v2579_v33  ;;  %v2587_v32 = vmul.f32 %v6341_v8, %v6290_v14  ;;  %v2114_v58 = vadd.f32 %v2082_v15, %v2017_v12  ;;  %v2179_v41 = vmul.f32 %v6023_v5, %v2146_v2  ;;  %v7411_v5 = vld [vmem:[#allocation41_spill] sm:$0xff] }
 0x201   : > { %v2205_v25 = vadd.f32 %v2173_v49, %v2108_v27  ;;  %v2206_v62 = vadd.f32 %v2174_v63, %v2109_v24  ;;  %v2207_v46 = vadd.f32 %v2175_v23, %v2110_v57  ;;  %v6367_v4 = vadd.f32 %v6046_v9, %v7410_v13 }
 0x202   : > { %v6371_v10 = vsel %vm1289_vm2, %v6351_v11, 0.0  ;;  %v2602_v30 = vmul.f32 %v6357_v7, %v6303_v47  ;;  %v6376_v48 = vadd.f32 %v6046_v9, %v2199_v54  ;;  %v3557_v19 = vmul.f32 -1.442695, %v6355_v37 }
 0x203   : > { %v6380_v27 = vmul.f32 %v2584_v29, %v7411_v5  ;;  %v6382_v24 = vadd.f32 1.0, %v3833_v34  ;;  %v2208_v57 = vadd.f32 %v2176_v18, %v2111_v39  ;;  %v2209_v49 = vadd.f32 %v2177_v60, %v2112_v0 }
 0x204   : > { %v2588_v63 = vsub.f32 1.0, %v2587_v32  ;;  %v2210_v23 = vadd.f32 %v2178_v55, %v2113_v28  ;;  %v2211_v6 = vadd.f32 %v2179_v41, %v2114_v58  ;;  %v6386_v26 = vadd.f32 %v6046_v9, %v7413_v20 }
 0x205   : > { %7412 = vst [vmem:[#allocation40_spill] sm:$0xff] %v6380_v27  ;;  %v6388_v42 = vpop.eup %3834  ;;  %v6391_v1 = vadd.f32 %v6046_v9, %v2203_v53  ;;  %v6394_v22 = vadd.f32 %v6046_v9, %v2204_v43  ;;  %v6397_v52 = vadd.f32 %v6046_v9, %v2205_v25  ;;  %v6400_v39 = vadd.f32 %v6046_v9, %v2206_v62 }
 0x206   : > { %v2603_v12 = vsub.f32 1.0, %v2602_v30  ;;  %v6403_v15 = vadd.f32 %v6046_v9, %v2207_v46  ;;  %3836 = vpow2.f32 %v3557_v19  ;;  %v3558_v50 = vmul.f32 -1.442695, %v6376_v48 }
 0x207   : > { %v2595_v18 = vand.u32 2147483647, %v6290_v14  ;;  %3838 = vrcp.f32 %v6382_v24  ;;  %v6409_v17 = vadd.f32 %v6046_v9, %v2208_v57  ;;  %v3560_v31 = vmul.f32 -1.442695, %v6367_v4 }
 0x208   : > { %v2589_v53 = vmul.f32 %v6341_v8, %v2588_v63  ;;  %v6414_v33 = vadd.f32 %v6046_v9, %v2209_v49  ;;  %v3561_v0 = vmul.f32 -1.442695, %v6386_v26  ;;  %v2617_v2 = vmul.f32 %v6388_v42, %v6328_v38 }
 0x209   : > { %vm2591_vm9 = vweird.f32 %v6290_v14  ;;  %v6421_v60 = vadd.f32 %v6046_v9, %v2210_v23  ;;  %v6424_v40 = vadd.f32 %v6046_v9, %v2211_v6  ;;  %v3562_v43 = vmul.f32 -1.442695, %v6391_v1 }
 0x20a   : > { %v2597_v44 = vand.u32 2147483648, %v6290_v14  ;;  %v2604_v45 = vmul.f32 %v6357_v7, %v2603_v12  ;;  %3840 = vpow2.f32 %v3558_v50  ;;  %v3563_v16 = vmul.f32 -1.442695, %v6394_v22 }
 0x20b   : > { %vm6430_vm6 = vcmp.eq.f32.partialorder %v2595_v18, 8.507059e+37  ;;  %3842 = vpow2.f32 %v3560_v31  ;;  %v3564_v28 = vmul.f32 -1.442695, %v6397_v52  ;;  %v3565_v55 = vmul.f32 -1.442695, %v6400_v39 }
 0x20c   : > { %v3837_v9 = vpop.eup %3836  ;;  %v2590_v34 = vadd.f32 %v6341_v8, %v2589_v53  ;;  %vm2592_vm3 = vweird.f32 %v6341_v8  ;;  %3844 = vpow2.f32 %v3561_v0  ;;  %v2618_v29 = vsub.f32 1.0, %v2617_v2 }
 0x20d   : > { %v6438_v32 = vpop.eup %3838  ;;  %v2610_v58 = vand.u32 2147483647, %v6303_v47  ;;  %v2612_v41 = vand.u32 2147483648, %v6303_v47  ;;  %3846 = vpow2.f32 %v3562_v43  ;;  %v3566_v25 = vmul.f32 -1.442695, %v6403_v15  ;;  %vm6448_vm11 = vmor %vm2591_vm9, %vm2592_vm3 }
 0x20e   : > { %v2605_v62 = vadd.f32 %v6357_v7, %v2604_v45  ;;  %vm2607_vm10 = vweird.f32 %v6357_v7  ;;  %3848 = vpow2.f32 %v3563_v16  ;;  %v3567_v46 = vmul.f32 -1.442695, %v6409_v17 }
 0x20f   : > { %vm2606_vm12 = vweird.f32 %v6303_v47  ;;  %3850 = vpow2.f32 %v3564_v28  ;;  %v3568_v30 = vmul.f32 -1.442695, %v6414_v33  ;;  %v6454_v19 = vadd.f32 1.0, %v3837_v9 }
 0x210   : > { %v3841_v5 = vpop.eup %3840  ;;  %v2594_v57 = vsel %vm6448_vm11, %v6341_v8, %v2590_v34  ;;  %3852 = vpow2.f32 %v3565_v55  ;;  %v2619_v49 = vmul.f32 %v6388_v42, %v2618_v29  ;;  %v2632_v14 = vmul.f32 %v6438_v32, %v6382_v24  ;;  %vm6464_vm13 = vmor %vm2606_vm12, %vm2607_vm10 }
 0x211   : > { %v3843_v63 = vpop.eup %3842  ;;  %v2598_v23 = vor.u32 1.1754944e-38, %v2597_v44  ;;  %vm6468_vm14 = vcmp.eq.f32.partialorder %v2610_v58, 8.507059e+37  ;;  %3854 = vpow2.f32 %v3566_v25  ;;  %v3569_v8 = vmul.f32 -1.442695, %v6421_v60 }
 0x212   : > { %v3845_v20 = vpop.eup %3844  ;;  %v2609_v12 = vsel %vm6464_vm13, %v6357_v7, %v2605_v62  ;;  %v2613_v50 = vor.u32 1.1754944e-38, %v2612_v41  ;;  %3856 = vpow2.f32 %v3567_v46  ;;  %v3570_v18 = vmul.f32 -1.442695, %v6424_v40  ;;  %v7426_v62 = vld [vmem:[#allocation29_spill] sm:$0xff] }
 0x213   : > { %v3847_v31 = vpop.eup %3846  ;;  %v2599_v53 = vsel %vm6430_vm6, %v2598_v23, %v2594_v57  ;;  %v6479_v0 = vadd.f32 1.0, %v3841_v5  ;;  %vm2622_vm15 = vweird.f32 %v6388_v42  ;;  %3858 = vrcp.f32 %v6454_v19 }
 0x214   : > { %v3849_v2 = vpop.eup %3848  ;;  %3860 = vpow2.f32 %v3568_v30  ;;  %v6483_v43 = vadd.f32 1.0, %v3843_v63  ;;  %v2620_v7 = vadd.f32 %v6388_v42, %v2619_v49  ;;  %v2633_v44 = vsub.f32 1.0, %v2632_v14 }
 0x215   : > { %v3851_v45 = vpop.eup %3850  ;;  %v2614_v16 = vsel %vm6468_vm14, %v2613_v50, %v2609_v12  ;;  %3862 = vpow2.f32 %v3569_v8  ;;  %v6488_v54 = vadd.f32 1.0, %v3845_v20  ;;  %v2627_v28 = vand.u32 2147483648, %v6328_v38 }
 0x216   : > { %v3853_v55 = vpop.eup %3852  ;;  %v6492_v9 = vmul.f32 %v2599_v53, %v6220_v21  ;;  %3864 = vpow2.f32 %v3570_v18  ;;  %vm2621_vm0 = vweird.f32 %v6328_v38  ;;  %v2625_v34 = vand.u32 2147483647, %v6328_v38  ;;  %v7425_v21 = vld [vmem:[#allocation25_spill] sm:$0xff] }
 0x217   : > { %v3855_v29 = vpop.eup %3854  ;;  %v2910_v58 = vadd.f32 %v6255_v61, %v6211_v35  ;;  %v2913_v41 = vsel %vm1289_vm2, %v6380_v27, 0.0  ;;  %vm6502_vm4 = vmor %vm2621_vm0, %vm2622_vm15  ;;  %3866 = vrcp.f32 %v6479_v0  ;;  %v2677_v46 = vmul.f32 %v7426_v62, %v7425_v21 }
 0x218   : > { %7422 = vst [vmem:[#allocation6_spill] sm:$0xff] %v6492_v9  ;;  %v3857_v13 = vpop.eup %3856  ;;  %v6510_v38 = vmul.f32 %v2614_v16, %v6232_v36  ;;  %v2624_v35 = vsel %vm6502_vm4, %v6388_v42, %v2620_v7  ;;  %v2634_v61 = vmul.f32 %v6438_v32, %v2633_v44  ;;  %3868 = vrcp.f32 %v6483_v43 }
 0x219   : > { %v6517_v30 = vpop.eup %3858  ;;  %v2912_v5 = vadd.f32 %v6371_v10, %v2910_v58  ;;  %v6520_v57 = vadd.f32 1.0, %v3847_v31  ;;  %v2628_v49 = vor.u32 1.1754944e-38, %v2627_v28  ;;  %3870 = vrcp.f32 %v6488_v54 }
 0x21a   : > { %7427 = vst [vmem:[#allocation7_spill] sm:$0xff] %v6510_v38  ;;  %v3861_v14 = vpop.eup %3860  ;;  %v2915_v36 = vsel %vm1289_vm2, %v6492_v9, 0.0  ;;  %v6525_v63 = vadd.f32 1.0, %v3849_v2  ;;  %vm2626_vm5 = vcmp.eq.f32.partialorder %v2625_v34, 8.507059e+37  ;;  %v6527_v47 = vadd.f32 1.0, %v3851_v45 }
 0x21b   : > { %v3863_v42 = vpop.eup %3862  ;;  %v2914_v23 = vadd.f32 %v2913_v41, %v2912_v5  ;;  %v6529_v6 = vsel %vm2626_vm5, %v2628_v49, %v2624_v35  ;;  %vm2637_vm7 = vweird.f32 %v6438_v32  ;;  %v2917_v8 = vsel %vm1289_vm2, %v6510_v38, 0.0 }
 0x21c   : > { %v3865_v10 = vpop.eup %3864  ;;  %v2635_v20 = vadd.f32 %v6438_v32, %v2634_v61  ;;  %v2647_v12 = vmul.f32 %v6517_v30, %v6454_v19  ;;  %v2678_v50 = vsub.f32 1.0, %v2677_v46  ;;  %v2640_v53 = vand.u32 2147483647, %v6382_v24 }
 0x21d   : > { %v6537_v18 = vpop.eup %3866  ;;  %v2916_v31 = vadd.f32 %v2915_v36, %v2914_v23  ;;  %v2642_v2 = vand.u32 2147483648, %v6382_v24  ;;  %3872 = vrcp.f32 %v6520_v57  ;;  %v6544_v44 = vadd.f32 1.0, %v3853_v55 }
 0x21e   : > { %v6542_v7 = vpop.eup %3868  ;;  %v6546_v45 = vadd.f32 1.0, %v3855_v29  ;;  %vm2636_vm8 = vweird.f32 %v6382_v24  ;;  %3874 = vrcp.f32 %v6525_v63  ;;  %v6554_v34 = vadd.f32 1.0, %v3857_v13 }
 0x21f   : > { %v6550_v16 = vpop.eup %3870  ;;  %v6552_v28 = vadd.f32 %v2917_v8, %v2916_v31  ;;  %v6556_v58 = vadd.f32 1.0, %v3861_v14  ;;  %vm6560_vm9 = vmor %vm2636_vm8, %vm2637_vm7  ;;  %v2657_v55 = vand.u32 2147483648, %v6454_v19  ;;  %v2648_v29 = vsub.f32 1.0, %v2647_v12 }
 0x220   : > { %v2639_v24 = vsel %vm6560_vm9, %v6438_v32, %v2635_v20  ;;  %v2662_v25 = vmul.f32 %v6537_v18, %v6479_v0  ;;  %v2679_v46 = vmul.f32 %v7426_v62, %v2678_v50  ;;  %v6571_v13 = vadd.f32 1.0, %v3863_v42 }
 0x221   : > { %vm2641_vm6 = vcmp.eq.f32.partialorder %v2640_v53, 8.507059e+37  ;;  %v2643_v35 = vor.u32 1.1754944e-38, %v2642_v2  ;;  %v2692_v61 = vmul.f32 %v6542_v7, %v6483_v43  ;;  %v6575_v5 = vadd.f32 1.0, %v3865_v10 }
 0x222   : > { %v2655_v49 = vand.u32 2147483647, %v6454_v19  ;;  %v2672_v14 = vand.u32 2147483648, %v6479_v0  ;;  %v2707_v32 = vmul.f32 %v6550_v16, %v6488_v54  ;;  %vm2651_vm3 = vweird.f32 %v6454_v19 }
 0x223   : > { %v6581_v36 = vpop.eup %3872  ;;  %v6583_v23 = vsel %vm2641_vm6, %v2643_v35, %v2639_v24  ;;  %v2658_v42 = vor.u32 1.1754944e-38, %v2657_v55  ;;  %v2670_v8 = vand.u32 2147483647, %v6479_v0  ;;  %v2649_v10 = vmul.f32 %v6517_v30, %v2648_v29 }
 0x224   : > { %v6587_v20 = vpop.eup %3874  ;;  %v2663_v12 = vsub.f32 1.0, %v2662_v25  ;;  %v2680_v50 = vadd.f32 %v7426_v62, %v2679_v46  ;;  %vm2682_vm10 = vweird.f32 %v7426_v62  ;;  %vm2681_vm11 = vweird.f32 %v7425_v21 }
 0x225   : > { %v2685_v31 = vand.u32 2147483647, %v7425_v21  ;;  %v2687_v53 = vand.u32 2147483648, %v7425_v21  ;;  %v2693_v2 = vsub.f32 1.0, %v2692_v61  ;;  %vm6595_vm12 = vcmp.eq.f32.partialorder %v2655_v49, 8.507059e+37  ;;  %vm6606_vm15 = vmor %vm2681_vm11, %vm2682_vm10 }
 0x226   : > { %vm2666_vm13 = vweird.f32 %v6479_v0  ;;  %v6600_v55 = vor.u32 1.1754944e-38, %v2672_v14  ;;  %v2708_v24 = vsub.f32 1.0, %v2707_v32  ;;  %v2722_v29 = vmul.f32 %v6581_v36, %v6520_v57 }
 0x227   : > { %3876 = vrcp.f32 %v6527_v47  ;;  %vm2652_vm14 = vweird.f32 %v6517_v30  ;;  %v2700_v21 = vand.u32 2147483647, %v6483_v43  ;;  %v2702_v46 = vand.u32 2147483648, %v6483_v43 }
 0x228   : > { %v2737_v35 = vmul.f32 %v6587_v20, %v6525_v63  ;;  %v2650_v61 = vadd.f32 %v6517_v30, %v2649_v10  ;;  %v2664_v49 = vmul.f32 %v6537_v18, %v2663_v12  ;;  %v2684_v14 = vsel %vm6606_vm15, %v7426_v62, %v2680_v50  ;;  %vm6633_vm9 = vmor %vm2651_vm3, %vm2652_vm14 }
 0x229   : > { %v2715_v32 = vand.u32 2147483647, %v6488_v54  ;;  %vm2686_vm0 = vcmp.eq.f32.partialorder %v2685_v31, 8.507059e+37  ;;  %v2688_v38 = vor.u32 1.1754944e-38, %v2687_v53  ;;  %v2694_v9 = vmul.f32 %v6542_v7, %v2693_v2 }
 0x22a   : > { %vm2696_vm4 = vweird.f32 %v6483_v43  ;;  %vm2667_vm5 = vweird.f32 %v6537_v18  ;;  %vm6623_vm7 = vcmp.eq.f32.partialorder %v2670_v8, 8.507059e+37  ;;  %v2709_v10 = vmul.f32 %v6550_v16, %v2708_v24 }
 0x22b   : > { %vm2711_vm8 = vweird.f32 %v6488_v54  ;;  %v2723_v12 = vsub.f32 1.0, %v2722_v29  ;;  %v6637_v50 = vsel %vm2686_vm0, %v2688_v38, %v2684_v14  ;;  %vm6639_vm6 = vcmp.eq.f32.partialorder %v2700_v21, 8.507059e+37  ;;  %vm6670_vm15 = vmor %vm2666_vm13, %vm2667_vm5 }
 0x22c   : > { %v2703_v31 = vor.u32 1.1754944e-38, %v2702_v46  ;;  %v2717_v53 = vand.u32 2147483648, %v6488_v54  ;;  %v2738_v2 = vsub.f32 1.0, %v2737_v35  ;;  %v2654_v19 = vsel %vm6633_vm9, %v6517_v30, %v2650_v61 }
 0x22d   : > { %v6644_v24 = vpop.eup %3876  ;;  %v2665_v29 = vadd.f32 %v6537_v18, %v2664_v49  ;;  %vm6650_vm3 = vcmp.eq.f32.partialorder %v2715_v32, 8.507059e+37  ;;  %vm2726_vm10 = vweird.f32 %v6520_v57  ;;  %v2730_v38 = vand.u32 2147483647, %v6520_v57 }
 0x22e   : > { %v2695_v21 = vadd.f32 %v6542_v7, %v2694_v9  ;;  %vm2697_vm11 = vweird.f32 %v6542_v7  ;;  %v2732_v46 = vand.u32 2147483648, %v6520_v57  ;;  %3878 = vrcp.f32 %v6544_v44 }
 0x22f   : > { %v2710_v30 = vadd.f32 %v6550_v16, %v2709_v10  ;;  %vm2712_vm14 = vweird.f32 %v6550_v16  ;;  %v2724_v35 = vmul.f32 %v6581_v36, %v2723_v12  ;;  %3880 = vrcp.f32 %v6546_v45 }
 0x230   : > { %v2659_v61 = vsel %vm6595_vm12, %v2658_v42, %v2654_v19  ;;  %v2718_v49 = vor.u32 1.1754944e-38, %v2717_v53  ;;  %v2739_v14 = vmul.f32 %v6587_v20, %v2738_v2  ;;  %v2752_v32 = vmul.f32 %v6644_v24, %v6527_v47  ;;  %vm6682_vm12 = vmor %vm2696_vm4, %vm2697_vm11 }
 0x231   : > { %v2669_v10 = vsel %vm6670_vm15, %v6537_v18, %v2665_v29  ;;  %vm6686_vm13 = vcmp.eq.f32.partialorder %v2730_v38, 8.507059e+37  ;;  %v2745_v41 = vand.u32 2147483647, %v6525_v63  ;;  %v2747_v12 = vand.u32 2147483648, %v6525_v63  ;;  %vm6700_vm0 = vmor %vm2711_vm8, %vm2712_vm14 }
 0x232   : > { %3882 = vrcp.f32 %v6554_v34  ;;  %v2699_v18 = vsel %vm6682_vm12, %v6542_v7, %v2695_v21  ;;  %v2733_v62 = vor.u32 1.1754944e-38, %v2732_v46  ;;  %vm2741_vm4 = vweird.f32 %v6525_v63 }
 0x233   : > { %v2762_v53 = vand.u32 2147483648, %v6527_v47  ;;  %v2714_v2 = vsel %vm6700_vm0, %v6550_v16, %v2710_v30  ;;  %v2725_v19 = vadd.f32 %v6581_v36, %v2724_v35  ;;  %vm2727_vm5 = vweird.f32 %v6581_v36 }
 0x234   : > { %3884 = vrcp.f32 %v6556_v58  ;;  %v6712_v54 = vpop.eup %3878  ;;  %v2674_v7 = vsel %vm6623_vm7, %v6600_v55, %v2669_v10  ;;  %v2740_v29 = vadd.f32 %v6587_v20, %v2739_v14  ;;  %vm2742_vm8 = vweird.f32 %v6587_v20  ;;  %vm6736_vm7 = vmor %vm2726_vm10, %vm2727_vm5 }
 0x235   : > { %v2753_v38 = vsub.f32 1.0, %v2752_v32  ;;  %v6719_v21 = vpop.eup %3880  ;;  %v6723_v16 = vsel %vm6639_vm6, %v2703_v31, %v2699_v18  ;;  %vm6725_vm9 = vcmp.eq.f32.partialorder %v2745_v41, 8.507059e+37  ;;  %v2748_v30 = vor.u32 1.1754944e-38, %v2747_v12 }
 0x236   : > { %v2760_v35 = vand.u32 2147483647, %v6527_v47  ;;  %v6732_v27 = vsel %vm6650_vm3, %v2718_v49, %v2714_v2  ;;  %vm2756_vm6 = vweird.f32 %v6527_v47  ;;  %v6741_v8 = vor.u32 1.1754944e-38, %v2762_v53  ;;  %vm6754_vm3 = vmor %vm2741_vm4, %vm2742_vm8 }
 0x237   : > { %v2777_v31 = vand.u32 2147483648, %v6544_v44  ;;  %3886 = vrcp.f32 %v6571_v13  ;;  %v2729_v25 = vsel %vm6736_vm7, %v6581_v36, %v2725_v19  ;;  %v2767_v49 = vmul.f32 %v6712_v54, %v6544_v44 }
 0x238   : > { %v6745_v9 = vpop.eup %3882  ;;  %v2775_v14 = vand.u32 2147483647, %v6544_v44  ;;  %v2790_v32 = vand.u32 2147483647, %v6546_v45  ;;  %v2744_v10 = vsel %vm6754_vm3, %v6587_v20, %v2740_v29  ;;  %v2754_v36 = vmul.f32 %v6644_v24, %v2753_v38 }
 0x239   : > { %v2782_v63 = vmul.f32 %v6719_v21, %v6546_v45  ;;  %3888 = vrcp.f32 %v6575_v5  ;;  %vm2757_vm10 = vweird.f32 %v6644_v24  ;;  %v2792_v41 = vand.u32 2147483648, %v6546_v45 }
 0x23a   : > { %v6769_v42 = vpop.eup %3884  ;;  %v6775_v12 = vmul.f32 %v6529_v6, %v6235_v56  ;;  %v6779_v20 = vmul.f32 %v6583_v23, %v6288_v59  ;;  %v6783_v18 = vsel %vm6686_vm13, %v2733_v62, %v2729_v25  ;;  %vm6785_vm11 = vcmp.eq.f32.partialorder %v2760_v35, 8.507059e+37  ;;  %vm6829_vm0 = vmor %vm2756_vm6, %vm2757_vm10 }
 0x23b   : > { %v6789_v53 = vor.u32 1.1754944e-38, %v2777_v31  ;;  %v2797_v2 = vmul.f32 %v6745_v9, %v6554_v34  ;;  %v2807_v56 = vand.u32 2147483648, %v6554_v34  ;;  %v6796_v6 = vsel %vm6725_vm9, %v2748_v30, %v2744_v10 }
 0x23c   : > { %v2768_v59 = vsub.f32 1.0, %v2767_v49  ;;  %v2805_v23 = vand.u32 2147483647, %v6554_v34  ;;  %v6800_v0 = vmul.f32 %v2659_v61, %v6355_v37  ;;  %v2755_v19 = vadd.f32 %v6644_v24, %v2754_v36 }
 0x23d   : > { %v6802_v62 = vpop.eup %3886  ;;  %vm2772_vm14 = vweird.f32 %v6712_v54  ;;  %v2783_v29 = vsub.f32 1.0, %v2782_v63  ;;  %v2812_v38 = vmul.f32 %v6769_v42, %v6556_v58  ;;  %vm2771_vm15 = vweird.f32 %v6544_v44 }
 0x23e   : > { %v6809_v46 = vor.u32 1.1754944e-38, %v2792_v41  ;;  %v6812_v30 = vmul.f32 %v2674_v7, %v6376_v48  ;;  %v2919_v37 = vsel %vm1289_vm2, %v6775_v12, 0.0  ;;  %v2921_v61 = vsel %vm1289_vm2, %v6779_v20, 0.0 }
 0x23f   : > { %v6818_v35 = vpop.eup %3888  ;;  %vm2786_vm12 = vweird.f32 %v6546_v45  ;;  %vm2787_vm13 = vweird.f32 %v6719_v21  ;;  %v2798_v55 = vsub.f32 1.0, %v2797_v2  ;;  %v6822_v31 = vor.u32 1.1754944e-38, %v2807_v56 }
 0x240   : > { %v2920_v25 = vadd.f32 %v2919_v37, %v6552_v28  ;;  %v2769_v7 = vmul.f32 %v6712_v54, %v2768_v59  ;;  %v2820_v57 = vand.u32 2147483647, %v6556_v58  ;;  %v2827_v49 = vmul.f32 %v6802_v62, %v6571_v13  ;;  %v7462_v59 = vld [vmem:[#allocation24_spill] sm:$0xff] }
 0x241   : > { %v2923_v10 = vsel %vm1289_vm2, %v6800_v0, 0.0  ;;  %v2759_v28 = vsel %vm6829_vm0, %v6644_v24, %v2755_v19  ;;  %v2784_v47 = vmul.f32 %v6719_v21, %v2783_v29  ;;  %vm2801_vm4 = vweird.f32 %v6554_v34  ;;  %vm6904_vm0 = vmor %vm2786_vm12, %vm2787_vm13 }
 0x242   : > { %v2813_v36 = vsub.f32 1.0, %v2812_v38  ;;  %v2922_v63 = vadd.f32 %v2921_v61, %v2920_v25  ;;  %vm6844_vm5 = vcmp.eq.f32.partialorder %v2775_v14, 8.507059e+37  ;;  %v2822_v2 = vand.u32 2147483648, %v6556_v58 }
 0x243   : > { %v2842_v56 = vmul.f32 %v6818_v35, %v6575_v5  ;;  %v6853_v37 = vmul.f32 %v6637_v50, %v7462_v59  ;;  %v2925_v24 = vsel %vm1289_vm2, %v6812_v30, 0.0  ;;  %v2799_v19 = vmul.f32 %v6745_v9, %v2798_v55 }
 0x244   : > { %vm2816_vm8 = vweird.f32 %v6556_v58  ;;  %vm2831_vm9 = vweird.f32 %v6571_v13  ;;  %v2835_v14 = vand.u32 2147483647, %v6571_v13  ;;  %v2924_v29 = vadd.f32 %v2923_v10, %v2922_v63 }
 0x245   : > { %v2764_v38 = vsel %vm6785_vm11, %v6741_v8, %v2759_v28  ;;  %v2770_v61 = vadd.f32 %v6712_v54, %v2769_v7  ;;  %vm6865_vm7 = vcmp.eq.f32.partialorder %v2790_v32, 8.507059e+37  ;;  %v2828_v25 = vsub.f32 1.0, %v2827_v49  ;;  %vm6891_vm11 = vmor %vm2771_vm15, %vm2772_vm14 }
 0x246   : > { %v6871_v55 = vmul.f32 %v6723_v16, %v6367_v4  ;;  %v2785_v48 = vadd.f32 %v6719_v21, %v2784_v47  ;;  %vm2802_vm6 = vweird.f32 %v6745_v9  ;;  %v2814_v10 = vmul.f32 %v6769_v42, %v2813_v36 }
 0x247   : > { %v2926_v63 = vadd.f32 %v2925_v24, %v2924_v29  ;;  %vm6876_vm3 = vcmp.eq.f32.partialorder %v2805_v23, 8.507059e+37  ;;  %vm2817_vm10 = vweird.f32 %v6769_v42  ;;  %v2843_v32 = vsub.f32 1.0, %v2842_v56  ;;  %vm6931_vm12 = vmor %vm2801_vm4, %vm2802_vm6 }
 0x248   : > { %v6883_v43 = vmul.f32 %v6732_v27, %v6386_v26  ;;  %v2927_v4 = vsel %vm1289_vm2, %v6853_v37, 0.0  ;;  %v2800_v23 = vadd.f32 %v6745_v9, %v2799_v19  ;;  %v2823_v7 = vor.u32 1.1754944e-38, %v2822_v2  ;;  %vm6953_vm4 = vmor %vm2816_vm8, %vm2817_vm10 }
 0x249   : > { %v2837_v49 = vand.u32 2147483648, %v6571_v13  ;;  %v2928_v28 = vadd.f32 %v2927_v4, %v2926_v63  ;;  %v2774_v26 = vsel %vm6891_vm11, %v6712_v54, %v2770_v61  ;;  %vm6908_vm14 = vcmp.eq.f32.partialorder %v2820_v57, 8.507059e+37 }
 0x24a   : > { %v2829_v47 = vmul.f32 %v6802_v62, %v2828_v25  ;;  %v6915_v36 = vmul.f32 %v6783_v18, %v6391_v1  ;;  %v2929_v54 = vsel %vm1289_vm2, %v6871_v55, 0.0  ;;  %v2789_v45 = vsel %vm6904_vm0, %v6719_v21, %v2785_v48 }
 0x24b   : > { %v2815_v2 = vadd.f32 %v6769_v42, %v2814_v10  ;;  %vm6923_vm15 = vcmp.eq.f32.partialorder %v2835_v14, 8.507059e+37  ;;  %v2930_v56 = vadd.f32 %v2929_v54, %v2928_v28  ;;  %vm2832_vm13 = vweird.f32 %v6802_v62 }
 0x24c   : > { %v2844_v18 = vmul.f32 %v6818_v35, %v2843_v32  ;;  %v6939_v21 = vmul.f32 %v6796_v6, %v6394_v22  ;;  %v2931_v59 = vsel %vm1289_vm2, %v6883_v43, 0.0  ;;  %v2779_v24 = vsel %vm6844_vm5, %v6789_v53, %v2774_v26  ;;  %vm6971_vm5 = vmor %vm2831_vm9, %vm2832_vm13 }
 0x24d   : > { %v2804_v34 = vsel %vm6931_vm12, %v6745_v9, %v2800_v23  ;;  %v2838_v19 = vor.u32 1.1754944e-38, %v2837_v49  ;;  %v2932_v14 = vadd.f32 %v2931_v59, %v2930_v56  ;;  %v2830_v6 = vadd.f32 %v6802_v62, %v2829_v47 }
 0x24e   : > { %v6959_v29 = vmul.f32 %v2764_v38, %v6397_v52  ;;  %v2933_v53 = vsel %vm1289_vm2, %v6915_v36, 0.0  ;;  %v2794_v9 = vsel %vm6865_vm7, %v6809_v46, %v2789_v45  ;;  %v2819_v58 = vsel %vm6953_vm4, %v6769_v42, %v2815_v2 }
 0x24f   : > { %vm2846_vm8 = vweird.f32 %v6575_v5  ;;  %v2934_v52 = vadd.f32 %v2933_v53, %v2932_v14  ;;  %v2845_v38 = vadd.f32 %v6818_v35, %v2844_v18  ;;  %vm2847_vm6 = vweird.f32 %v6818_v35  ;;  %v2968_v53 = vld [vmem:[#allocation3] sm:$0x1] }
 0x250   : > { %v6979_v61 = vmul.f32 %v2779_v24, %v6400_v39  ;;  %v2935_v46 = vsel %vm1289_vm2, %v6939_v21, 0.0  ;;  %v2809_v13 = vsel %vm6876_vm3, %v6822_v31, %v2804_v34  ;;  %v2852_v42 = vand.u32 2147483648, %v6575_v5  ;;  %vm2848_vm9 = vmor %vm2846_vm8, %vm2847_vm6 }
 0x251   : > { %v2936_v50 = vadd.f32 %v2935_v46, %v2934_v52  ;;  %v3916_v25 = vmov 256.0   ;;  %v2834_v48 = vsel %vm6971_vm5, %v6802_v62, %v2830_v6  ;;  %v2850_v10 = vand.u32 2147483647, %v6575_v5 }
 0x252   : > { %3890 = vrcp.f32 %v3916_v25  ;;  %v6992_v39 = vmul.f32 %v2794_v9, %v6403_v15  ;;  %v2937_v63 = vsel %vm1289_vm2, %v6959_v29, 0.0  ;;  %v2824_v31 = vsel %vm6908_vm14, %v2823_v7, %v2819_v58  ;;  %v3012_v9 = vld [vmem:[%s7221_s7] sm:$0x1] }
 0x253   : > { %v2938_v8 = vadd.f32 %v2937_v63, %v2936_v50  ;;  %v2849_v32 = vsel %vm2848_vm9, %v6818_v35, %v2845_v38  ;;  %v7002_v4 = vmul.f32 %v2809_v13, %v6409_v17  ;;  %v2939_v62 = vsel %vm1289_vm2, %v6979_v61, 0.0 }
 0x254   : > { %v2839_v15 = vsel %vm6923_vm15, %v2838_v19, %v2834_v48  ;;  %v2853_v16 = vor.u32 1.1754944e-38, %v2852_v42  ;;  %vm2851_vm7 = vcmp.eq.f32.partialorder %v2850_v10, 8.507059e+37  ;;  %v7009_v7 = vmul.f32 %v2824_v31, %v6414_v33 }
 0x255   : > { %v2940_v23 = vadd.f32 %v2939_v62, %v2938_v8  ;;  %v2941_v5 = vsel %vm1289_vm2, %v6992_v39, 0.0  ;;  %v7014_v17 = vmul.f32 %v2839_v15, %v6421_v60  ;;  %v2943_v26 = vsel %vm1289_vm2, %v7002_v4, 0.0  ;;  %v3013_v15 = vld [vmem:[%s7222_s8] sm:$0x1] }
 0x256   : > { %v2854_v35 = vsel %vm2851_vm7, %v2853_v16, %v2849_v32  ;;  %v2945_v33 = vsel %vm1289_vm2, %v7009_v7, 0.0  ;;  %vm3018_vm10 = vcmask 1040384   ;;  %vm3014_vm12 = vcmask 7168   ;;  %v3112_v16 = vld [vmem:[%s7223_s9 + $0x8] sm:$0xf] }
 0x257   : > { %v2942_v28 = vadd.f32 %v2941_v5, %v2940_v23  ;;  %v7019_v27 = vmul.f32 %v2854_v35, %v6424_v40  ;;  %v2947_v45 = vsel %vm1289_vm2, %v7014_v17, 0.0  ;;  %3573 = vmatpush.msk.msra.mxu2 %vm3018_vm10, %v3012_v9  ;;  %v3122_v5 = vunpack.c.l.b16 %v3112_v16 }
 0x258   : > { %v3891_v49 = vpop.eup %3890  ;;  %vm3174_vm13 = vcmask 1043456  }
 0x259   : > { %v2944_v44 = vadd.f32 %v2943_v26, %v2942_v28  ;;  %v2958_v47 = vmul.f32 256.0, %v3891_v49  ;;  %v2949_v60 = vsel %vm1289_vm2, %v7019_v27, 0.0  ;;  %vm2962_vm3 = vweird.f32 %v3891_v49 }
 0x25a   : > { %v3124_v35 = vpack.c.b16 %v3122_v5, %v3122_v5 }
 0x25b   : > { %v2946_v54 = vadd.f32 %v2945_v33, %v2944_v44  ;;  %v2959_v57 = vsub.f32 1.0, %v2958_v47  ;;  %v3616_v44 = vld [vmem:[%s7223_s9] sm:$0xff] }
 0x25c   : > { %v3176_v26 = vsel %vm3174_vm13, %v3124_v35, 0  ;;  %v7490_v35 = vld [vmem:[#allocation49_spill] sm:$0xff] }
 0x25d   : > { %v2948_v2 = vadd.f32 %v2947_v45, %v2946_v54  ;;  %v2960_v18 = vmul.f32 %v3891_v49, %v2959_v57  ;;  %3184 = vmatpush.bf16.msrb.mxu2 %v3176_v26  ;;  %3618 = vmatpush.bf16.msra.mxu3 %v3176_v26 }
 0x25f   : > { %v2950_v56 = vadd.f32 %v2949_v60, %v2948_v2  ;;  %v2961_v40 = vadd.f32 %v3891_v49, %v2960_v18 }
 0x261   : > { %v2951_v1 = vrot.slane %v2950_v56, 4  ;;  %v2963_v14 = vsel %vm2962_vm3, %v3891_v49, %v2961_v40  ;;  %3185 = vmatpush.bf16.msrb.mxu2 %v3616_v44  ;;  %3619 = vmatpush.bf16.msra.mxu3 %v3616_v44 }
 0x263   : > { %v2952_v59 = vadd.f32 %v2951_v1, %v2950_v56 }
 0x265   : > { %v2953_v24 = vrot.slane %v2952_v59, 2 }
 0x267   : > { %v2954_v34 = vadd.f32 %v2953_v24, %v2952_v59 }
 0x269   : > { %v2955_v19 = vrot.slane %v2954_v34, 1 }
 0x26b   : > { %v2956_v22 = vadd.f32 %v2955_v19, %v2954_v34  ;;  %v7481_v34 = vld [vmem:[#allocation23_spill] sm:$0xff] }
 0x26d   : > { %v2964_v6 = vmul.f32 %v2963_v14, %v2956_v22  ;;  %v7482_v14 = vld [vmem:[#allocation22_spill] sm:$0xff] }
 0x26f   : > { %3571 = vmatmul.msk.f32.vlgmr.msrb.gmra.mxu1 %vm1289_vm2, %v2964_v6 }
 0x2ec   : > { %v2989_v58 = vpop.f32.mrf.mxu1 }
 0x2ed   : > { %v2990_v41 = vadd.f32 %v2989_v58, %v2968_v53 }
 0x2ef   : > { %v3572_v52 = vmul.f32 -1.442695, %v2990_v41 }
 0x2f1   : > { %3892 = vpow2.f32 %v3572_v52 }
 0x2f7   : > { %v3893_v38 = vpop.eup %3892 }
 0x2f8   : > { %v2995_v46 = vadd.f32 1.0, %v3893_v38  ;;  %v7484_v38 = vld [vmem:[#allocation27_spill] sm:$0xff] }
 0x2fa   : > { %3894 = vrcp.f32 %v2995_v46  ;;  %v3007_v25 = vand.u32 2147483648, %v2995_v46  ;;  %v3005_v10 = vand.u32 2147483647, %v2995_v46  ;;  %vm3001_vm0 = vweird.f32 %v2995_v46 }
 0x2fc   : > { %v3008_v31 = vor.u32 1.1754944e-38, %v3007_v25  ;;  %vm3006_vm15 = vcmp.eq.f32.partialorder %v3005_v10, 8.507059e+37 }
 0x300   : > { %v3895_v13 = vpop.eup %3894 }
 0x301   : > { %v2997_v42 = vmul.f32 %v3895_v13, %v2995_v46  ;;  %vm3002_vm11 = vweird.f32 %v3895_v13 }
 0x302   : > { %vm3003_vm14 = vmor %vm3001_vm0, %vm3002_vm11 }
 0x303   : > { %v2998_v50 = vsub.f32 1.0, %v2997_v42 }
 0x305   : > { %v2999_v48 = vmul.f32 %v3895_v13, %v2998_v50 }
 0x307   : > { %v3000_v63 = vadd.f32 %v3895_v13, %v2999_v48  ;;  %v7486_v48 = vld [vmem:[#allocation36_spill] sm:$0xff] }
 0x309   : > { %v3004_v8 = vsel %vm3003_vm14, %v3895_v13, %v3000_v63 }
 0x30a   : > { %v3009_v32 = vsel %vm3006_vm15, %v3008_v31, %v3004_v8 }
 0x30b   : > { %v3011_v62 = vmul.f32 %v3009_v32, %v2990_v41  ;;  %v7483_v41 = vld [vmem:[#allocation26_spill] sm:$0xff] }
 0x30d   : > { %3574 = vmatmul.msk.f32.vlgmr.msra.gmra.mxu2 %vm3014_vm12, %v3011_v62  ;;  %v7488_v62 = vld [vmem:[#allocation43_spill] sm:$0xff] }
 0x390   : > { %v3039_v23 = vpop.f32.mrf.mxu2 }
 0x391   : > { %v3040_v49 = vadd.f32 %v3039_v23, %v3013_v15 }
 0x393   : > { %v3575_v28 = vmul.f32 -1.442695, %v3040_v49 }
 0x395   : > { %3896 = vpow2.f32 %v3575_v28 }
 0x39b   : > { %v3897_v33 = vpop.eup %3896 }
 0x39c   : > { %v3045_v47 = vadd.f32 1.0, %v3897_v33 }
 0x39e   : > { %3898 = vrcp.f32 %v3045_v47  ;;  %v3057_v60 = vand.u32 2147483648, %v3045_v47  ;;  %v3055_v56 = vand.u32 2147483647, %v3045_v47  ;;  %vm3051_vm5 = vweird.f32 %v3045_v47 }
 0x3a0   : > { %v3058_v18 = vor.u32 1.1754944e-38, %v3057_v60  ;;  %vm3056_vm6 = vcmp.eq.f32.partialorder %v3055_v56, 8.507059e+37 }
 0x3a4   : > { %v3899_v54 = vpop.eup %3898 }
 0x3a5   : > { %v3047_v45 = vmul.f32 %v3899_v54, %v3045_v47  ;;  %vm3052_vm4 = vweird.f32 %v3899_v54 }
 0x3a6   : > { %vm3053_vm8 = vmor %vm3051_vm5, %vm3052_vm4 }
 0x3a7   : > { %v3048_v2 = vsub.f32 1.0, %v3047_v45 }
 0x3a9   : > { %v3049_v57 = vmul.f32 %v3899_v54, %v3048_v2 }
 0x3ab   : > { %v3050_v1 = vadd.f32 %v3899_v54, %v3049_v57 }
 0x3ad   : > { %v3054_v59 = vsel %vm3053_vm8, %v3899_v54, %v3050_v1 }
 0x3ae   : > { %v3059_v24 = vsel %vm3056_vm6, %v3058_v18, %v3054_v59  ;;  %v7493_v18 = vld [vmem:[#allocation7_spill] sm:$0xff] }
 0x3af   : > { %v3061_v40 = vperm.slane %v3059_v24, 0 }
 0x3b1   : > { %v3062_v19 = vmul.f32 %v3061_v40, %v7481_v34  ;;  %v3063_v22 = vmul.f32 %v3061_v40, %v7482_v14  ;;  %v3078_v6 = vmul.f32 %v3061_v40, %v6775_v12  ;;  %v3079_v53 = vmul.f32 %v3061_v40, %v6779_v20  ;;  %v7485_v12 = vld [vmem:[#allocation35_spill] sm:$0xff]  ;;  %v7093_v14 = vld [vmem:[%s7224_s10] ss:$0 sm:$0xff] }
 0x3b2   : > { %v3064_v52 = vmul.f32 %v3061_v40, %v7483_v41  ;;  %v3065_v46 = vmul.f32 %v3061_v40, %v7484_v38  ;;  %v3080_v13 = vmul.f32 %v3061_v40, %v6800_v0  ;;  %v3081_v42 = vmul.f32 %v3061_v40, %v6812_v30  ;;  %v7487_v0 = vld [vmem:[#allocation42_spill] sm:$0xff] }
 0x3b3   : > { %v3094_v9 = vpack.c.bf16 %v3063_v22, %v3062_v19  ;;  %v3102_v58 = vpack.c.bf16 %v3079_v53, %v3078_v6  ;;  %v3066_v20 = vmul.f32 %v3061_v40, %v7485_v12  ;;  %v3067_v10 = vmul.f32 %v3061_v40, %v7486_v48  ;;  %v392_v12 = vld [vmem:[%s3997_s25 + $0x8] sm:$0xff]  }
 0x3b4   : > { %v3095_v50 = vpack.c.bf16 %v3065_v46, %v3064_v52  ;;  %v3103_v25 = vpack.c.bf16 %v3081_v42, %v3080_v13  ;;  %v3082_v63 = vmul.f32 %v3061_v40, %v6853_v37  ;;  %v3083_v31 = vmul.f32 %v3061_v40, %v6871_v55  ;;  %v7489_v37 = vld [vmem:[#allocation48_spill] sm:$0xff] }
 0x3b5   : > { %3580 = vmatmul.msk.bf16.vlgmr.msrb.gmra.mxu2 %vm1289_vm2, %v3094_v9  ;;  %3588 = vmatmul.msk.bf16.vlgmr.msra.gmra.mxu3 %vm1289_vm2, %v3102_v58  ;;  %v3096_v8 = vpack.c.bf16 %v3067_v10, %v3066_v20  ;;  %v3068_v30 = vmul.f32 %v3061_v40, %v7487_v0  ;;  %v3069_v15 = vmul.f32 %v3061_v40, %v7488_v62  ;;  %v408_v20 = vld [vmem:[%s3997_s25 + $0x48] sm:$0xff]   ;;  %v3269_v48 = vunpack.c.l.bf16 %v392_v12 }
 0x3b6   : > { %v3104_v32 = vpack.c.bf16 %v3083_v31, %v3082_v63  ;;  %v3084_v16 = vmul.f32 %v3061_v40, %v6883_v43  ;;  %v3085_v23 = vmul.f32 %v3061_v40, %v6915_v36  ;;  %v3070_v55 = vmul.f32 %v3061_v40, %v7489_v37 }
 0x3b7   : > { %v3097_v5 = vpack.c.bf16 %v3069_v15, %v3068_v30  ;;  %v3071_v28 = vmul.f32 %v3061_v40, %v7490_v35  ;;  %v3086_v26 = vmul.f32 %v3061_v40, %v6939_v21  ;;  %v3087_v44 = vmul.f32 %v3061_v40, %v6959_v29  ;;  %v7491_v29 = vld [vmem:[#allocation40_spill] sm:$0xff] }
 0x3b8   : > { %v3105_v49 = vpack.c.bf16 %v3085_v23, %v3084_v16  ;;  %v3072_v43 = vmul.f32 %v3061_v40, %v6151_v3  ;;  %v3073_v36 = vmul.f32 %v3061_v40, %v6208_v51  ;;  %v3088_v54 = vmul.f32 %v3061_v40, %v6979_v61  ;;  %v394_v35 = vld [vmem:[%s3997_s25 + $0x10] sm:$0xff]  }
 0x3b9   : > { %v3098_v33 = vpack.c.bf16 %v3071_v28, %v3070_v55  ;;  %v3106_v47 = vpack.c.bf16 %v3087_v44, %v3086_v26  ;;  %v3089_v45 = vmul.f32 %v3061_v40, %v6992_v39  ;;  %v3074_v21 = vmul.f32 %v3061_v40, %v6351_v11  ;;  %v7492_v39 = vld [vmem:[#allocation6_spill] sm:$0xff]  ;;  %v410_v28 = vld [vmem:[%s3997_s25 + $0x50] sm:$0xff]  }
 0x3ba   : > { %v3099_v2 = vpack.c.bf16 %v3073_v36, %v3072_v43  ;;  %v3075_v57 = vmul.f32 %v3061_v40, %v7491_v29  ;;  %v3090_v3 = vmul.f32 %v3061_v40, %v7002_v4  ;;  %v3091_v51 = vmul.f32 %v3061_v40, %v7009_v7  ;;  %v390_v4 = vld [vmem:[%s3997_s25] sm:$0xff]  }
 0x3bb   : > { %v3107_v60 = vpack.c.bf16 %v3089_v45, %v3088_v54  ;;  %v3076_v1 = vmul.f32 %v3061_v40, %v7492_v39  ;;  %v3077_v59 = vmul.f32 %v3061_v40, %v7493_v18  ;;  %v3092_v11 = vmul.f32 %v3061_v40, %v7014_v17  ;;  %v406_v7 = vld [vmem:[%s3997_s25 + $0x40] sm:$0xff]   ;;  %v412_v39 = vld [vmem:[%s3997_s25 + $0x58] sm:$0xff]  }
 0x3bc   : > { %v3100_v61 = vpack.c.bf16 %v3075_v57, %v3074_v21  ;;  %v3108_v56 = vpack.c.bf16 %v3091_v51, %v3090_v3  ;;  %v3093_v24 = vmul.f32 %v3061_v40, %v7019_v27  ;;  %v3267_v22 = vunpack.c.l.bf16 %v390_v4 }
 0x3bd   : > { %v3101_v34 = vpack.c.bf16 %v3077_v59, %v3076_v1  ;;  %v3283_v6 = vunpack.c.l.bf16 %v406_v7  ;;  %v3268_v41 = vunpack.c.h.bf16 %v390_v4  ;;  %v3284_v52 = vunpack.c.h.bf16 %v406_v7 }
 0x3be   : > { %v3109_v19 = vpack.c.bf16 %v3093_v24, %v3092_v11  ;;  %v3285_v10 = vunpack.c.l.bf16 %v408_v20  ;;  %v3270_v62 = vunpack.c.h.bf16 %v392_v12  ;;  %v3286_v15 = vunpack.c.h.bf16 %v408_v20 }
 0x3bf   : > { %v3271_v26 = vunpack.c.l.bf16 %v394_v35  ;;  %v3287_v44 = vunpack.c.l.bf16 %v410_v28  ;;  %v3289_v18 = vunpack.c.l.bf16 %v412_v39 }
 0x3c5   : > { %3581 = vmatmul.msk.bf16.gmra.mxu2 %vm1289_vm2, %v3095_v50  ;;  %3589 = vmatmul.msk.bf16.gmra.mxu3 %vm1289_vm2, %v3103_v25 }
 0x3d5   : > { %3582 = vmatmul.msk.bf16.gmra.mxu2 %vm1289_vm2, %v3096_v8  ;;  %3590 = vmatmul.msk.bf16.gmra.mxu3 %vm1289_vm2, %v3104_v32 }
 0x3e5   : > { %3583 = vmatmul.msk.bf16.gmra.mxu2 %vm1289_vm2, %v3097_v5  ;;  %3591 = vmatmul.msk.bf16.gmra.mxu3 %vm1289_vm2, %v3105_v49 }
 0x3f5   : > { %3584 = vmatmul.msk.bf16.gmra.mxu2 %vm1289_vm2, %v3098_v33  ;;  %3592 = vmatmul.msk.bf16.gmra.mxu3 %vm1289_vm2, %v3106_v47 }
 0x405   : > { %3585 = vmatmul.msk.bf16.gmra.mxu2 %vm1289_vm2, %v3099_v2  ;;  %3593 = vmatmul.msk.bf16.gmra.mxu3 %vm1289_vm2, %v3107_v60  ;;  %v3272_v2 = vunpack.c.h.bf16 %v394_v35  ;;  %v3288_v60 = vunpack.c.h.bf16 %v410_v28 }
 0x415   : > { %3586 = vmatmul.msk.bf16.gmra.mxu2 %vm1289_vm2, %v3100_v61  ;;  %3594 = vmatmul.msk.bf16.gmra.mxu3 %vm1289_vm2, %v3108_v56  ;;  %v396_v56 = vld [vmem:[%s3997_s25 + $0x18] sm:$0xff]  }
 0x416   : > { %v3273_v1 = vunpack.c.l.bf16 %v396_v56  ;;  %v3274_v7 = vunpack.c.h.bf16 %v396_v56 }
 0x425   : > { %3587 = vmatmul.msk.bf16.gmra.mxu2 %vm1289_vm2, %v3101_v34  ;;  %3595 = vmatmul.msk.bf16.gmra.mxu3 %vm1289_vm2, %v3109_v19 }
 0x438   : > { %v3187_v53 = vpop.f32.mrf.mxu2  ;;  %v3227_v17 = vpop.f32.mrf.mxu3 }
 0x439   : > { %v3188_v27 = vadd.f32 %v7093_v14, %v3187_v53  ;;  %v3228_v40 = vadd.f32 %v7093_v14, %v3227_v17 }
 0x43b   : > { %v3299_v9 = vadd.f32 %v3267_v22, %v3188_v27  ;;  %v3315_v58 = vadd.f32 %v3283_v6, %v3228_v40  ;;  %v3290_v22 = vunpack.c.h.bf16 %v412_v39 }
 0x43d   : > { %3331 = vst.msk [vmem:[%s7101_s12] sm:$0xff] %vm507_vm1, %v3299_v9 }
 0x43e   : > { %3347 = vst.msk [vmem:[%s7101_s12 + $0x80] sm:$0xff] %vm507_vm1, %v3315_v58  ;;  %v398_v58 = vld [vmem:[%s3997_s25 + $0x20] sm:$0xff]  }
 0x43f   : > { %v3276_v20 = vunpack.c.h.bf16 %v398_v58 }
 0x440   : > { %v3189_v38 = vpop.f32.mrf.mxu2  ;;  %v3229_v46 = vpop.f32.mrf.mxu3 }
 0x441   : > { %v3190_v13 = vadd.f32 %v7093_v14, %v3189_v38  ;;  %v3230_v42 = vadd.f32 %v7093_v14, %v3229_v46 }
 0x443   : > { %v3300_v50 = vadd.f32 %v3268_v41, %v3190_v13  ;;  %v3316_v25 = vadd.f32 %v3284_v52, %v3230_v42  ;;  %v414_v41 = vld [vmem:[%s3997_s25 + $0x60] sm:$0xff]   ;;  %v3275_v52 = vunpack.c.l.bf16 %v398_v58 }
 0x444   : > { %v3291_v38 = vunpack.c.l.bf16 %v414_v41 }
 0x445   : > { %3332 = vst.msk [vmem:[%s7101_s12 + $0x8] sm:$0xff] %vm507_vm1, %v3300_v50 }
 0x446   : > { %3348 = vst.msk [vmem:[%s7101_s12 + $0x88] sm:$0xff] %vm507_vm1, %v3316_v25 }
 0x448   : > { %v3192_v63 = vpop.f32.mrf.mxu2  ;;  %v3232_v31 = vpop.f32.mrf.mxu3 }
 0x449   : > { %v3193_v8 = vadd.f32 %v7093_v14, %v3192_v63  ;;  %v3233_v32 = vadd.f32 %v7093_v14, %v3232_v31 }
 0x44b   : > { %v3301_v0 = vadd.f32 %v3269_v48, %v3193_v8  ;;  %v3317_v30 = vadd.f32 %v3285_v10, %v3233_v32  ;;  %v3292_v48 = vunpack.c.h.bf16 %v414_v41 }
 0x44d   : > { %3333 = vst.msk [vmem:[%s7101_s12 + $0x10] sm:$0xff] %vm507_vm1, %v3301_v0 }
 0x44e   : > { %3349 = vst.msk [vmem:[%s7101_s12 + $0x90] sm:$0xff] %vm507_vm1, %v3317_v30  ;;  %v400_v30 = vld [vmem:[%s3997_s25 + $0x28] sm:$0xff]  }
 0x44f   : > { %v3278_v28 = vunpack.c.h.bf16 %v400_v30 }
 0x450   : > { %v3194_v16 = vpop.f32.mrf.mxu2  ;;  %v3234_v23 = vpop.f32.mrf.mxu3 }
 0x451   : > { %v3195_v5 = vadd.f32 %v7093_v14, %v3194_v16  ;;  %v3235_v49 = vadd.f32 %v7093_v14, %v3234_v23 }
 0x453   : > { %v3302_v37 = vadd.f32 %v3270_v62, %v3195_v5  ;;  %v3318_v55 = vadd.f32 %v3286_v15, %v3235_v49  ;;  %v416_v62 = vld [vmem:[%s3997_s25 + $0x68] sm:$0xff]   ;;  %v3277_v15 = vunpack.c.l.bf16 %v400_v30 }
 0x454   : > { %v3293_v16 = vunpack.c.l.bf16 %v416_v62 }
 0x455   : > { %3334 = vst.msk [vmem:[%s7101_s12 + $0x18] sm:$0xff] %vm507_vm1, %v3302_v37 }
 0x456   : > { %3350 = vst.msk [vmem:[%s7101_s12 + $0x98] sm:$0xff] %vm507_vm1, %v3318_v55 }
 0x458   : > { %v3197_v33 = vpop.f32.mrf.mxu2  ;;  %v3237_v47 = vpop.f32.mrf.mxu3 }
 0x459   : > { %v3198_v43 = vadd.f32 %v7093_v14, %v3197_v33  ;;  %v3238_v36 = vadd.f32 %v7093_v14, %v3237_v47 }
 0x45b   : > { %v3303_v54 = vadd.f32 %v3271_v26, %v3198_v43  ;;  %v3319_v45 = vadd.f32 %v3287_v44, %v3238_v36  ;;  %v3294_v26 = vunpack.c.h.bf16 %v416_v62 }
 0x45d   : > { %3335 = vst.msk [vmem:[%s7101_s12 + $0x20] sm:$0xff] %vm507_vm1, %v3303_v54 }
 0x45e   : > { %3351 = vst.msk [vmem:[%s7101_s12 + $0xa0] sm:$0xff] %vm507_vm1, %v3319_v45  ;;  %v402_v45 = vld [vmem:[%s3997_s25 + $0x30] sm:$0xff]  }
 0x45f   : > { %v3280_v39 = vunpack.c.h.bf16 %v402_v45 }
 0x460   : > { %v3199_v21 = vpop.f32.mrf.mxu2  ;;  %v3239_v29 = vpop.f32.mrf.mxu3 }
 0x461   : > { %v3200_v57 = vadd.f32 %v7093_v14, %v3199_v21  ;;  %v3240_v3 = vadd.f32 %v7093_v14, %v3239_v29 }
 0x463   : > { %v3304_v51 = vadd.f32 %v3272_v2, %v3200_v57  ;;  %v3320_v61 = vadd.f32 %v3288_v60, %v3240_v3  ;;  %v418_v2 = vld [vmem:[%s3997_s25 + $0x70] sm:$0xff]   ;;  %v3279_v60 = vunpack.c.l.bf16 %v402_v45 }
 0x464   : > { %v3295_v21 = vunpack.c.l.bf16 %v418_v2 }
 0x465   : > { %3336 = vst.msk [vmem:[%s7101_s12 + $0x28] sm:$0xff] %vm507_vm1, %v3304_v51 }
 0x466   : > { %3352 = vst.msk [vmem:[%s7101_s12 + $0xa8] sm:$0xff] %vm507_vm1, %v3320_v61 }
 0x468   : > { %v3202_v59 = vpop.f32.mrf.mxu2  ;;  %v3242_v11 = vpop.f32.mrf.mxu3 }
 0x469   : > { %v3203_v24 = vadd.f32 %v7093_v14, %v3202_v59  ;;  %v3243_v34 = vadd.f32 %v7093_v14, %v3242_v11 }
 0x46b   : > { %v3305_v19 = vadd.f32 %v3273_v1, %v3203_v24  ;;  %v3321_v4 = vadd.f32 %v3289_v18, %v3243_v34  ;;  %v3296_v1 = vunpack.c.h.bf16 %v418_v2 }
 0x46d   : > { %3337 = vst.msk [vmem:[%s7101_s12 + $0x30] sm:$0xff] %vm507_vm1, %v3305_v19 }
 0x46e   : > { %3353 = vst.msk [vmem:[%s7101_s12 + $0xb0] sm:$0xff] %vm507_vm1, %v3321_v4  ;;  %v404_v4 = vld [vmem:[%s3997_s25 + $0x38] sm:$0xff]  }
 0x46f   : > { %v3282_v41 = vunpack.c.h.bf16 %v404_v4 }
 0x470   : > { %v3204_v6 = vpop.f32.mrf.mxu2  ;;  %v3244_v53 = vpop.f32.mrf.mxu3 }
 0x471   : > { %v3205_v17 = vadd.f32 %v7093_v14, %v3204_v6  ;;  %v3245_v27 = vadd.f32 %v7093_v14, %v3244_v53 }
 0x473   : > { %v3306_v40 = vadd.f32 %v3274_v7, %v3205_v17  ;;  %v3322_v9 = vadd.f32 %v3290_v22, %v3245_v27  ;;  %v420_v7 = vld [vmem:[%s3997_s25 + $0x78] sm:$0xff]   ;;  %v3281_v22 = vunpack.c.l.bf16 %v404_v4 }
 0x474   : > { %v3297_v6 = vunpack.c.l.bf16 %v420_v7 }
 0x475   : > { %3338 = vst.msk [vmem:[%s7101_s12 + $0x38] sm:$0xff] %vm507_vm1, %v3306_v40 }
 0x476   : > { %3354 = vst.msk [vmem:[%s7101_s12 + $0xb8] sm:$0xff] %vm507_vm1, %v3322_v9 }
 0x478   : > { %v3207_v46 = vpop.f32.mrf.mxu2  ;;  %v3247_v13 = vpop.f32.mrf.mxu3 }
 0x479   : > { %v3208_v42 = vadd.f32 %v7093_v14, %v3207_v46  ;;  %v3248_v50 = vadd.f32 %v7093_v14, %v3247_v13 }
 0x47b   : > { %v3307_v25 = vadd.f32 %v3275_v52, %v3208_v42  ;;  %v3323_v12 = vadd.f32 %v3291_v38, %v3248_v50  ;;  %v3298_v52 = vunpack.c.h.bf16 %v420_v7 }
 0x47d   : > { %3339 = vst.msk [vmem:[%s7101_s12 + $0x40] sm:$0xff] %vm507_vm1, %v3307_v25 }
 0x47e   : > { %3355 = vst.msk [vmem:[%s7101_s12 + $0xc0] sm:$0xff] %vm507_vm1, %v3323_v12 }
 0x480   : > { %v3209_v10 = vpop.f32.mrf.mxu2  ;;  %v3249_v63 = vpop.f32.mrf.mxu3 }
 0x481   : > { %v3210_v31 = vadd.f32 %v7093_v14, %v3209_v10  ;;  %v3250_v8 = vadd.f32 %v7093_v14, %v3249_v63 }
 0x483   : > { %v3308_v32 = vadd.f32 %v3276_v20, %v3210_v31  ;;  %v3324_v0 = vadd.f32 %v3292_v48, %v3250_v8 }
 0x485   : > { %3340 = vst.msk [vmem:[%s7101_s12 + $0x48] sm:$0xff] %vm507_vm1, %v3308_v32 }
 0x486   : > { %3356 = vst.msk [vmem:[%s7101_s12 + $0xc8] sm:$0xff] %vm507_vm1, %v3324_v0 }
 0x488   : > { %v3212_v23 = vpop.f32.mrf.mxu2  ;;  %v3252_v5 = vpop.f32.mrf.mxu3 }
 0x489   : > { %v3213_v49 = vadd.f32 %v7093_v14, %v3212_v23  ;;  %v3253_v37 = vadd.f32 %v7093_v14, %v3252_v5 }
 0x48b   : > { %v3309_v55 = vadd.f32 %v3277_v15, %v3213_v49  ;;  %v3325_v35 = vadd.f32 %v3293_v16, %v3253_v37 }
 0x48d   : > { %3341 = vst.msk [vmem:[%s7101_s12 + $0x50] sm:$0xff] %vm507_vm1, %v3309_v55 }
 0x48e   : > { %3357 = vst.msk [vmem:[%s7101_s12 + $0xd0] sm:$0xff] %vm507_vm1, %v3325_v35 }
 0x490   : > { %v3214_v44 = vpop.f32.mrf.mxu2  ;;  %v3254_v33 = vpop.f32.mrf.mxu3 }
 0x491   : > { %v3215_v47 = vadd.f32 %v7093_v14, %v3214_v44  ;;  %v3255_v43 = vadd.f32 %v7093_v14, %v3254_v33 }
 0x493   : > { %v3310_v36 = vadd.f32 %v3278_v28, %v3215_v47  ;;  %v3326_v54 = vadd.f32 %v3294_v26, %v3255_v43 }
 0x495   : > { %3342 = vst.msk [vmem:[%s7101_s12 + $0x58] sm:$0xff] %vm507_vm1, %v3310_v36 }
 0x496   : > { %3358 = vst.msk [vmem:[%s7101_s12 + $0xd8] sm:$0xff] %vm507_vm1, %v3326_v54 }
 0x498   : > { %v3217_v29 = vpop.f32.mrf.mxu2  ;;  %v3257_v57 = vpop.f32.mrf.mxu3 }
 0x499   : > { %v3218_v3 = vadd.f32 %v7093_v14, %v3217_v29  ;;  %v3258_v51 = vadd.f32 %v7093_v14, %v3257_v57 }
 0x49b   : > { %v3311_v61 = vadd.f32 %v3279_v60, %v3218_v3  ;;  %v3327_v56 = vadd.f32 %v3295_v21, %v3258_v51 }
 0x49d   : > { %3343 = vst.msk [vmem:[%s7101_s12 + $0x60] sm:$0xff] %vm507_vm1, %v3311_v61 }
 0x49e   : > { %3359 = vst.msk [vmem:[%s7101_s12 + $0xe0] sm:$0xff] %vm507_vm1, %v3327_v56 }
 0x4a0   : > { %v3219_v18 = vpop.f32.mrf.mxu2  ;;  %v3259_v59 = vpop.f32.mrf.mxu3 }
 0x4a1   : > { %v3220_v11 = vadd.f32 %v7093_v14, %v3219_v18  ;;  %v3260_v24 = vadd.f32 %v7093_v14, %v3259_v59 }
 0x4a3   : > { %v3312_v34 = vadd.f32 %v3280_v39, %v3220_v11  ;;  %v3328_v19 = vadd.f32 %v3296_v1, %v3260_v24 }
 0x4a5   : > { %3344 = vst.msk [vmem:[%s7101_s12 + $0x68] sm:$0xff] %vm507_vm1, %v3312_v34 }
 0x4a6   : > { %3360 = vst.msk [vmem:[%s7101_s12 + $0xe8] sm:$0xff] %vm507_vm1, %v3328_v19 }
 0x4a8   : > { %v3222_v53 = vpop.f32.mrf.mxu2  ;;  %v3262_v17 = vpop.f32.mrf.mxu3 }
 0x4a9   : > { %v3223_v27 = vadd.f32 %v7093_v14, %v3222_v53  ;;  %v3263_v40 = vadd.f32 %v7093_v14, %v3262_v17 }
 0x4ab   : > { %v3313_v9 = vadd.f32 %v3281_v22, %v3223_v27  ;;  %v3329_v58 = vadd.f32 %v3297_v6, %v3263_v40 }
 0x4ad   : > { %3345 = vst.msk [vmem:[%s7101_s12 + $0x70] sm:$0xff] %vm507_vm1, %v3313_v9 }
 0x4ae   : > { %3361 = vst.msk [vmem:[%s7101_s12 + $0xf0] sm:$0xff] %vm507_vm1, %v3329_v58 }
 0x4b0   : > { %v3224_v38 = vpop.f32.mrf.mxu2  ;;  %v3264_v46 = vpop.f32.mrf.mxu3 }
 0x4b1   : > { %v3225_v13 = vadd.f32 %v7093_v14, %v3224_v38  ;;  %v3265_v42 = vadd.f32 %v7093_v14, %v3264_v46 }
 0x4b3   : > { %v3314_v50 = vadd.f32 %v3282_v41, %v3225_v13  ;;  %v3330_v25 = vadd.f32 %v3298_v52, %v3265_v42 }
 0x4b5   : > { %3346 = vst.msk [vmem:[%s7101_s12 + $0x78] sm:$0xff] %vm507_vm1, %v3314_v50 }
 0x4b6   : > { %3362 = vst.msk [vmem:[%s7101_s12 + $0xf8] sm:$0xff] %vm507_vm1, %v3330_v25 }
 0x4b7 PF: > { %s23_s19 = sadd.s32 1, %s3913_s19  }
 0x4b8   : > { %p20_p4 = scmp.ge.s32.totalorder %s23_s19, 4  }
 0x4ba   :  { %22 = sbr.rel (!%p20_p4) target bundleno = 3 (0x3), region = 97 }

</bundles_post_ra>
